<compile_context>
chip_gen: v5e
topology: v5e:2x2
jax: 0.10.0
libtpu: 0.0.40
codegen_flags: <defaults>
</compile_context>

<pallas_src>
import jax
import jax.numpy as jnp
from jax.experimental import pallas as pl
from jax.experimental.pallas import tpu as pltpu

EMBED_DIM = 768
HID1 = 512
HID2 = 256
LN_EPS = 1e-5


def _round_up(x, m):
    return ((x + m - 1) // m) * m


def _cif_kernel(x_ref, w1_ref, b1_ref, w2_ref, b2_ref, w3_ref, b3_ref,
                gamma_ref, beta_ref, o_ref):
    # In-kernel downcast: x arrives in its HBM dtype (f32 or bf16) and is cast
    # to bf16 right before the MXU (no separate wrapper pass over x).
    x = x_ref[...].astype(jnp.bfloat16)

    h1 = jnp.dot(x, w1_ref[...], preferred_element_type=jnp.float32)
    h1 = jnp.maximum(h1 + b1_ref[...], 0.0)                    # (TM, 512) f32

    h2 = jnp.dot(h1.astype(jnp.bfloat16), w2_ref[...],
                 preferred_element_type=jnp.float32)
    h2 = jnp.maximum(h2 + b2_ref[...], 0.0)                    # (TM, 256) f32

    h3 = jnp.dot(h2.astype(jnp.bfloat16), w3_ref[...],
                 preferred_element_type=jnp.float32)
    h3 = h3 + b3_ref[...]                                      # (TM, 768) f32

    # LayerNorm over features, all in f32.  Variance = E[x^2] - mean^2 so the
    # two reductions are independent (XLU overlap); clamp guards tiny negative
    # round-off.  Biased variance + eps=1e-5 matches torch.nn.LayerNorm.
    s1 = jnp.mean(h3, axis=-1, keepdims=True)                  # (TM, 1)
    s2 = jnp.mean(h3 * h3, axis=-1, keepdims=True)             # (TM, 1)
    var = jnp.maximum(s2 - s1 * s1, 0.0)
    inv_std = jax.lax.rsqrt(var + LN_EPS)                      # EUP rsqrt
    y = (h3 - s1) * (inv_std * gamma_ref[...]) + beta_ref[...]

    o_ref[...] = y.astype(o_ref.dtype)


def _pick_tile_rows(M):
    if M <= 128:
        # Tiny inputs: single grid step, padded to a 16-row multiple so bf16
        # tiles (output, or bf16 producer input) use unmasked packed vld/vst.
        return _round_up(M, 16)
    if M <= 1024:
        # Exactly two grid steps: both v7x TensorCores get work through the
        # "parallel" row axis while each step stays large enough to amortize
        # the ~0.35 us per-step overhead.
        return _round_up(pl.cdiv(M, 2), 16)
    # Large inputs: 512-row tiles (~85% of HBM roofline; 256 only reaches ~63%).
    # ~11 MiB/step of VMEM including double-buffered f32 input and bf16 output,
    # comfortably inside the scoped default on v5e/v6e/v7x.
    return 512


def context_isolation_forward(x2d, params, *, tile_rows=None,
                              out_dtype=jnp.bfloat16):
    """x2d: (M, EMBED_DIM) float array (f32 or bf16). Returns (M, EMBED_DIM)."""
    M, E = x2d.shape
    assert E == EMBED_DIM
    w1, b1, w2, b2, w3, b3, gamma, beta = params

    if tile_rows is None:
        tile_rows = _pick_tile_rows(M)

    M_pad = _round_up(M, tile_rows)
    if M_pad != M:
        x2d = jnp.pad(x2d, ((0, M_pad - M), (0, 0)))

    # Weights go to the MXU as bf16 (cast once here, tiny); biases + LN stay f32.
    w1b = w1.astype(jnp.bfloat16)
    w2b = w2.astype(jnp.bfloat16)
    w3b = w3.astype(jnp.bfloat16)

    const = lambda i: (0, 0)   # constant block index -> no re-DMA across steps
    grid = (M_pad // tile_rows,)

    out = pl.pallas_call(
        _cif_kernel,
        out_shape=jax.ShapeDtypeStruct((M_pad, E), out_dtype),
        grid_spec=pltpu.PrefetchScalarGridSpec(
            num_scalar_prefetch=0,
            grid=grid,
            in_specs=[
                pl.BlockSpec((tile_rows, E), lambda i: (i, 0)),   # x tile (producer dtype)
                pl.BlockSpec((E, HID1), const),                   # w1 (bf16)
                pl.BlockSpec((1, HID1), const),                   # b1 (f32)
                pl.BlockSpec((HID1, HID2), const),                # w2 (bf16)
                pl.BlockSpec((1, HID2), const),                   # b2 (f32)
                pl.BlockSpec((HID2, E), const),                   # w3 (bf16)
                pl.BlockSpec((1, E), const),                      # b3 (f32)
                pl.BlockSpec((1, E), const),                      # gamma (f32)
                pl.BlockSpec((1, E), const),                      # beta (f32)
            ],
            out_specs=pl.BlockSpec((tile_rows, E), lambda i: (i, 0)),
        ),
        compiler_params=pltpu.CompilerParams(
            dimension_semantics=("parallel",)),
    )(x2d, w1b, b1, w2b, b2, w3b, b3, gamma, beta)

    return out[:M] if M_pad != M else out


def make_params(key):
    """Deterministic synthetic parameters (PyTorch-style uniform fan-in init)."""
    ks = jax.random.split(key, 6)

    def linear(kw, kb, fan_in, fan_out):
        bound = 1.0 / jnp.sqrt(fan_in)
        w = jax.random.uniform(kw, (fan_in, fan_out), jnp.float32, -bound, bound)
        b = jax.random.uniform(kb, (1, fan_out), jnp.float32, -bound, bound)
        return w, b

    w1, b1 = linear(ks[0], ks[1], EMBED_DIM, HID1)
    w2, b2 = linear(ks[2], ks[3], HID1, HID2)
    w3, b3 = linear(ks[4], ks[5], HID2, EMBED_DIM)
    gamma = jnp.ones((1, EMBED_DIM), jnp.float32)   # LayerNorm weight init
    beta = jnp.zeros((1, EMBED_DIM), jnp.float32)   # LayerNorm bias init
    return (w1, b1, w2, b2, w3, b3, gamma, beta)


def reference_forward(x2d, params, compute_dtype=jnp.float32):
    """Pure-JAX reference; compute_dtype=bf16 mirrors the kernel's MXU path."""
    w1, b1, w2, b2, w3, b3, gamma, beta = params
    cd = compute_dtype
    h = jnp.dot(x2d.astype(cd), w1.astype(cd),
                preferred_element_type=jnp.float32) + b1
    h = jnp.maximum(h, 0.0)
    h = jnp.dot(h.astype(cd), w2.astype(cd),
                preferred_element_type=jnp.float32) + b2
    h = jnp.maximum(h, 0.0)
    h = jnp.dot(h.astype(cd), w3.astype(cd),
                preferred_element_type=jnp.float32) + b3
    mean = jnp.mean(h, -1, keepdims=True)
    var = jnp.mean((h - mean) ** 2, -1, keepdims=True)
    return (h - mean) * jax.lax.rsqrt(var + LN_EPS) * gamma + beta


if __name__ == "__main__":
    key = jax.random.PRNGKey(0)
    k_x, k_x2, k_p = jax.random.split(key, 3)
    params = make_params(k_p)

    # Small embeddings batch (single-grid-step path): (2, 8, 768)
    batch, seq = 2, 8
    x = jax.random.normal(k_x, (batch, seq, EMBED_DIM), jnp.float32)
    x2d = x.reshape(batch * seq, EMBED_DIM)

    ref_bf16 = reference_forward(x2d, params, jnp.bfloat16)
    ref_f32 = reference_forward(x2d, params, jnp.float32)

    # (a) Production config: bf16 output.  Tolerance covers bf16 output rounding.
    out2d = context_isolation_forward(x2d, params)            # bf16 out
    out = out2d.reshape(batch, seq, EMBED_DIM)
    jax.block_until_ready(out)
    assert out2d.dtype == jnp.bfloat16
    assert jnp.allclose(out2d.astype(jnp.float32), ref_bf16, atol=2e-2, rtol=2e-2), \
        "bf16-output mismatch vs bf16-matched reference"

    # (b) Exact-math check: f32 output path, tight tolerance vs bf16-matched ref,
    #     loose sanity check vs the full-f32 reference (bf16 operand quantization).
    out2d_f32 = context_isolation_forward(x2d, params, out_dtype=jnp.float32)
    jax.block_until_ready(out2d_f32)
    assert jnp.allclose(out2d_f32, ref_bf16, atol=2e-3, rtol=2e-3), \
        "f32-output mismatch vs bf16-matched reference"
    assert jnp.allclose(out2d_f32, ref_f32, atol=1e-1, rtol=1e-1), \
        "mismatch vs f32 reference"

    # (c) Tiled / padded path: M=600 -> tile_rows=304, padded to 608, 2 grid steps
    #     (feeds both v7x TensorCores), bf16 output.
    x_big = jax.random.normal(k_x2, (600, EMBED_DIM), jnp.float32)
    out_big = context_isolation_forward(x_big, params)
    jax.block_until_ready(out_big)
    ref_big = reference_forward(x_big, params, jnp.bfloat16)
    assert out_big.shape == (600, EMBED_DIM)
    assert jnp.allclose(out_big.astype(jnp.float32), ref_big, atol=2e-2, rtol=2e-2), \
        "mismatch vs bf16-matched reference (tiled path)"

    print("KERNEL_OK")
</pallas_src>

<mosaic_0001>
module attributes {stable_mosaic.version = 11 : i64} {
  func.func @_cif_kernel(%arg0: i32, %arg1: memref<16x768xf32, #tpu.memory_space<vmem>>, %arg2: memref<768x512xbf16, #tpu.memory_space<vmem>>, %arg3: memref<1x512xf32, #tpu.memory_space<vmem>>, %arg4: memref<512x256xbf16, #tpu.memory_space<vmem>>, %arg5: memref<1x256xf32, #tpu.memory_space<vmem>>, %arg6: memref<256x768xbf16, #tpu.memory_space<vmem>>, %arg7: memref<1x768xf32, #tpu.memory_space<vmem>>, %arg8: memref<1x768xf32, #tpu.memory_space<vmem>>, %arg9: memref<1x768xf32, #tpu.memory_space<vmem>>, %arg10: memref<16x768xbf16, #tpu.memory_space<vmem>>) attributes {dimension_semantics = [#tpu.dimension_semantics<parallel>], iteration_bounds = array<i64: 1>, scalar_prefetch = 0 : i64, scratch_operands = 0 : i64, tpu.core_type = #tpu.core_type<tc>, window_params = [{transform_indices = @transform_0, window_bounds = array<i64: 16, 768>}, {pipeline_mode = #tpu.pipeline_mode<synchronous>, transform_indices = @transform_1, window_bounds = array<i64: 768, 512>}, {pipeline_mode = #tpu.pipeline_mode<synchronous>, transform_indices = @transform_2, window_bounds = array<i64: 1, 512>}, {pipeline_mode = #tpu.pipeline_mode<synchronous>, transform_indices = @transform_3, window_bounds = array<i64: 512, 256>}, {pipeline_mode = #tpu.pipeline_mode<synchronous>, transform_indices = @transform_4, window_bounds = array<i64: 1, 256>}, {pipeline_mode = #tpu.pipeline_mode<synchronous>, transform_indices = @transform_5, window_bounds = array<i64: 256, 768>}, {pipeline_mode = #tpu.pipeline_mode<synchronous>, transform_indices = @transform_6, window_bounds = array<i64: 1, 768>}, {pipeline_mode = #tpu.pipeline_mode<synchronous>, transform_indices = @transform_7, window_bounds = array<i64: 1, 768>}, {pipeline_mode = #tpu.pipeline_mode<synchronous>, transform_indices = @transform_8, window_bounds = array<i64: 1, 768>}, {transform_indices = @transform_9, window_bounds = array<i64: 16, 768>}]} {
    %c0 = arith.constant 0 : index
    %c0_0 = arith.constant 0 : index
    %0 = vector.load %arg1[%c0, %c0_0] : memref<16x768xf32, #tpu.memory_space<vmem>>, vector<16x768xf32>
    %1 = arith.truncf %0 : vector<16x768xf32> to vector<16x768xbf16>
    %c0_1 = arith.constant 0 : index
    %c0_2 = arith.constant 0 : index
    %2 = vector.load %arg2[%c0_1, %c0_2] : memref<768x512xbf16, #tpu.memory_space<vmem>>, vector<768x512xbf16>
    %cst = arith.constant dense<0.000000e+00> : vector<16x512xf32>
    %3 = tpu.matmul %1, %2, %cst {dimension_numbers = #tpu.dot_dimension_numbers<[1], [0], [0], [1], [0, 0, 1, 1], [], []>} : vector<16x768xbf16>, vector<768x512xbf16>, vector<16x512xf32> -> vector<16x512xf32>
    %c0_3 = arith.constant 0 : index
    %c0_4 = arith.constant 0 : index
    %4 = vector.load %arg3[%c0_3, %c0_4] : memref<1x512xf32, #tpu.memory_space<vmem>>, vector<1x512xf32>
    %5 = vector.broadcast %4 : vector<1x512xf32> to vector<16x512xf32>
    %6 = arith.addf %3, %5 : vector<16x512xf32>
    %cst_5 = arith.constant 0.000000e+00 : f32
    %7 = vector.broadcast %cst_5 : f32 to vector<16x512xf32>
    %8 = arith.maximumf %6, %7 : vector<16x512xf32>
    %9 = arith.truncf %8 : vector<16x512xf32> to vector<16x512xbf16>
    %c0_6 = arith.constant 0 : index
    %c0_7 = arith.constant 0 : index
    %10 = vector.load %arg4[%c0_6, %c0_7] : memref<512x256xbf16, #tpu.memory_space<vmem>>, vector<512x256xbf16>
    %cst_8 = arith.constant dense<0.000000e+00> : vector<16x256xf32>
    %11 = tpu.matmul %9, %10, %cst_8 {dimension_numbers = #tpu.dot_dimension_numbers<[1], [0], [0], [1], [0, 0, 1, 1], [], []>} : vector<16x512xbf16>, vector<512x256xbf16>, vector<16x256xf32> -> vector<16x256xf32>
    %c0_9 = arith.constant 0 : index
    %c0_10 = arith.constant 0 : index
    %12 = vector.load %arg5[%c0_9, %c0_10] : memref<1x256xf32, #tpu.memory_space<vmem>>, vector<1x256xf32>
    %13 = vector.broadcast %12 : vector<1x256xf32> to vector<16x256xf32>
    %14 = arith.addf %11, %13 : vector<16x256xf32>
    %cst_11 = arith.constant 0.000000e+00 : f32
    %15 = vector.broadcast %cst_11 : f32 to vector<16x256xf32>
    %16 = arith.maximumf %14, %15 : vector<16x256xf32>
    %17 = arith.truncf %16 : vector<16x256xf32> to vector<16x256xbf16>
    %c0_12 = arith.constant 0 : index
    %c0_13 = arith.constant 0 : index
    %18 = vector.load %arg6[%c0_12, %c0_13] : memref<256x768xbf16, #tpu.memory_space<vmem>>, vector<256x768xbf16>
    %cst_14 = arith.constant dense<0.000000e+00> : vector<16x768xf32>
    %19 = tpu.matmul %17, %18, %cst_14 {dimension_numbers = #tpu.dot_dimension_numbers<[1], [0], [0], [1], [0, 0, 1, 1], [], []>} : vector<16x256xbf16>, vector<256x768xbf16>, vector<16x768xf32> -> vector<16x768xf32>
    %c0_15 = arith.constant 0 : index
    %c0_16 = arith.constant 0 : index
    %20 = vector.load %arg7[%c0_15, %c0_16] : memref<1x768xf32, #tpu.memory_space<vmem>>, vector<1x768xf32>
    %21 = vector.broadcast %20 : vector<1x768xf32> to vector<16x768xf32>
    %22 = arith.addf %19, %21 : vector<16x768xf32>
    %cst_17 = arith.constant dense<0.000000e+00> : vector<16xf32>
    %23 = vector.multi_reduction <add>, %22, %cst_17 [1] : vector<16x768xf32> to vector<16xf32>
    %24 = vector.shape_cast %23 : vector<16xf32> to vector<16x1xf32>
    %cst_18 = arith.constant 7.680000e+02 : f32
    %25 = vector.broadcast %cst_18 : f32 to vector<16x1xf32>
    %26 = arith.divf %24, %25 : vector<16x1xf32>
    %27 = arith.mulf %22, %22 : vector<16x768xf32>
    %cst_19 = arith.constant dense<0.000000e+00> : vector<16xf32>
    %28 = vector.multi_reduction <add>, %27, %cst_19 [1] : vector<16x768xf32> to vector<16xf32>
    %29 = vector.shape_cast %28 : vector<16xf32> to vector<16x1xf32>
    %cst_20 = arith.constant 7.680000e+02 : f32
    %30 = vector.broadcast %cst_20 : f32 to vector<16x1xf32>
    %31 = arith.divf %29, %30 : vector<16x1xf32>
    %32 = arith.mulf %26, %26 : vector<16x1xf32>
    %33 = arith.subf %31, %32 : vector<16x1xf32>
    %cst_21 = arith.constant 0.000000e+00 : f32
    %34 = vector.broadcast %cst_21 : f32 to vector<16x1xf32>
    %35 = arith.maximumf %33, %34 : vector<16x1xf32>
    %cst_22 = arith.constant 9.99999974E-6 : f32
    %36 = vector.broadcast %cst_22 : f32 to vector<16x1xf32>
    %37 = arith.addf %35, %36 : vector<16x1xf32>
    %38 = math.rsqrt %37 : vector<16x1xf32>
    %39 = vector.broadcast %26 : vector<16x1xf32> to vector<16x768xf32>
    %40 = arith.subf %22, %39 : vector<16x768xf32>
    %c0_23 = arith.constant 0 : index
    %c0_24 = arith.constant 0 : index
    %41 = vector.load %arg8[%c0_23, %c0_24] : memref<1x768xf32, #tpu.memory_space<vmem>>, vector<1x768xf32>
    %42 = vector.broadcast %38 : vector<16x1xf32> to vector<16x768xf32>
    %43 = vector.broadcast %41 : vector<1x768xf32> to vector<16x768xf32>
    %44 = arith.mulf %42, %43 : vector<16x768xf32>
    %45 = arith.mulf %40, %44 : vector<16x768xf32>
    %c0_25 = arith.constant 0 : index
    %c0_26 = arith.constant 0 : index
    %46 = vector.load %arg9[%c0_25, %c0_26] : memref<1x768xf32, #tpu.memory_space<vmem>>, vector<1x768xf32>
    %47 = vector.broadcast %46 : vector<1x768xf32> to vector<16x768xf32>
    %48 = arith.addf %45, %47 : vector<16x768xf32>
    %49 = arith.truncf %48 : vector<16x768xf32> to vector<16x768xbf16>
    %c0_27 = arith.constant 0 : index
    %c0_28 = arith.constant 0 : index
    %50 = vector.load %arg10[%c0_27, %c0_28] : memref<16x768xbf16, #tpu.memory_space<vmem>>, vector<16x768xbf16>
    tpu.vector_store %arg10[%c0_27, %c0_28], %49 {strides = array<i32>} : memref<16x768xbf16, #tpu.memory_space<vmem>>, vector<16x768xbf16>,
    return
  }
  func.func @transform_0(%arg0: i32) -> (i32, i32) {
    %c0_i32 = arith.constant 0 : i32
    %c0_i32_0 = arith.constant 0 : i32
    return %arg0, %c0_i32 : i32, i32
  }
  func.func @transform_1(%arg0: i32) -> (i32, i32) {
    %c0_i32 = arith.constant 0 : i32
    %c0_i32_0 = arith.constant 0 : i32
    %c0_i32_1 = arith.constant 0 : i32
    return %c0_i32, %c0_i32_0 : i32, i32
  }
  func.func @transform_2(%arg0: i32) -> (i32, i32) {
    %c0_i32 = arith.constant 0 : i32
    %c0_i32_0 = arith.constant 0 : i32
    %c0_i32_1 = arith.constant 0 : i32
    return %c0_i32, %c0_i32_0 : i32, i32
  }
  func.func @transform_3(%arg0: i32) -> (i32, i32) {
    %c0_i32 = arith.constant 0 : i32
    %c0_i32_0 = arith.constant 0 : i32
    %c0_i32_1 = arith.constant 0 : i32
    return %c0_i32, %c0_i32_0 : i32, i32
  }
  func.func @transform_4(%arg0: i32) -> (i32, i32) {
    %c0_i32 = arith.constant 0 : i32
    %c0_i32_0 = arith.constant 0 : i32
    %c0_i32_1 = arith.constant 0 : i32
    return %c0_i32, %c0_i32_0 : i32, i32
  }
  func.func @transform_5(%arg0: i32) -> (i32, i32) {
    %c0_i32 = arith.constant 0 : i32
    %c0_i32_0 = arith.constant 0 : i32
    %c0_i32_1 = arith.constant 0 : i32
    return %c0_i32, %c0_i32_0 : i32, i32
  }
  func.func @transform_6(%arg0: i32) -> (i32, i32) {
    %c0_i32 = arith.constant 0 : i32
    %c0_i32_0 = arith.constant 0 : i32
    %c0_i32_1 = arith.constant 0 : i32
    return %c0_i32, %c0_i32_0 : i32, i32
  }
  func.func @transform_7(%arg0: i32) -> (i32, i32) {
    %c0_i32 = arith.constant 0 : i32
    %c0_i32_0 = arith.constant 0 : i32
    %c0_i32_1 = arith.constant 0 : i32
    return %c0_i32, %c0_i32_0 : i32, i32
  }
  func.func @transform_8(%arg0: i32) -> (i32, i32) {
    %c0_i32 = arith.constant 0 : i32
    %c0_i32_0 = arith.constant 0 : i32
    %c0_i32_1 = arith.constant 0 : i32
    return %c0_i32, %c0_i32_0 : i32, i32
  }
  func.func @transform_9(%arg0: i32) -> (i32, i32) {
    %c0_i32 = arith.constant 0 : i32
    %c0_i32_0 = arith.constant 0 : i32
    return %arg0, %c0_i32 : i32, i32
  }
}

</mosaic_0001>

<bundles_post_ra>
// kernel: tpu_custom_call.1
= control target key start
LH: loop header
LB: loop body
LE: loop exit
PB: predicated region body
PF: predicated region fallthrough
CT: control target
= control target key end

     0   :  { %14 = vsyncpa [#allocation3], 0  ;;  %s5455_s0 = inlined_call_operand.hbm [shape: f32[16,768], index: 0, kind: input, shape index: {}]   ;;  %s5456_s1 = inlined_call_operand.hbm [shape: bf16[768,512], index: 1, kind: input, shape index: {}]   ;;  %s5457_s2 = inlined_call_operand.hbm [shape: f32[1,512], index: 2, kind: input, shape index: {}]   ;;  %s5458_s3 = inlined_call_operand.hbm [shape: bf16[512,256], index: 3, kind: input, shape index: {}]   ;;  %s5459_s4 = inlined_call_operand.hbm [shape: f32[1,256], index: 4, kind: input, shape index: {}]   ;;  %s5460_s5 = inlined_call_operand.hbm [shape: bf16[256,768], index: 5, kind: input, shape index: {}]   ;;  %s5461_s6 = inlined_call_operand.hbm [shape: f32[1,768], index: 6, kind: input, shape index: {}]   ;;  %s5462_s7 = inlined_call_operand.vmem [shape: f32[1,768], index: 7, kind: input, shape index: {}]   ;;  %s5463_s8 = inlined_call_operand.hbm [shape: f32[1,768], index: 8, kind: input, shape index: {}]   ;;  %s5464_s9 = inlined_call_operand.hbm [shape: bf16[16,768], index: 9, kind: output, shape index: {}]  }
   0x1   :  { %15 = vsyncpa [#allocation6], 0 }
   0x2   :  { %16 = vsyncpa [#allocation9], 0 }
   0x3   :  { %17 = vsyncpa [#allocation12], 0 }
   0x4   :  { %18 = vsyncpa [#allocation15], 0  ;;  %s37_s11 = sshll.u32 %s5456_s1, 4  ;;  %s38_s11 = int_to_ptr.hbm [resolvable:$true] %s37_s11 }
   0x5   :  { %19 = vsyncpa [#allocation4], 0  ;;  %s5146_s12 = smov [#allocation5]   ;;  %s61_s16 = sshll.u32 %s5458_s3, 4  ;;  %s62_s16 = int_to_ptr.hbm [resolvable:$true] %s61_s16 }
   0x6   :  { %s39_s13 = sshll.u32 %s5146_s12, 4  ;;  %s5147_s17 = smov 256   ;;  %s40_s13 = int_to_ptr.vmem [resolvable:$true] %s39_s13 }
   0x7   :  { %s5148_s18 = smov 16   ;;  %s5149_s19 = smov [#allocation8]  }
   0x8   :  { %45 = dma.hbm_to_vmem [thread:$0]  %s38_s11, 24576, %s40_s13, [#allocation6], %s5147_s17, %s5147_s17, %s5148_s18  }
   0x9   :  { %s63_s20 = sshll.u32 %s5149_s19, 4  ;;  %s5150_s21 = smov 128   ;;  %s64_s20 = int_to_ptr.vmem [resolvable:$true] %s63_s20 }
   0xa   :  { %s5151_s22 = smov 8   ;;  %s85_s24 = sshll.u32 %s5460_s5, 4  ;;  %s86_s24 = int_to_ptr.hbm [resolvable:$true] %s85_s24 }
   0xb   :  { %69 = dma.hbm_to_vmem [thread:$0]  %s62_s16, 8192, %s64_s20, [#allocation9], %s5150_s21, %s5150_s21, %s5151_s22  }
   0xc   :  { %s5152_s25 = smov [#allocation11]   ;;  %s24_s28 = sshll.u32 %s5455_s0, 4  ;;  %s25_s28 = int_to_ptr.hbm [resolvable:$true] %s24_s28 }
   0xd   :  { %s87_s26 = sshll.u32 %s5152_s25, 4  ;;  %s5153_s29 = smov 384   ;;  %s88_s26 = int_to_ptr.vmem [resolvable:$true] %s87_s26 }
   0xe   :  { %s5154_s30 = smov 24   ;;  %s5155_s10 = smov [#allocation2]  }
   0xf   :  { %93 = dma.hbm_to_vmem [thread:$0]  %s86_s24, 12288, %s88_s26, [#allocation12], %s5153_s29, %s5153_s29, %s5154_s30  }
  0x10   :  { %s26_s11 = sshll.u32 %s5155_s10, 4  ;;  %s5156_s12 = smov 768   ;;  %s27_s11 = int_to_ptr.vmem [resolvable:$true] %s26_s11 }
  0x11   :  { %s5157_s5 = smov 48   ;;  %s51_s15 = sshll.u32 %s5457_s2, 4  ;;  %s52_s15 = int_to_ptr.hbm [resolvable:$true] %s51_s15 }
  0x12   :  { %32 = dma.hbm_to_vmem [thread:$0]  %s25_s28, 1536, %s27_s11, [#allocation3], %s5156_s12, %s5156_s12, %s5157_s5  }
  0x13   :  { %s5158_s16 = smov [#allocation7]   ;;  %s75_s19 = sshll.u32 %s5459_s4, 4  ;;  %s76_s19 = int_to_ptr.hbm [resolvable:$true] %s75_s19 }
  0x14   :  { %s53_s0 = sshll.u32 %s5158_s16, 4  ;;  %s5159_s20 = smov [#allocation10]   ;;  %s54_s0 = int_to_ptr.vmem [resolvable:$true] %s53_s0 }
  0x15   :  { %56 = dma.hbm_to_vmem [thread:$0]  %s52_s15, 64, %s54_s0, [#allocation6]  }
  0x16   :  { %s77_s21 = sshll.u32 %s5159_s20, 4  ;;  %s99_s23 = sshll.u32 %s5461_s6, 4  ;;  %s78_s21 = int_to_ptr.vmem [resolvable:$true] %s77_s21  ;;  %s100_s23 = int_to_ptr.hbm [resolvable:$true] %s99_s23 }
  0x17   :  { %80 = dma.hbm_to_vmem [thread:$0]  %s76_s19, 32, %s78_s21, [#allocation9]  }
  0x18   :  { %s112_s25 = sshll.u32 %s5463_s8, 4  ;;  %s5160_s26 = smov [#allocation13]   ;;  %s113_s25 = int_to_ptr.hbm [resolvable:$true] %s112_s25 }
  0x19   :  { %s101_s27 = sshll.u32 %s5160_s26, 4  ;;  %s5161_s4 = smov [#allocation14]   ;;  %s102_s27 = int_to_ptr.vmem [resolvable:$true] %s101_s27 }
  0x1a   :  { %104 = dma.hbm_to_vmem [thread:$0]  %s100_s23, 96, %s102_s27, [#allocation12]  }
  0x1b   :  { %s114_s3 = sshll.u32 %s5161_s4, 4  ;;  %s115_s3 = int_to_ptr.vmem [resolvable:$true] %s114_s3 }
  0x1c   :  { %117 = dma.hbm_to_vmem [thread:$0]  %s113_s25, 96, %s115_s3, [#allocation15]  }
  0x1d   :  { %5134 = dma.done.wait [#allocation3], 1536  }
  0x1e   :  { %5135 = vsyncadd [#allocation3], 4294965760 }
  0x1f   :  { %5136 = dma.done.wait [#allocation6], 24640  }
  0x20   :  { %5137 = vsyncadd [#allocation6], 4294942656 }
  0x21   :  { %5138 = dma.done.wait [#allocation9], 8224  }
  0x22   :  { %5139 = vsyncadd [#allocation9], 4294959072 }
  0x23   :  { %5140 = dma.done.wait [#allocation12], 12384  }
  0x24   :  { %5141 = vsyncadd [#allocation12], 4294954912 }
  0x25   :  { %5142 = dma.done.wait [#allocation15], 96  }
  0x26   :  { %5143 = vsyncadd [#allocation15], 4294967200  ;;  %v3248_v0 = vld [vmem:[#allocation5 + $0xe0] sm:$0xf]  ;;  %v4572_v1 = vld [vmem:[#allocation5 + $0xec] sm:$0xf0] }
  0x27   :  { %v3376_v2 = vld [vmem:[#allocation5 + $0x1e0] sm:$0xf]  ;;  %v3249_v3 = vor.u32 %v4572_v1, %v3248_v0  ;;  %v4604_v4 = vld [vmem:[#allocation5 + $0x1ec] sm:$0xf0]  ;;  %s3117_s12 = sshll.u32 %s5464_s9, 4  ;;  %s3118_s12 = int_to_ptr.hbm [resolvable:$true] %s3117_s12 }
  0x28   :  { %v3504_v5 = vld [vmem:[#allocation5 + $0x2e0] sm:$0xf]  ;;  %v4636_v6 = vld [vmem:[#allocation5 + $0x2ec] sm:$0xf0]  ;;  %v3377_v7 = vor.u32 %v4604_v4, %v3376_v2 }
  0x29   :  { %v3505_v8 = vor.u32 %v4636_v6, %v3504_v5  ;;  %v3632_v9 = vld [vmem:[#allocation5 + $0x3e0] sm:$0xf]  ;;  %v4668_v10 = vld [vmem:[#allocation5 + $0x3ec] sm:$0xf0]  ;;  %1330 = vmatpush.bf16.msra.mxu0 %v3249_v3 }
  0x2a   :  { %v3232_v11 = vld [vmem:[#allocation5 + $0xc0] sm:$0xf]  ;;  %v3633_v12 = vor.u32 %v4668_v10, %v3632_v9  ;;  %v4568_v13 = vld [vmem:[#allocation5 + $0xcc] sm:$0xf0]  ;;  %1344 = vmatpush.bf16.msra.mxu1 %v3377_v7 }
  0x2b   :  { %v3360_v14 = vld [vmem:[#allocation5 + $0x1c0] sm:$0xf]  ;;  %v4600_v15 = vld [vmem:[#allocation5 + $0x1cc] sm:$0xf0]  ;;  %1358 = vmatpush.bf16.msra.mxu2 %v3505_v8  ;;  %v3233_v16 = vor.u32 %v4568_v13, %v3232_v11 }
  0x2c   :  { %v3361_v17 = vor.u32 %v4600_v15, %v3360_v14  ;;  %v3488_v18 = vld [vmem:[#allocation5 + $0x2c0] sm:$0xf]  ;;  %v4632_v19 = vld [vmem:[#allocation5 + $0x2cc] sm:$0xf0]  ;;  %1372 = vmatpush.bf16.msra.mxu3 %v3633_v12 }
  0x2d   :  { %v3616_v20 = vld [vmem:[#allocation5 + $0x3c0] sm:$0xf]  ;;  %v3489_v21 = vor.u32 %v4632_v19, %v3488_v18  ;;  %v4664_v22 = vld [vmem:[#allocation5 + $0x3cc] sm:$0xf0]  ;;  %1331 = vmatpush.bf16.msra.mxu0 %v3233_v16 }
  0x2e   :  { %v3216_v23 = vld [vmem:[#allocation5 + $0xa0] sm:$0xf]  ;;  %v4564_v24 = vld [vmem:[#allocation5 + $0xac] sm:$0xf0]  ;;  %v3617_v25 = vor.u32 %v4664_v22, %v3616_v20  ;;  %1345 = vmatpush.bf16.msra.mxu1 %v3361_v17 }
  0x2f   :  { %v3344_v26 = vld [vmem:[#allocation5 + $0x1a0] sm:$0xf]  ;;  %v4596_v27 = vld [vmem:[#allocation5 + $0x1ac] sm:$0xf0]  ;;  %v3217_v29 = vor.u32 %v4564_v24, %v3216_v23  ;;  %1359 = vmatpush.bf16.msra.mxu2 %v3489_v21 }
  0x30   :  { %v3472_v28 = vld [vmem:[#allocation5 + $0x2a0] sm:$0xf]  ;;  %v4628_v30 = vld [vmem:[#allocation5 + $0x2ac] sm:$0xf0]  ;;  %v3345_v33 = vor.u32 %v4596_v27, %v3344_v26  ;;  %1373 = vmatpush.bf16.msra.mxu3 %v3617_v25 }
  0x31   :  { %v3600_v31 = vld [vmem:[#allocation5 + $0x3a0] sm:$0xf]  ;;  %v4660_v32 = vld [vmem:[#allocation5 + $0x3ac] sm:$0xf0]  ;;  %v3473_v34 = vor.u32 %v4628_v30, %v3472_v28  ;;  %1332 = vmatpush.bf16.msra.mxu0 %v3217_v29 }
  0x32   :  { %v3200_v35 = vld [vmem:[#allocation5 + $0x80] sm:$0xf]  ;;  %v4560_v36 = vld [vmem:[#allocation5 + $0x8c] sm:$0xf0]  ;;  %v3601_v38 = vor.u32 %v4660_v32, %v3600_v31  ;;  %1346 = vmatpush.bf16.msra.mxu1 %v3345_v33  ;;  %v4570_v33 = vld [vmem:[#allocation5 + $0xe4] sm:$0xf] }
  0x33   :  { %v3328_v37 = vld [vmem:[#allocation5 + $0x180] sm:$0xf]  ;;  %v4592_v39 = vld [vmem:[#allocation5 + $0x18c] sm:$0xf0]  ;;  %v3201_v44 = vor.u32 %v4560_v36, %v3200_v35  ;;  %1360 = vmatpush.bf16.msra.mxu2 %v3473_v34  ;;  %v3250_v34 = vld [vmem:[#allocation5 + $0xf0] sm:$0xf0] }
  0x34   :  { %v3456_v40 = vld [vmem:[#allocation5 + $0x280] sm:$0xf]  ;;  %v4624_v41 = vld [vmem:[#allocation5 + $0x28c] sm:$0xf0]  ;;  %v3329_v45 = vor.u32 %v4592_v39, %v3328_v37  ;;  %1374 = vmatpush.bf16.msra.mxu3 %v3601_v38  ;;  %v4602_v37 = vld [vmem:[#allocation5 + $0x1e4] sm:$0xf] }
  0x35   :  { %v3584_v42 = vld [vmem:[#allocation5 + $0x380] sm:$0xf]  ;;  %v4656_v43 = vld [vmem:[#allocation5 + $0x38c] sm:$0xf0]  ;;  %v3457_v46 = vor.u32 %v4624_v41, %v3456_v40  ;;  %1333 = vmatpush.bf16.msra.mxu0 %v3201_v44  ;;  %v3378_v38 = vld [vmem:[#allocation5 + $0x1f0] sm:$0xf0] }
  0x36   :  { %v3184_v47 = vld [vmem:[#allocation5 + $0x60] sm:$0xf]  ;;  %v4556_v48 = vld [vmem:[#allocation5 + $0x6c] sm:$0xf0]  ;;  %v3585_v50 = vor.u32 %v4656_v43, %v3584_v42  ;;  %1347 = vmatpush.bf16.msra.mxu1 %v3329_v45  ;;  %v3253_v43 = vor.u32 %v4570_v33, %v3250_v34  ;;  %v3186_v33 = vld [vmem:[#allocation5 + $0x70] sm:$0xf0] }
  0x37   :  { %v3312_v49 = vld [vmem:[#allocation5 + $0x160] sm:$0xf]  ;;  %v4588_v51 = vld [vmem:[#allocation5 + $0x16c] sm:$0xf0]  ;;  %v3185_v56 = vor.u32 %v4556_v48, %v3184_v47  ;;  %1361 = vmatpush.bf16.msra.mxu2 %v3457_v46  ;;  %v3381_v47 = vor.u32 %v4602_v37, %v3378_v38  ;;  %v4566_v48 = vld [vmem:[#allocation5 + $0xc4] sm:$0xf] }
  0x38   :  { %v3440_v52 = vld [vmem:[#allocation5 + $0x260] sm:$0xf]  ;;  %v4620_v53 = vld [vmem:[#allocation5 + $0x26c] sm:$0xf0]  ;;  %v3313_v57 = vor.u32 %v4588_v51, %v3312_v49  ;;  %1375 = vmatpush.bf16.msra.mxu3 %v3585_v50  ;;  %v3234_v49 = vld [vmem:[#allocation5 + $0xd0] sm:$0xf0] }
  0x39   :  { %v3568_v54 = vld [vmem:[#allocation5 + $0x360] sm:$0xf]  ;;  %v4652_v55 = vld [vmem:[#allocation5 + $0x36c] sm:$0xf0]  ;;  %v3441_v58 = vor.u32 %v4620_v53, %v3440_v52  ;;  %1334 = vmatpush.bf16.msra.mxu0 %v3185_v56  ;;  %v4598_v50 = vld [vmem:[#allocation5 + $0x1c4] sm:$0xf] }
  0x3a   :  { %v3168_v59 = vld [vmem:[#allocation5 + $0x40] sm:$0xf]  ;;  %v4552_v60 = vld [vmem:[#allocation5 + $0x4c] sm:$0xf0]  ;;  %v3569_v62 = vor.u32 %v4652_v55, %v3568_v54  ;;  %1348 = vmatpush.bf16.msra.mxu1 %v3313_v57  ;;  %v3362_v51 = vld [vmem:[#allocation5 + $0x1d0] sm:$0xf0] }
  0x3b   :  { %v3296_v61 = vld [vmem:[#allocation5 + $0x140] sm:$0xf]  ;;  %v4584_v63 = vld [vmem:[#allocation5 + $0x14c] sm:$0xf0]  ;;  %v3169_v4 = vor.u32 %v4552_v60, %v3168_v59  ;;  %1362 = vmatpush.bf16.msra.mxu2 %v3441_v58  ;;  %v3237_v59 = vor.u32 %v4566_v48, %v3234_v49  ;;  %v4586_v34 = vld [vmem:[#allocation5 + $0x164] sm:$0xf] }
  0x3c   :  { %v3424_v0 = vld [vmem:[#allocation5 + $0x240] sm:$0xf]  ;;  %v4616_v1 = vld [vmem:[#allocation5 + $0x24c] sm:$0xf0]  ;;  %v3297_v5 = vor.u32 %v4584_v63, %v3296_v61  ;;  %1376 = vmatpush.bf16.msra.mxu3 %v3569_v62  ;;  %v4562_v62 = vld [vmem:[#allocation5 + $0xa4] sm:$0xf]  ;;  %v3365_v63 = vor.u32 %v4598_v50, %v3362_v51 }
  0x3d   :  { %v3552_v2 = vld [vmem:[#allocation5 + $0x340] sm:$0xf]  ;;  %v4648_v3 = vld [vmem:[#allocation5 + $0x34c] sm:$0xf0]  ;;  %v3425_v6 = vor.u32 %v4616_v1, %v3424_v0  ;;  %1335 = vmatpush.bf16.msra.mxu0 %v3169_v4  ;;  %v3218_v0 = vld [vmem:[#allocation5 + $0xb0] sm:$0xf0] }
  0x3e   :  { %v3152_v7 = vld [vmem:[#allocation5 + $0x20] sm:$0xf]  ;;  %v4548_v8 = vld [vmem:[#allocation5 + $0x2c] sm:$0xf0]  ;;  %v3553_v10 = vor.u32 %v4648_v3, %v3552_v2  ;;  %1349 = vmatpush.bf16.msra.mxu1 %v3297_v5  ;;  %v151_v1 = vld [vmem:[#allocation2 + $0x8] sm:$0xff] }
  0x3f   :  { %v3280_v9 = vld [vmem:[#allocation5 + $0x120] sm:$0xf]  ;;  %v4580_v11 = vld [vmem:[#allocation5 + $0x12c] sm:$0xf0]  ;;  %v3153_v16 = vor.u32 %v4548_v8, %v3152_v7  ;;  %1363 = vmatpush.bf16.msra.mxu2 %v3425_v6  ;;  %v157_v2 = vld [vmem:[#allocation2 + $0x38] sm:$0xff] }
  0x40   :  { %v3408_v12 = vld [vmem:[#allocation5 + $0x220] sm:$0xf]  ;;  %v4612_v13 = vld [vmem:[#allocation5 + $0x22c] sm:$0xf0]  ;;  %v3281_v19 = vor.u32 %v4580_v11, %v3280_v9  ;;  %1377 = vmatpush.bf16.msra.mxu3 %v3553_v10  ;;  %v4594_v3 = vld [vmem:[#allocation5 + $0x1a4] sm:$0xf]  ;;  %v5244_v6 = vpack.c.bf16 %v157_v2, %v151_v1 }
  0x41   :  { %v3536_v14 = vld [vmem:[#allocation5 + $0x320] sm:$0xf]  ;;  %v4644_v15 = vld [vmem:[#allocation5 + $0x32c] sm:$0xf0]  ;;  %v3409_v20 = vor.u32 %v4612_v13, %v3408_v12  ;;  %1336 = vmatpush.bf16.msra.mxu0 %v3153_v16  ;;  %v3346_v4 = vld [vmem:[#allocation5 + $0x1b0] sm:$0xf0]  ;;  %v3221_v12 = vor.u32 %v4562_v62, %v3218_v0 }
  0x42   :  { %v3136_v17 = vld [vmem:[#allocation5] sm:$0xf]  ;;  %v4544_v18 = vld [vmem:[#allocation5 + $0xc] sm:$0xf0]  ;;  %v3537_v24 = vor.u32 %v4644_v15, %v3536_v14  ;;  %1350 = vmatpush.bf16.msra.mxu1 %v3281_v19  ;;  %v4558_v13 = vld [vmem:[#allocation5 + $0x84] sm:$0xf]  ;;  %v3349_v16 = vor.u32 %v4594_v3, %v3346_v4 }
  0x43   :  { %v3264_v21 = vld [vmem:[#allocation5 + $0x100] sm:$0xf]  ;;  %v4576_v22 = vld [vmem:[#allocation5 + $0x10c] sm:$0xf0]  ;;  %v3137_v31 = vor.u32 %v4544_v18, %v3136_v17  ;;  %1364 = vmatpush.bf16.msra.mxu2 %v3409_v20  ;;  %v3202_v14 = vld [vmem:[#allocation5 + $0x90] sm:$0xf0] }
  0x44   :  { %v3392_v23 = vld [vmem:[#allocation5 + $0x200] sm:$0xf]  ;;  %v4608_v25 = vld [vmem:[#allocation5 + $0x20c] sm:$0xf0]  ;;  %v3265_v35 = vor.u32 %v4576_v22, %v3264_v21  ;;  %1378 = vmatpush.bf16.msra.mxu3 %v3537_v24  ;;  %v153_v18 = vld [vmem:[#allocation2 + $0x18] sm:$0xff] }
  0x45   :  { %v3520_v26 = vld [vmem:[#allocation5 + $0x300] sm:$0xf]  ;;  %v4640_v27 = vld [vmem:[#allocation5 + $0x30c] sm:$0xf0]  ;;  %v3393_v36 = vor.u32 %v4608_v25, %v3392_v23  ;;  %1337 = vmatpush.bf16.msra.mxu0 %v3137_v31  ;;  %v159_v19 = vld [vmem:[#allocation2 + $0x48] sm:$0xff] }
  0x46   :  { %v3760_v28 = vld [vmem:[#allocation5 + $0x4e0] sm:$0xf]  ;;  %v4700_v29 = vld [vmem:[#allocation5 + $0x4ec] sm:$0xf0]  ;;  %v3521_v39 = vor.u32 %v4640_v27, %v3520_v26  ;;  %1351 = vmatpush.bf16.msra.mxu1 %v3265_v35  ;;  %v4590_v20 = vld [vmem:[#allocation5 + $0x184] sm:$0xf]  ;;  %v5249_v23 = vpack.c.bf16 %v159_v19, %v153_v18  ;;  %v3205_v26 = vor.u32 %v4558_v13, %v3202_v14 }
  0x47   :  { %v3888_v30 = vld [vmem:[#allocation5 + $0x5e0] sm:$0xf]  ;;  %v4732_v32 = vld [vmem:[#allocation5 + $0x5ec] sm:$0xf0]  ;;  %v3761_v40 = vor.u32 %v4700_v29, %v3760_v28  ;;  %1365 = vmatpush.bf16.msra.mxu2 %v3393_v36  ;;  %v3330_v21 = vld [vmem:[#allocation5 + $0x190] sm:$0xf0] }
  0x48   :  { %v3744_v41 = vld [vmem:[#allocation5 + $0x4c0] sm:$0xf]  ;;  %v3889_v42 = vor.u32 %v4732_v32, %v3888_v30  ;;  %v4696_v44 = vld [vmem:[#allocation5 + $0x4cc] sm:$0xf0]  ;;  %1379 = vmatpush.bf16.msra.mxu3 %v3521_v39  ;;  %v3333_v30 = vor.u32 %v4590_v20, %v3330_v21  ;;  %v4554_v32 = vld [vmem:[#allocation5 + $0x64] sm:$0xf] }
  0x49   :  { %v3872_v45 = vld [vmem:[#allocation5 + $0x5c0] sm:$0xf]  ;;  %v4728_v46 = vld [vmem:[#allocation5 + $0x5cc] sm:$0xf0]  ;;  %1386 = vmatpush.bf16.msrb.mxu0 %v3761_v40  ;;  %v3745_v54 = vor.u32 %v4696_v44, %v3744_v41  ;;  %1352 = vmatmul.bf16.vlgmr.msra.gmra.mxu1 %v5244_v6  ;;  %v3314_v35 = vld [vmem:[#allocation5 + $0x170] sm:$0xf0]  ;;  %v3189_v38 = vor.u32 %v4554_v32, %v3186_v33 }
  0x4a   :  { %v150_v52 = vld [vmem:[#allocation2] sm:$0xff]  ;;  %v156_v53 = vld [vmem:[#allocation2 + $0x30] sm:$0xff]  ;;  %1400 = vmatpush.bf16.msrb.mxu1 %v3889_v42  ;;  %v3873_v58 = vor.u32 %v4728_v46, %v3872_v45  ;;  %v3317_v42 = vor.u32 %v4586_v34, %v3314_v35 }
  0x4b   :  { %v3728_v55 = vld [vmem:[#allocation5 + $0x4a0] sm:$0xf]  ;;  %v4692_v56 = vld [vmem:[#allocation5 + $0x4ac] sm:$0xf0]  ;;  %v5241_v57 = vpack.c.bf16 %v156_v53, %v150_v52  ;;  %1414 = vmatpush.bf16.msrb.mxu2 %v3253_v43  ;;  %1380 = vmatmul.bf16.vlgmr.msra.gmra.mxu3 %v5249_v23  ;;  %v4550_v44 = vld [vmem:[#allocation5 + $0x44] sm:$0xf] }
  0x4c   :  { %v3856_v60 = vld [vmem:[#allocation5 + $0x5a0] sm:$0xf]  ;;  %v4724_v61 = vld [vmem:[#allocation5 + $0x5ac] sm:$0xf0]  ;;  %1428 = vmatpush.bf16.msrb.mxu3 %v3381_v47  ;;  %v3729_v7 = vor.u32 %v4692_v56, %v3728_v55  ;;  %v3170_v45 = vld [vmem:[#allocation5 + $0x50] sm:$0xf0] }
  0x4d   :  { %1338 = vmatmul.bf16.vlgmr.msra.gmra.mxu0 %v5241_v57  ;;  %v3712_v5 = vld [vmem:[#allocation5 + $0x480] sm:$0xf]  ;;  %v4688_v8 = vld [vmem:[#allocation5 + $0x48c] sm:$0xf0]  ;;  %v3857_v11 = vor.u32 %v4724_v61, %v3856_v60  ;;  %v4582_v46 = vld [vmem:[#allocation5 + $0x144] sm:$0xf]  ;;  %v3173_v50 = vor.u32 %v4550_v44, %v3170_v45 }
  0x4e   :  { %1387 = vmatpush.bf16.msrb.mxu0 %v3745_v54  ;;  %v3840_v9 = vld [vmem:[#allocation5 + $0x580] sm:$0xf]  ;;  %v4720_v10 = vld [vmem:[#allocation5 + $0x58c] sm:$0xf0]  ;;  %1401 = vmatpush.bf16.msrb.mxu1 %v3873_v58  ;;  %v3713_v24 = vor.u32 %v4688_v8, %v3712_v5  ;;  %v3298_v47 = vld [vmem:[#allocation5 + $0x150] sm:$0xf0] }
  0x4f   :  { %1415 = vmatpush.bf16.msrb.mxu2 %v3237_v59  ;;  %v152_v15 = vld [vmem:[#allocation2 + $0x10] sm:$0xff]  ;;  %v158_v17 = vld [vmem:[#allocation2 + $0x40] sm:$0xff]  ;;  %v3841_v25 = vor.u32 %v4720_v10, %v3840_v9  ;;  %v3301_v54 = vor.u32 %v4582_v46, %v3298_v47 }
  0x50   :  { %1429 = vmatpush.bf16.msrb.mxu3 %v3365_v63  ;;  %v5247_v22 = vpack.c.bf16 %v158_v17, %v152_v15  ;;  %v3696_v27 = vld [vmem:[#allocation5 + $0x460] sm:$0xf]  ;;  %v4684_v28 = vld [vmem:[#allocation5 + $0x46c] sm:$0xf0]  ;;  %v4546_v56 = vld [vmem:[#allocation5 + $0x24] sm:$0xf] }
  0x51   :  { %v3824_v29 = vld [vmem:[#allocation5 + $0x560] sm:$0xf]  ;;  %v4716_v31 = vld [vmem:[#allocation5 + $0x56c] sm:$0xf0]  ;;  %v3697_v36 = vor.u32 %v4684_v28, %v3696_v27  ;;  %v3154_v58 = vld [vmem:[#allocation5 + $0x30] sm:$0xf0] }
  0x52   :  { %1388 = vmatpush.bf16.msrb.mxu0 %v3729_v7  ;;  %1402 = vmatpush.bf16.msrb.mxu1 %v3857_v11  ;;  %v3825_v37 = vor.u32 %v4716_v31, %v3824_v29  ;;  %v3680_v39 = vld [vmem:[#allocation5 + $0x440] sm:$0xf]  ;;  %v4680_v40 = vld [vmem:[#allocation5 + $0x44c] sm:$0xf0]  ;;  %v4578_v59 = vld [vmem:[#allocation5 + $0x124] sm:$0xf]  ;;  %v3157_v2 = vor.u32 %v4546_v56, %v3154_v58 }
  0x53   :  { %1416 = vmatpush.bf16.msrb.mxu2 %v3221_v12  ;;  %v3808_v41 = vld [vmem:[#allocation5 + $0x540] sm:$0xf]  ;;  %v4712_v43 = vld [vmem:[#allocation5 + $0x54c] sm:$0xf0]  ;;  %v3681_v48 = vor.u32 %v4680_v40, %v3680_v39  ;;  %v3282_v60 = vld [vmem:[#allocation5 + $0x130] sm:$0xf0] }
  0x54   :  { %1430 = vmatpush.bf16.msrb.mxu3 %v3349_v16  ;;  %1366 = vmatmul.bf16.vlgmr.msra.gmra.mxu2 %v5247_v22  ;;  %v3809_v49 = vor.u32 %v4712_v43, %v3808_v41  ;;  %v3664_v51 = vld [vmem:[#allocation5 + $0x420] sm:$0xf]  ;;  %v4676_v52 = vld [vmem:[#allocation5 + $0x42c] sm:$0xf0]  ;;  %v4542_v4 = vld [vmem:[#allocation5 + $0x4] sm:$0xf]  ;;  %v3285_v7 = vor.u32 %v4578_v59, %v3282_v60 }
  0x55   :  { %v3792_v53 = vld [vmem:[#allocation5 + $0x520] sm:$0xf]  ;;  %v4708_v55 = vld [vmem:[#allocation5 + $0x52c] sm:$0xf0]  ;;  %v3665_v61 = vor.u32 %v4676_v52, %v3664_v51  ;;  %v3138_v5 = vld [vmem:[#allocation5 + $0x10] sm:$0xf0] }
  0x56   :  { %1389 = vmatpush.bf16.msrb.mxu0 %v3713_v24  ;;  %1403 = vmatpush.bf16.msrb.mxu1 %v3841_v25  ;;  %v3648_v62 = vld [vmem:[#allocation5 + $0x400] sm:$0xf]  ;;  %v4672_v63 = vld [vmem:[#allocation5 + $0x40c] sm:$0xf0]  ;;  %v3793_v1 = vor.u32 %v4708_v55, %v3792_v53  ;;  %v4574_v8 = vld [vmem:[#allocation5 + $0x104] sm:$0xf]  ;;  %v3141_v19 = vor.u32 %v4542_v4, %v3138_v5 }
  0x57   :  { %1417 = vmatpush.bf16.msrb.mxu2 %v3205_v26  ;;  %v3776_v0 = vld [vmem:[#allocation5 + $0x500] sm:$0xf]  ;;  %v4704_v3 = vld [vmem:[#allocation5 + $0x50c] sm:$0xf0]  ;;  %v3266_v9 = vld [vmem:[#allocation5 + $0x110] sm:$0xf0]  ;;  %v3649_v14 = vor.u32 %v4672_v63, %v3648_v62 }
  0x58   :  { %1431 = vmatpush.bf16.msrb.mxu3 %v3333_v30  ;;  %v4634_v10 = vld [vmem:[#allocation5 + $0x2e4] sm:$0xf]  ;;  %v3506_v11 = vld [vmem:[#allocation5 + $0x2f0] sm:$0xf0]  ;;  %v3777_v18 = vor.u32 %v4704_v3, %v3776_v0  ;;  %v3269_v25 = vor.u32 %v4574_v8, %v3266_v9  ;;  %v155_v27 = vld [vmem:[#allocation2 + $0x28] sm:$0xff] }
  0x59   :  { %v4666_v12 = vld [vmem:[#allocation5 + $0x3e4] sm:$0xf]  ;;  %v3634_v13 = vld [vmem:[#allocation5 + $0x3f0] sm:$0xf0]  ;;  %v3509_v26 = vor.u32 %v4634_v10, %v3506_v11  ;;  %v161_v28 = vld [vmem:[#allocation2 + $0x58] sm:$0xff] }
  0x5a   :  { %1390 = vmatpush.bf16.msrb.mxu0 %v3697_v36  ;;  %1404 = vmatpush.bf16.msrb.mxu1 %v3825_v37  ;;  %v4698_v15 = vld [vmem:[#allocation5 + $0x4e4] sm:$0xf]  ;;  %v3762_v16 = vld [vmem:[#allocation5 + $0x4f0] sm:$0xf0]  ;;  %v3637_v29 = vor.u32 %v4666_v12, %v3634_v13  ;;  %v5255_v39 = vpack.c.bf16 %v161_v28, %v155_v27 }
  0x5b   :  { %1418 = vmatpush.bf16.msrb.mxu2 %v3189_v38  ;;  %v4730_v17 = vld [vmem:[#allocation5 + $0x5e4] sm:$0xf]  ;;  %v3890_v20 = vld [vmem:[#allocation5 + $0x5f0] sm:$0xf0]  ;;  %v3765_v30 = vor.u32 %v4698_v15, %v3762_v16 }
  0x5c   :  { %1432 = vmatpush.bf16.msrb.mxu3 %v3317_v42  ;;  %v154_v21 = vld [vmem:[#allocation2 + $0x20] sm:$0xff]  ;;  %v160_v24 = vld [vmem:[#allocation2 + $0x50] sm:$0xff]  ;;  %v3893_v34 = vor.u32 %v4730_v17, %v3890_v20 }
  0x5d   :  { %v4630_v31 = vld [vmem:[#allocation5 + $0x2c4] sm:$0xf]  ;;  %v3490_v32 = vld [vmem:[#allocation5 + $0x2d0] sm:$0xf0]  ;;  %v5253_v35 = vpack.c.bf16 %v160_v24, %v154_v21 }
  0x5e   :  { %1391 = vmatpush.bf16.msrb.mxu0 %v3681_v48  ;;  %1405 = vmatpush.bf16.msrb.mxu1 %v3809_v49  ;;  %v4662_v33 = vld [vmem:[#allocation5 + $0x3c4] sm:$0xf]  ;;  %v3618_v36 = vld [vmem:[#allocation5 + $0x3d0] sm:$0xf0]  ;;  %v3493_v42 = vor.u32 %v4630_v31, %v3490_v32 }
  0x5f   :  { %1419 = vmatpush.bf16.msrb.mxu2 %v3173_v50  ;;  %v4694_v37 = vld [vmem:[#allocation5 + $0x4c4] sm:$0xf]  ;;  %v3746_v38 = vld [vmem:[#allocation5 + $0x4d0] sm:$0xf0]  ;;  %v3621_v43 = vor.u32 %v4662_v33, %v3618_v36 }
  0x60   :  { %1433 = vmatpush.bf16.msrb.mxu3 %v3301_v54  ;;  %v4726_v40 = vld [vmem:[#allocation5 + $0x5c4] sm:$0xf]  ;;  %v3874_v41 = vld [vmem:[#allocation5 + $0x5d0] sm:$0xf0]  ;;  %v3749_v44 = vor.u32 %v4694_v37, %v3746_v38 }
  0x61   :  { %v4626_v45 = vld [vmem:[#allocation5 + $0x2a4] sm:$0xf]  ;;  %v3474_v46 = vld [vmem:[#allocation5 + $0x2b0] sm:$0xf0]  ;;  %v3877_v48 = vor.u32 %v4726_v40, %v3874_v41 }
  0x62   :  { %1392 = vmatpush.bf16.msrb.mxu0 %v3665_v61  ;;  %1406 = vmatpush.bf16.msrb.mxu1 %v3793_v1  ;;  %v4658_v47 = vld [vmem:[#allocation5 + $0x3a4] sm:$0xf]  ;;  %v3602_v49 = vld [vmem:[#allocation5 + $0x3b0] sm:$0xf0]  ;;  %v3477_v54 = vor.u32 %v4626_v45, %v3474_v46 }
  0x63   :  { %1420 = vmatpush.bf16.msrb.mxu2 %v3157_v2  ;;  %v4690_v50 = vld [vmem:[#allocation5 + $0x4a4] sm:$0xf]  ;;  %v3730_v51 = vld [vmem:[#allocation5 + $0x4b0] sm:$0xf0]  ;;  %v3605_v55 = vor.u32 %v4658_v47, %v3602_v49 }
  0x64   :  { %1434 = vmatpush.bf16.msrb.mxu3 %v3285_v7  ;;  %v4722_v52 = vld [vmem:[#allocation5 + $0x5a4] sm:$0xf]  ;;  %v3858_v53 = vld [vmem:[#allocation5 + $0x5b0] sm:$0xf0]  ;;  %v3733_v56 = vor.u32 %v4690_v50, %v3730_v51 }
  0x65   :  { %v4622_v58 = vld [vmem:[#allocation5 + $0x284] sm:$0xf]  ;;  %v3458_v59 = vld [vmem:[#allocation5 + $0x290] sm:$0xf0]  ;;  %v3861_v61 = vor.u32 %v4722_v52, %v3858_v53 }
  0x66   :  { %1393 = vmatpush.bf16.msrb.mxu0 %v3649_v14  ;;  %1407 = vmatpush.bf16.msrb.mxu1 %v3777_v18  ;;  %v4654_v60 = vld [vmem:[#allocation5 + $0x384] sm:$0xf]  ;;  %v3586_v62 = vld [vmem:[#allocation5 + $0x390] sm:$0xf0]  ;;  %v3461_v3 = vor.u32 %v4622_v58, %v3458_v59  ;;  %v4573_v58 = vld [vmem:[#allocation5 + $0xf4] sm:$0xf0] }
  0x67   :  { %1421 = vmatpush.bf16.msrb.mxu2 %v3141_v19  ;;  %v4686_v63 = vld [vmem:[#allocation5 + $0x484] sm:$0xf]  ;;  %v3714_v0 = vld [vmem:[#allocation5 + $0x490] sm:$0xf0]  ;;  %v3589_v4 = vor.u32 %v4654_v60, %v3586_v62  ;;  %v3384_v59 = vld [vmem:[#allocation5 + $0x1e8] sm:$0xf] }
  0x68   :  { %1435 = vmatpush.bf16.msrb.mxu3 %v3269_v25  ;;  %v4718_v1 = vld [vmem:[#allocation5 + $0x584] sm:$0xf]  ;;  %v3842_v2 = vld [vmem:[#allocation5 + $0x590] sm:$0xf0]  ;;  %v3717_v5 = vor.u32 %v4686_v63, %v3714_v0  ;;  %v3512_v62 = vld [vmem:[#allocation5 + $0x2e8] sm:$0xf] }
  0x69   :  { %1394 = vmatmul.bf16.vlgmr.msrb.gmra.mxu0 %v5253_v35  ;;  %1408 = vmatmul.bf16.vlgmr.msrb.gmra.mxu1 %v5255_v39  ;;  %v4618_v7 = vld [vmem:[#allocation5 + $0x264] sm:$0xf]  ;;  %v3442_v8 = vld [vmem:[#allocation5 + $0x270] sm:$0xf0]  ;;  %v3845_v10 = vor.u32 %v4718_v1, %v3842_v2  ;;  %v4637_v63 = vld [vmem:[#allocation5 + $0x2f4] sm:$0xf0] }
  0x6a   :  { %1442 = vmatpush.bf16.msra.mxu0 %v3509_v26  ;;  %1456 = vmatpush.bf16.msra.mxu1 %v3637_v29  ;;  %v4650_v9 = vld [vmem:[#allocation5 + $0x364] sm:$0xf]  ;;  %v3570_v11 = vld [vmem:[#allocation5 + $0x370] sm:$0xf0]  ;;  %v3445_v16 = vor.u32 %v4618_v7, %v3442_v8  ;;  %v3640_v2 = vld [vmem:[#allocation5 + $0x3e8] sm:$0xf]  ;;  %v3513_v8 = vor.u32 %v4637_v63, %v3512_v62 }
  0x6b   :  { %1470 = vmatpush.bf16.msra.mxu2 %v3765_v30  ;;  %1436 = vmatmul.bf16.vlgmr.msrb.gmra.mxu3 %v5244_v6  ;;  %v4682_v12 = vld [vmem:[#allocation5 + $0x464] sm:$0xf]  ;;  %v3698_v13 = vld [vmem:[#allocation5 + $0x470] sm:$0xf0]  ;;  %v3573_v17 = vor.u32 %v4650_v9, %v3570_v11  ;;  %v3240_v9 = vld [vmem:[#allocation5 + $0xc8] sm:$0xf] }
  0x6c   :  { %1484 = vmatpush.bf16.msra.mxu3 %v3893_v34  ;;  %1422 = vmatmul.bf16.vlgmr.msrb.gmra.mxu2 %v5241_v57  ;;  %v4714_v14 = vld [vmem:[#allocation5 + $0x564] sm:$0xf]  ;;  %v3826_v15 = vld [vmem:[#allocation5 + $0x570] sm:$0xf0]  ;;  %v3701_v18 = vor.u32 %v4682_v12, %v3698_v13  ;;  %v3368_v11 = vld [vmem:[#allocation5 + $0x1c8] sm:$0xf] }
  0x6d   :  { %v4614_v19 = vld [vmem:[#allocation5 + $0x244] sm:$0xf]  ;;  %v3426_v20 = vld [vmem:[#allocation5 + $0x250] sm:$0xf0]  ;;  %v3829_v24 = vor.u32 %v4714_v14, %v3826_v15  ;;  %v4601_v13 = vld [vmem:[#allocation5 + $0x1d4] sm:$0xf0] }
  0x6e   :  { %1443 = vmatpush.bf16.msra.mxu0 %v3493_v42  ;;  %1457 = vmatpush.bf16.msra.mxu1 %v3621_v43  ;;  %v4646_v21 = vld [vmem:[#allocation5 + $0x344] sm:$0xf]  ;;  %v3554_v25 = vld [vmem:[#allocation5 + $0x350] sm:$0xf0]  ;;  %v3429_v30 = vor.u32 %v4614_v19, %v3426_v20  ;;  %v3496_v14 = vld [vmem:[#allocation5 + $0x2c8] sm:$0xf]  ;;  %v3369_v19 = vor.u32 %v4601_v13, %v3368_v11 }
  0x6f   :  { %1471 = vmatpush.bf16.msra.mxu2 %v3749_v44  ;;  %v4678_v26 = vld [vmem:[#allocation5 + $0x444] sm:$0xf]  ;;  %v3682_v27 = vld [vmem:[#allocation5 + $0x450] sm:$0xf0]  ;;  %v3557_v31 = vor.u32 %v4646_v21, %v3554_v25  ;;  %v4633_v15 = vld [vmem:[#allocation5 + $0x2d4] sm:$0xf0] }
  0x70   :  { %1485 = vmatpush.bf16.msra.mxu3 %v3877_v48  ;;  %v4710_v28 = vld [vmem:[#allocation5 + $0x544] sm:$0xf]  ;;  %v3810_v29 = vld [vmem:[#allocation5 + $0x550] sm:$0xf0]  ;;  %v3685_v32 = vor.u32 %v4678_v26, %v3682_v27  ;;  %v3497_v20 = vor.u32 %v4633_v15, %v3496_v14  ;;  %v3224_v21 = vld [vmem:[#allocation5 + $0xa8] sm:$0xf] }
  0x71   :  { %v4610_v33 = vld [vmem:[#allocation5 + $0x224] sm:$0xf]  ;;  %v3410_v34 = vld [vmem:[#allocation5 + $0x230] sm:$0xf0]  ;;  %v3813_v37 = vor.u32 %v4710_v28, %v3810_v29  ;;  %v3352_v25 = vld [vmem:[#allocation5 + $0x1a8] sm:$0xf] }
  0x72   :  { %1444 = vmatpush.bf16.msra.mxu0 %v3477_v54  ;;  %1458 = vmatpush.bf16.msra.mxu1 %v3605_v55  ;;  %v4642_v36 = vld [vmem:[#allocation5 + $0x324] sm:$0xf]  ;;  %v3538_v38 = vld [vmem:[#allocation5 + $0x330] sm:$0xf0]  ;;  %v3413_v44 = vor.u32 %v4610_v33, %v3410_v34  ;;  %v4597_v27 = vld [vmem:[#allocation5 + $0x1b4] sm:$0xf0] }
  0x73   :  { %1472 = vmatpush.bf16.msra.mxu2 %v3733_v56  ;;  %v4674_v40 = vld [vmem:[#allocation5 + $0x424] sm:$0xf]  ;;  %v3666_v41 = vld [vmem:[#allocation5 + $0x430] sm:$0xf0]  ;;  %v3541_v47 = vor.u32 %v4642_v36, %v3538_v38  ;;  %v3256_v56 = vld [vmem:[#allocation5 + $0xe8] sm:$0xf]  ;;  %v3353_v33 = vor.u32 %v4597_v27, %v3352_v25 }
  0x74   :  { %1486 = vmatpush.bf16.msra.mxu3 %v3861_v61  ;;  %v4706_v42 = vld [vmem:[#allocation5 + $0x524] sm:$0xf]  ;;  %v3794_v43 = vld [vmem:[#allocation5 + $0x530] sm:$0xf0]  ;;  %v3669_v48 = vor.u32 %v4674_v40, %v3666_v41  ;;  %v4605_v61 = vld [vmem:[#allocation5 + $0x1f4] sm:$0xf0] }
  0x75   :  { %v4606_v45 = vld [vmem:[#allocation5 + $0x204] sm:$0xf]  ;;  %v3394_v46 = vld [vmem:[#allocation5 + $0x210] sm:$0xf0]  ;;  %v3797_v52 = vor.u32 %v4706_v42, %v3794_v43  ;;  %v3385_v7 = vor.u32 %v4605_v61, %v3384_v59  ;;  %v3480_v28 = vld [vmem:[#allocation5 + $0x2a8] sm:$0xf] }
  0x76   :  { %1445 = vmatpush.bf16.msra.mxu0 %v3461_v3  ;;  %1459 = vmatpush.bf16.msra.mxu1 %v3589_v4  ;;  %v4638_v49 = vld [vmem:[#allocation5 + $0x304] sm:$0xf]  ;;  %v3522_v50 = vld [vmem:[#allocation5 + $0x310] sm:$0xf0]  ;;  %v3397_v60 = vor.u32 %v4606_v45, %v3394_v46  ;;  %v4669_v3 = vld [vmem:[#allocation5 + $0x3f4] sm:$0xf0] }
  0x77   :  { %1473 = vmatpush.bf16.msra.mxu2 %v3717_v5  ;;  %v4670_v51 = vld [vmem:[#allocation5 + $0x404] sm:$0xf]  ;;  %v3650_v53 = vld [vmem:[#allocation5 + $0x410] sm:$0xf0]  ;;  %v3525_v0 = vor.u32 %v4638_v49, %v3522_v50  ;;  %v3257_v5 = vor.u32 %v4573_v58, %v3256_v56  ;;  %v3641_v12 = vor.u32 %v4669_v3, %v3640_v2  ;;  %v4629_v29 = vld [vmem:[#allocation5 + $0x2b4] sm:$0xf0] }
  0x78   :  { %1487 = vmatpush.bf16.msra.mxu3 %v3845_v10  ;;  %v4702_v54 = vld [vmem:[#allocation5 + $0x504] sm:$0xf]  ;;  %v3778_v55 = vld [vmem:[#allocation5 + $0x510] sm:$0xf0]  ;;  %v3653_v1 = vor.u32 %v4670_v51, %v3650_v53  ;;  %v4569_v10 = vld [vmem:[#allocation5 + $0xd4] sm:$0xf0]  ;;  %v3481_v34 = vor.u32 %v4629_v29, %v3480_v28 }
  0x79   :  { %v3781_v4 = vor.u32 %v4702_v54, %v3778_v55  ;;  %v3208_v36 = vld [vmem:[#allocation5 + $0x88] sm:$0xf]  ;;  %v4593_v41 = vld [vmem:[#allocation5 + $0x194] sm:$0xf0] }
  0x7a   :  { %1446 = vmatpush.bf16.msra.mxu0 %v3445_v16  ;;  %1460 = vmatpush.bf16.msra.mxu1 %v3573_v17  ;;  %v3624_v16 = vld [vmem:[#allocation5 + $0x3c8] sm:$0xf]  ;;  %v4665_v17 = vld [vmem:[#allocation5 + $0x3d4] sm:$0xf0] }
  0x7b   :  { %1474 = vmatpush.bf16.msra.mxu2 %v3701_v18  ;;  %v3241_v18 = vor.u32 %v4569_v10, %v3240_v9  ;;  %v3625_v26 = vor.u32 %v4665_v17, %v3624_v16  ;;  %v3336_v38 = vld [vmem:[#allocation5 + $0x188] sm:$0xf]  ;;  %v4625_v43 = vld [vmem:[#allocation5 + $0x294] sm:$0xf0] }
  0x7c   :  { %1488 = vmatpush.bf16.msra.mxu3 %v3829_v24  ;;  %v4565_v24 = vld [vmem:[#allocation5 + $0xb4] sm:$0xf0]  ;;  %v3464_v42 = vld [vmem:[#allocation5 + $0x288] sm:$0xf] }
  0x7d   :  { %v4657_v45 = vld [vmem:[#allocation5 + $0x394] sm:$0xf0]  ;;  %v3192_v49 = vld [vmem:[#allocation5 + $0x68] sm:$0xf] }
  0x7e   :  { %1447 = vmatpush.bf16.msra.mxu0 %v3429_v30  ;;  %1461 = vmatpush.bf16.msra.mxu1 %v3557_v31  ;;  %v3608_v30 = vld [vmem:[#allocation5 + $0x3a8] sm:$0xf]  ;;  %v4661_v31 = vld [vmem:[#allocation5 + $0x3b4] sm:$0xf0] }
  0x7f   :  { %1475 = vmatpush.bf16.msra.mxu2 %v3685_v32  ;;  %v3225_v32 = vor.u32 %v4565_v24, %v3224_v21  ;;  %v3609_v40 = vor.u32 %v4661_v31, %v3608_v30  ;;  %v4557_v50 = vld [vmem:[#allocation5 + $0x74] sm:$0xf0]  ;;  %v3320_v51 = vld [vmem:[#allocation5 + $0x168] sm:$0xf] }
  0x80   :  { %1489 = vmatpush.bf16.msra.mxu3 %v3813_v37  ;;  %v4561_v37 = vld [vmem:[#allocation5 + $0x94] sm:$0xf0]  ;;  %v3448_v54 = vld [vmem:[#allocation5 + $0x268] sm:$0xf]  ;;  %v3193_v59 = vor.u32 %v4557_v50, %v3192_v49 }
  0x81   :  { %v3209_v46 = vor.u32 %v4561_v37, %v3208_v36  ;;  %v4589_v53 = vld [vmem:[#allocation5 + $0x174] sm:$0xf0]  ;;  %v3576_v56 = vld [vmem:[#allocation5 + $0x368] sm:$0xf] }
  0x82   :  { %1448 = vmatpush.bf16.msra.mxu0 %v3413_v44  ;;  %1462 = vmatpush.bf16.msra.mxu1 %v3541_v47  ;;  %v3592_v44 = vld [vmem:[#allocation5 + $0x388] sm:$0xf]  ;;  %v3337_v47 = vor.u32 %v4593_v41, %v3336_v38  ;;  %v4621_v55 = vld [vmem:[#allocation5 + $0x274] sm:$0xf0]  ;;  %v4571_v41 = vld [vmem:[#allocation5 + $0xec] sm:$0xf] }
  0x83   :  { %1476 = vmatpush.bf16.msra.mxu2 %v3669_v48  ;;  %v3465_v48 = vor.u32 %v4625_v43, %v3464_v42  ;;  %v4653_v58 = vld [vmem:[#allocation5 + $0x374] sm:$0xf0]  ;;  %v3449_v61 = vor.u32 %v4621_v55, %v3448_v54  ;;  %v3176_v62 = vld [vmem:[#allocation5 + $0x48] sm:$0xf]  ;;  %v3258_v42 = vld [vmem:[#allocation5 + $0xf8] sm:$0xf0] }
  0x84   :  { %1490 = vmatpush.bf16.msra.mxu3 %v3797_v52  ;;  %v3593_v52 = vor.u32 %v4657_v45, %v3592_v44  ;;  %v4553_v63 = vld [vmem:[#allocation5 + $0x54] sm:$0xf0]  ;;  %v3432_v3 = vld [vmem:[#allocation5 + $0x248] sm:$0xf]  ;;  %v4603_v45 = vld [vmem:[#allocation5 + $0x1ec] sm:$0xf]  ;;  %v3261_v50 = vor.u32 %v4571_v41, %v3258_v42 }
  0x85   :  { %v4585_v2 = vld [vmem:[#allocation5 + $0x154] sm:$0xf0]  ;;  %v3160_v11 = vld [vmem:[#allocation5 + $0x28] sm:$0xf] }
  0x86   :  { %1449 = vmatpush.bf16.msra.mxu0 %v3397_v60  ;;  %1463 = vmatpush.bf16.msra.mxu1 %v3525_v0  ;;  %v3321_v60 = vor.u32 %v4589_v53, %v3320_v51  ;;  %v3304_v0 = vld [vmem:[#allocation5 + $0x148] sm:$0xf]  ;;  %v4581_v15 = vld [vmem:[#allocation5 + $0x134] sm:$0xf0] }
  0x87   :  { %1477 = vmatpush.bf16.msra.mxu2 %v3653_v1  ;;  %v3577_v1 = vor.u32 %v4653_v58, %v3576_v56  ;;  %v3305_v9 = vor.u32 %v4585_v2, %v3304_v0  ;;  %v3288_v13 = vld [vmem:[#allocation5 + $0x128] sm:$0xf]  ;;  %v4613_v17 = vld [vmem:[#allocation5 + $0x234] sm:$0xf0]  ;;  %v4567_v56 = vld [vmem:[#allocation5 + $0xcc] sm:$0xf] }
  0x88   :  { %1491 = vmatpush.bf16.msra.mxu3 %v3781_v4  ;;  %v4617_v4 = vld [vmem:[#allocation5 + $0x254] sm:$0xf0]  ;;  %v3416_v16 = vld [vmem:[#allocation5 + $0x228] sm:$0xf]  ;;  %v3289_v25 = vor.u32 %v4581_v15, %v3288_v13  ;;  %v3242_v58 = vld [vmem:[#allocation5 + $0xd8] sm:$0xf0] }
  0x89   :  { %1450 = vmatmul.bf16.vlgmr.msra.gmra.mxu0 %v5247_v22  ;;  %1464 = vmatmul.bf16.vlgmr.msra.gmra.mxu1 %v5249_v23  ;;  %v3433_v10 = vor.u32 %v4617_v4, %v3432_v3  ;;  %v3144_v21 = vld [vmem:[#allocation5 + $0x8] sm:$0xf]  ;;  %v4545_v24 = vld [vmem:[#allocation5 + $0x14] sm:$0xf0] }
  0x8a   :  { %1498 = vmatpush.bf16.msrb.mxu0 %v3257_v5  ;;  %1512 = vmatpush.bf16.msrb.mxu1 %v3385_v7  ;;  %v3560_v5 = vld [vmem:[#allocation5 + $0x348] sm:$0xf]  ;;  %v4649_v7 = vld [vmem:[#allocation5 + $0x354] sm:$0xf0]  ;;  %v3145_v38 = vor.u32 %v4545_v24, %v3144_v21  ;;  %v3338_v21 = vld [vmem:[#allocation5 + $0x198] sm:$0xf0] }
  0x8b   :  { %1526 = vmatpush.bf16.msrb.mxu2 %v3513_v8  ;;  %1492 = vmatmul.bf16.vlgmr.msra.gmra.mxu3 %v5255_v39  ;;  %v3177_v8 = vor.u32 %v4553_v63, %v3176_v62  ;;  %v3561_v14 = vor.u32 %v4649_v7, %v3560_v5  ;;  %v3272_v27 = vld [vmem:[#allocation5 + $0x108] sm:$0xf]  ;;  %v4577_v28 = vld [vmem:[#allocation5 + $0x114] sm:$0xf0]  ;;  %v3245_v63 = vor.u32 %v4567_v56, %v3242_v58  ;;  %v4563_v5 = vld [vmem:[#allocation5 + $0xac] sm:$0xf] }
  0x8c   :  { %1540 = vmatpush.bf16.msrb.mxu3 %v3641_v12  ;;  %1478 = vmatmul.bf16.vlgmr.msra.gmra.mxu2 %v5253_v35  ;;  %v4549_v12 = vld [vmem:[#allocation5 + $0x34] sm:$0xf0]  ;;  %v3400_v29 = vld [vmem:[#allocation5 + $0x208] sm:$0xf]  ;;  %v3273_v43 = vor.u32 %v4577_v28, %v3272_v27  ;;  %v3226_v7 = vld [vmem:[#allocation5 + $0xb8] sm:$0xf0] }
  0x8d   :  { %v4609_v31 = vld [vmem:[#allocation5 + $0x214] sm:$0xf0]  ;;  %v3896_v37 = vld [vmem:[#allocation5 + $0x5e8] sm:$0xf] }
  0x8e   :  { %1499 = vmatpush.bf16.msrb.mxu0 %v3241_v18  ;;  %1513 = vmatpush.bf16.msrb.mxu1 %v3369_v19  ;;  %v3544_v18 = vld [vmem:[#allocation5 + $0x328] sm:$0xf]  ;;  %v4645_v19 = vld [vmem:[#allocation5 + $0x334] sm:$0xf0]  ;;  %v3401_v44 = vor.u32 %v4609_v31, %v3400_v29 }
  0x8f   :  { %1527 = vmatpush.bf16.msrb.mxu2 %v3497_v20  ;;  %v3161_v20 = vor.u32 %v4549_v12, %v3160_v11  ;;  %v3545_v30 = vor.u32 %v4645_v19, %v3544_v18  ;;  %v4701_v36 = vld [vmem:[#allocation5 + $0x4f4] sm:$0xf0]  ;;  %v3752_v51 = vld [vmem:[#allocation5 + $0x4c8] sm:$0xf]  ;;  %v3229_v12 = vor.u32 %v4563_v5, %v3226_v7  ;;  %v4559_v18 = vld [vmem:[#allocation5 + $0x8c] sm:$0xf] }
  0x90   :  { %1541 = vmatpush.bf16.msrb.mxu3 %v3625_v26  ;;  %v3417_v26 = vor.u32 %v4613_v17, %v3416_v16  ;;  %v3880_v53 = vld [vmem:[#allocation5 + $0x5c8] sm:$0xf]  ;;  %v4729_v55 = vld [vmem:[#allocation5 + $0x5d4] sm:$0xf0]  ;;  %v3210_v19 = vld [vmem:[#allocation5 + $0x98] sm:$0xf0] }
  0x91   :  { %v3881_v62 = vor.u32 %v4729_v55, %v3880_v53  ;;  %v3736_v0 = vld [vmem:[#allocation5 + $0x4a8] sm:$0xf]  ;;  %v4725_v4 = vld [vmem:[#allocation5 + $0x5b4] sm:$0xf0]  ;;  %v4543_v7 = vld [vmem:[#allocation5 + $0xc] sm:$0xf] }
  0x92   :  { %1500 = vmatpush.bf16.msrb.mxu0 %v3225_v32  ;;  %1514 = vmatpush.bf16.msrb.mxu1 %v3353_v33  ;;  %v3528_v32 = vld [vmem:[#allocation5 + $0x308] sm:$0xf]  ;;  %v4641_v33 = vld [vmem:[#allocation5 + $0x314] sm:$0xf0] }
  0x93   :  { %1528 = vmatpush.bf16.msrb.mxu2 %v3481_v34  ;;  %v3768_v34 = vld [vmem:[#allocation5 + $0x4e8] sm:$0xf]  ;;  %v4721_v17 = vld [vmem:[#allocation5 + $0x594] sm:$0xf0] }
  0x94   :  { %1542 = vmatpush.bf16.msrb.mxu3 %v3609_v40  ;;  %v4733_v40 = vld [vmem:[#allocation5 + $0x5f4] sm:$0xf0]  ;;  %v3864_v2 = vld [vmem:[#allocation5 + $0x5a8] sm:$0xf] }
  0x95   :  { %v3897_v49 = vor.u32 %v4733_v40, %v3896_v37  ;;  %v3865_v11 = vor.u32 %v4725_v4, %v3864_v2  ;;  %v3720_v13 = vld [vmem:[#allocation5 + $0x488] sm:$0xf]  ;;  %v4685_v28 = vld [vmem:[#allocation5 + $0x474] sm:$0xf0] }
  0x96   :  { %1501 = vmatpush.bf16.msrb.mxu0 %v3209_v46  ;;  %1515 = vmatpush.bf16.msrb.mxu1 %v3337_v47  ;;  %v3386_v46 = vld [vmem:[#allocation5 + $0x1f8] sm:$0xf0]  ;;  %v3529_v47 = vor.u32 %v4641_v33, %v3528_v32  ;;  %v3848_v15 = vld [vmem:[#allocation5 + $0x588] sm:$0xf]  ;;  %v4717_v31 = vld [vmem:[#allocation5 + $0x574] sm:$0xf0] }
  0x97   :  { %1529 = vmatpush.bf16.msrb.mxu2 %v3465_v48  ;;  %v3769_v48 = vor.u32 %v4701_v36, %v3768_v34  ;;  %v3389_v54 = vor.u32 %v4603_v45, %v3386_v46  ;;  %v3704_v27 = vld [vmem:[#allocation5 + $0x468] sm:$0xf]  ;;  %v4555_v32 = vld [vmem:[#allocation5 + $0x6c] sm:$0xf]  ;;  %v3194_v33 = vld [vmem:[#allocation5 + $0x78] sm:$0xf0] }
  0x98   :  { %1543 = vmatpush.bf16.msrb.mxu3 %v3593_v52  ;;  %v4697_v52 = vld [vmem:[#allocation5 + $0x4d4] sm:$0xf0]  ;;  %v3832_v29 = vld [vmem:[#allocation5 + $0x568] sm:$0xf]  ;;  %v4587_v34 = vld [vmem:[#allocation5 + $0x16c] sm:$0xf]  ;;  %v3705_v37 = vor.u32 %v4685_v28, %v3704_v27  ;;  %v3197_v40 = vor.u32 %v4555_v32, %v3194_v33 }
  0x99   :  { %v3322_v36 = vld [vmem:[#allocation5 + $0x178] sm:$0xf0]  ;;  %v3688_v41 = vld [vmem:[#allocation5 + $0x448] sm:$0xf]  ;;  %v4681_v42 = vld [vmem:[#allocation5 + $0x454] sm:$0xf0] }
  0x9a   :  { %1502 = vmatpush.bf16.msrb.mxu0 %v3193_v59  ;;  %1516 = vmatpush.bf16.msrb.mxu1 %v3321_v60  ;;  %v4599_v59 = vld [vmem:[#allocation5 + $0x1cc] sm:$0xf]  ;;  %v3370_v60 = vld [vmem:[#allocation5 + $0x1d8] sm:$0xf0]  ;;  %v4713_v45 = vld [vmem:[#allocation5 + $0x554] sm:$0xf0] }
  0x9b   :  { %1530 = vmatpush.bf16.msrb.mxu2 %v3449_v61  ;;  %v3753_v61 = vor.u32 %v4697_v52, %v3752_v51  ;;  %v3373_v3 = vor.u32 %v4599_v59, %v3370_v60  ;;  %v4551_v46 = vld [vmem:[#allocation5 + $0x4c] sm:$0xf]  ;;  %v3672_v53 = vld [vmem:[#allocation5 + $0x428] sm:$0xf]  ;;  %v4709_v58 = vld [vmem:[#allocation5 + $0x534] sm:$0xf0] }
  0x9c   :  { %1544 = vmatpush.bf16.msrb.mxu3 %v3577_v1  ;;  %v4693_v1 = vld [vmem:[#allocation5 + $0x4b4] sm:$0xf0]  ;;  %v3800_v55 = vld [vmem:[#allocation5 + $0x528] sm:$0xf]  ;;  %v4547_v59 = vld [vmem:[#allocation5 + $0x2c] sm:$0xf] }
  0x9d   :  { %v3162_v60 = vld [vmem:[#allocation5 + $0x38] sm:$0xf0]  ;;  %v3801_v2 = vor.u32 %v4709_v58, %v3800_v55  ;;  %v3784_v4 = vld [vmem:[#allocation5 + $0x508] sm:$0xf]  ;;  %v4705_v5 = vld [vmem:[#allocation5 + $0x514] sm:$0xf0] }
  0x9e   :  { %1503 = vmatpush.bf16.msrb.mxu0 %v3177_v8  ;;  %1517 = vmatpush.bf16.msrb.mxu1 %v3305_v9  ;;  %v4595_v8 = vld [vmem:[#allocation5 + $0x1ac] sm:$0xf]  ;;  %v3354_v9 = vld [vmem:[#allocation5 + $0x1b8] sm:$0xf0] }
  0x9f   :  { %1531 = vmatpush.bf16.msrb.mxu2 %v3433_v10  ;;  %v3737_v10 = vor.u32 %v4693_v1, %v3736_v0  ;;  %v3357_v16 = vor.u32 %v4595_v8, %v3354_v9  ;;  %v3656_v0 = vld [vmem:[#allocation5 + $0x408] sm:$0xf]  ;;  %v4673_v1 = vld [vmem:[#allocation5 + $0x414] sm:$0xf0]  ;;  %v3146_v9 = vld [vmem:[#allocation5 + $0x18] sm:$0xf0] }
  0xa0   :  { %1545 = vmatpush.bf16.msrb.mxu3 %v3561_v14  ;;  %v4689_v14 = vld [vmem:[#allocation5 + $0x494] sm:$0xf0]  ;;  %v3626_v33 = vld [vmem:[#allocation5 + $0x3d8] sm:$0xf0]  ;;  %v4623_v55 = vld [vmem:[#allocation5 + $0x28c] sm:$0xf] }
  0xa1   :  { %v3721_v24 = vor.u32 %v4689_v14, %v3720_v13  ;;  %v3514_v13 = vld [vmem:[#allocation5 + $0x2f8] sm:$0xf0]  ;;  %v4667_v14 = vld [vmem:[#allocation5 + $0x3ec] sm:$0xf] }
  0xa2   :  { %1504 = vmatpush.bf16.msrb.mxu0 %v3161_v20  ;;  %1518 = vmatpush.bf16.msrb.mxu1 %v3289_v25  ;;  %v4591_v20 = vld [vmem:[#allocation5 + $0x18c] sm:$0xf]  ;;  %v3849_v25 = vor.u32 %v4721_v17, %v3848_v15  ;;  %v3657_v15 = vor.u32 %v4673_v1, %v3656_v0 }
  0xa3   :  { %1532 = vmatpush.bf16.msrb.mxu2 %v3417_v26  ;;  %v3213_v26 = vor.u32 %v4559_v18, %v3210_v19  ;;  %v4699_v17 = vld [vmem:[#allocation5 + $0x4ec] sm:$0xf]  ;;  %v3770_v18 = vld [vmem:[#allocation5 + $0x4f8] sm:$0xf0]  ;;  %v3785_v19 = vor.u32 %v4705_v5, %v3784_v4 }
  0xa4   :  { %1546 = vmatpush.bf16.msrb.mxu3 %v3545_v30  ;;  %v3341_v30 = vor.u32 %v4591_v20, %v3338_v21  ;;  %v3149_v20 = vor.u32 %v4543_v7, %v3146_v9  ;;  %v4731_v21 = vld [vmem:[#allocation5 + $0x5ec] sm:$0xf]  ;;  %v3773_v28 = vor.u32 %v4699_v17, %v3770_v18  ;;  %v3578_v7 = vld [vmem:[#allocation5 + $0x378] sm:$0xf0] }
  0xa5   :  { %v4655_v58 = vld [vmem:[#allocation5 + $0x38c] sm:$0xf]  ;;  %v3706_v9 = vld [vmem:[#allocation5 + $0x478] sm:$0xf0] }
  0xa6   :  { %1505 = vmatpush.bf16.msrb.mxu0 %v3145_v38  ;;  %1519 = vmatpush.bf16.msrb.mxu1 %v3273_v43  ;;  %v3833_v38 = vor.u32 %v4717_v31, %v3832_v29  ;;  %v3816_v43 = vld [vmem:[#allocation5 + $0x548] sm:$0xf]  ;;  %v4631_v29 = vld [vmem:[#allocation5 + $0x2cc] sm:$0xf] }
  0xa7   :  { %1533 = vmatpush.bf16.msrb.mxu2 %v3401_v44  ;;  %v3325_v44 = vor.u32 %v4587_v34, %v3322_v36  ;;  %v3817_v51 = vor.u32 %v4713_v45, %v3816_v43  ;;  %v4663_v31 = vld [vmem:[#allocation5 + $0x3cc] sm:$0xf]  ;;  %v3754_v36 = vld [vmem:[#allocation5 + $0x4d8] sm:$0xf0] }
  0xa8   :  { %1547 = vmatpush.bf16.msrb.mxu3 %v3529_v47  ;;  %v3178_v47 = vld [vmem:[#allocation5 + $0x58] sm:$0xf0]  ;;  %v4695_v34 = vld [vmem:[#allocation5 + $0x4cc] sm:$0xf] }
  0xa9   :  { %1506 = vmatmul.bf16.vlgmr.msrb.gmra.mxu0 %v5241_v57  ;;  %1520 = vmatmul.bf16.vlgmr.msrb.gmra.mxu1 %v5244_v6  ;;  %v3181_v52 = vor.u32 %v4551_v46, %v3178_v47  ;;  %v4627_v43 = vld [vmem:[#allocation5 + $0x2ac] sm:$0xf]  ;;  %v3610_v47 = vld [vmem:[#allocation5 + $0x3b8] sm:$0xf0] }
  0xaa   :  { %1554 = vmatpush.bf16.msra.mxu0 %v3769_v48  ;;  %1568 = vmatpush.bf16.msra.mxu1 %v3897_v49  ;;  %v4583_v48 = vld [vmem:[#allocation5 + $0x14c] sm:$0xf]  ;;  %v3306_v49 = vld [vmem:[#allocation5 + $0x158] sm:$0xf0] }
  0xab   :  { %1582 = vmatpush.bf16.msra.mxu2 %v3261_v50  ;;  %1548 = vmatmul.bf16.vlgmr.msrb.gmra.mxu3 %v5249_v23  ;;  %v3689_v50 = vor.u32 %v4681_v42, %v3688_v41  ;;  %v3309_v56 = vor.u32 %v4583_v48, %v3306_v49  ;;  %v3629_v41 = vor.u32 %v4663_v31, %v3626_v33  ;;  %v4659_v45 = vld [vmem:[#allocation5 + $0x3ac] sm:$0xf]  ;;  %v3738_v49 = vld [vmem:[#allocation5 + $0x4b8] sm:$0xf0] }
  0xac   :  { %1596 = vmatpush.bf16.msra.mxu3 %v3389_v54  ;;  %1534 = vmatmul.bf16.vlgmr.msrb.gmra.mxu2 %v5247_v22  ;;  %v4677_v54 = vld [vmem:[#allocation5 + $0x434] sm:$0xf0]  ;;  %v3757_v42 = vor.u32 %v4695_v34, %v3754_v36  ;;  %v4691_v48 = vld [vmem:[#allocation5 + $0x4ac] sm:$0xf]  ;;  %v3418_v31 = vld [vmem:[#allocation5 + $0x238] sm:$0xf0] }
  0xad   :  { %v4651_v4 = vld [vmem:[#allocation5 + $0x36c] sm:$0xf]  ;;  %v3546_v34 = vld [vmem:[#allocation5 + $0x338] sm:$0xf0] }
  0xae   :  { %1555 = vmatpush.bf16.msra.mxu0 %v3753_v61  ;;  %1569 = vmatpush.bf16.msra.mxu1 %v3881_v62  ;;  %v4579_v61 = vld [vmem:[#allocation5 + $0x12c] sm:$0xf]  ;;  %v3290_v62 = vld [vmem:[#allocation5 + $0x138] sm:$0xf0] }
  0xaf   :  { %1583 = vmatpush.bf16.msra.mxu2 %v3245_v63  ;;  %v3673_v63 = vor.u32 %v4677_v54, %v3672_v53  ;;  %v3293_v8 = vor.u32 %v4579_v61, %v3290_v62  ;;  %v3613_v53 = vor.u32 %v4659_v45, %v3610_v47  ;;  %v3741_v54 = vor.u32 %v4691_v48, %v3738_v49  ;;  %v4687_v61 = vld [vmem:[#allocation5 + $0x48c] sm:$0xf]  ;;  %v3722_v62 = vld [vmem:[#allocation5 + $0x498] sm:$0xf0] }
  0xb0   :  { %1597 = vmatpush.bf16.msra.mxu3 %v3373_v3  ;;  %v3165_v3 = vor.u32 %v4547_v59, %v3162_v60  ;;  %v3594_v60 = vld [vmem:[#allocation5 + $0x398] sm:$0xf0]  ;;  %v4647_v17 = vld [vmem:[#allocation5 + $0x34c] sm:$0xf] }
  0xb1   :  { %v3597_v1 = vor.u32 %v4655_v58, %v3594_v60  ;;  %v4675_v36 = vld [vmem:[#allocation5 + $0x42c] sm:$0xf]  ;;  %v3530_v48 = vld [vmem:[#allocation5 + $0x318] sm:$0xf0] }
  0xb2   :  { %1556 = vmatpush.bf16.msra.mxu0 %v3737_v10  ;;  %1570 = vmatpush.bf16.msra.mxu1 %v3865_v11  ;;  %v4575_v10 = vld [vmem:[#allocation5 + $0x10c] sm:$0xf]  ;;  %v3274_v11 = vld [vmem:[#allocation5 + $0x118] sm:$0xf0] }
  0xb3   :  { %1584 = vmatpush.bf16.msra.mxu2 %v3229_v12  ;;  %v4635_v12 = vld [vmem:[#allocation5 + $0x2ec] sm:$0xf]  ;;  %v4765_v60 = vld [vmem:[#allocation8 + $0xf4] sm:$0xf0] }
  0xb4   :  { %1598 = vmatpush.bf16.msra.mxu3 %v3357_v16  ;;  %v3642_v16 = vld [vmem:[#allocation5 + $0x3f8] sm:$0xf0]  ;;  %v4639_v47 = vld [vmem:[#allocation5 + $0x30c] sm:$0xf] }
  0xb5   :  { %v3645_v27 = vor.u32 %v4667_v14, %v3642_v16  ;;  %v3434_v16 = vld [vmem:[#allocation5 + $0x258] sm:$0xf0] }
  0xb6   :  { %1557 = vmatpush.bf16.msra.mxu0 %v3721_v24  ;;  %1571 = vmatpush.bf16.msra.mxu1 %v3849_v25  ;;  %v3898_v24 = vld [vmem:[#allocation5 + $0x5f8] sm:$0xf0]  ;;  %v3277_v25 = vor.u32 %v4575_v10, %v3274_v11  ;;  %v4715_v10 = vld [vmem:[#allocation5 + $0x56c] sm:$0xf] }
  0xb7   :  { %1585 = vmatpush.bf16.msra.mxu2 %v3213_v26  ;;  %v3517_v26 = vor.u32 %v4635_v12, %v3514_v13  ;;  %v3901_v32 = vor.u32 %v4731_v21, %v3898_v24  ;;  %v3834_v11 = vld [vmem:[#allocation5 + $0x578] sm:$0xf0]  ;;  %v3581_v13 = vor.u32 %v4651_v4, %v3578_v7  ;;  %v4711_v24 = vld [vmem:[#allocation5 + $0x54c] sm:$0xf]  ;;  %v4016_v7 = vld [vmem:[#allocation8 + $0xe0] sm:$0xf] }
  0xb8   :  { %1599 = vmatpush.bf16.msra.mxu3 %v3341_v30  ;;  %v3498_v30 = vld [vmem:[#allocation5 + $0x2d8] sm:$0xf0]  ;;  %v3837_v18 = vor.u32 %v4715_v10, %v3834_v11 }
  0xb9   :  { %v3690_v21 = vld [vmem:[#allocation5 + $0x458] sm:$0xf0] }
  0xba   :  { %1558 = vmatpush.bf16.msra.mxu0 %v3705_v37  ;;  %1572 = vmatpush.bf16.msra.mxu1 %v3833_v38  ;;  %v4727_v37 = vld [vmem:[#allocation5 + $0x5cc] sm:$0xf]  ;;  %v3882_v38 = vld [vmem:[#allocation5 + $0x5d8] sm:$0xf0] }
  0xbb   :  { %1586 = vmatpush.bf16.msra.mxu2 %v3197_v40  ;;  %v3501_v40 = vor.u32 %v4631_v29, %v3498_v30  ;;  %v3885_v46 = vor.u32 %v4727_v37, %v3882_v38  ;;  %v4611_v30 = vld [vmem:[#allocation5 + $0x22c] sm:$0xf]  ;;  %v3674_v37 = vld [vmem:[#allocation5 + $0x438] sm:$0xf0] }
  0xbc   :  { %1600 = vmatpush.bf16.msra.mxu3 %v3325_v44  ;;  %v3482_v44 = vld [vmem:[#allocation5 + $0x2b8] sm:$0xf0]  ;;  %v3677_v45 = vor.u32 %v4675_v36, %v3674_v37 }
  0xbd   :  { %v4757_v36 = vld [vmem:[#allocation8 + $0xb4] sm:$0xf0] }
  0xbe   :  { %1559 = vmatpush.bf16.msra.mxu0 %v3689_v50  ;;  %1573 = vmatpush.bf16.msra.mxu1 %v3817_v51  ;;  %v4723_v50 = vld [vmem:[#allocation5 + $0x5ac] sm:$0xf]  ;;  %v3866_v51 = vld [vmem:[#allocation5 + $0x5b8] sm:$0xf0] }
  0xbf   :  { %1587 = vmatpush.bf16.msra.mxu2 %v3181_v52  ;;  %v3485_v52 = vor.u32 %v4627_v43, %v3482_v44  ;;  %v3869_v59 = vor.u32 %v4723_v50, %v3866_v51  ;;  %v4607_v43 = vld [vmem:[#allocation5 + $0x20c] sm:$0xf]  ;;  %v3658_v51 = vld [vmem:[#allocation5 + $0x418] sm:$0xf0] }
  0xc0   :  { %1601 = vmatpush.bf16.msra.mxu3 %v3309_v56  ;;  %v3466_v56 = vld [vmem:[#allocation5 + $0x298] sm:$0xf0]  ;;  %v4671_v50 = vld [vmem:[#allocation5 + $0x40c] sm:$0xf] }
  0xc1   :  { %v3469_v0 = vor.u32 %v4623_v55, %v3466_v56  ;;  %v4749_v55 = vld [vmem:[#allocation8 + $0x74] sm:$0xf0]  ;;  %v5275_v56 = vld [vmem:[#allocation7] sm:$0xf] }
  0xc2   :  { %1560 = vmatpush.bf16.msra.mxu0 %v3673_v63  ;;  %1574 = vmatpush.bf16.msra.mxu1 %v3801_v2  ;;  %v4719_v63 = vld [vmem:[#allocation5 + $0x58c] sm:$0xf] }
  0xc3   :  { %1588 = vmatpush.bf16.msra.mxu2 %v3165_v3  ;;  %v4619_v2 = vld [vmem:[#allocation5 + $0x26c] sm:$0xf]  ;;  %v3450_v3 = vld [vmem:[#allocation5 + $0x278] sm:$0xf0] }
  0xc4   :  { %1602 = vmatpush.bf16.msra.mxu3 %v3293_v8  ;;  %v4683_v8 = vld [vmem:[#allocation5 + $0x46c] sm:$0xf]  ;;  %v3453_v12 = vor.u32 %v4619_v2, %v3450_v3  ;;  %v3952_v2 = vld [vmem:[#allocation8 + $0x60] sm:$0xf] }
  0xc5   :  { %v3709_v14 = vor.u32 %v4683_v8, %v3706_v9  ;;  %v4747_v3 = vld [vmem:[#allocation8 + $0x64] sm:$0xf0] }
  0xc6   :  { %1561 = vmatpush.bf16.msra.mxu0 %v3657_v15  ;;  %1575 = vmatpush.bf16.msra.mxu1 %v3785_v19  ;;  %v4615_v15 = vld [vmem:[#allocation5 + $0x24c] sm:$0xf]  ;;  %v3562_v19 = vld [vmem:[#allocation5 + $0x358] sm:$0xf0]  ;;  %v5273_v38 = vpop.f32.mrf.mxu1  ;;  %v3953_v9 = vor.u32 %v4747_v3, %v3952_v2  ;;  %v4764_v2 = vld [vmem:[#allocation8 + $0xf4] sm:$0xf] }
  0xc7   :  { %1589 = vmatpush.bf16.msra.mxu2 %v3149_v20  ;;  %v4679_v20 = vld [vmem:[#allocation5 + $0x44c] sm:$0xf]  ;;  %v4026_v3 = vld [vmem:[#allocation8 + $0xf8] sm:$0xf0] }
  0xc8   :  { %1603 = vmatpush.bf16.msra.mxu3 %v3277_v25  ;;  %v3818_v25 = vld [vmem:[#allocation5 + $0x558] sm:$0xf0]  ;;  %v4763_v8 = vld [vmem:[#allocation8 + $0xe4] sm:$0xf0] }
  0xc9   :  { %1562 = vmatmul.bf16.vlgmr.msra.gmra.mxu0 %v5253_v35  ;;  %1576 = vmatmul.bf16.vlgmr.msra.gmra.mxu1 %v5255_v39  ;;  %v3821_v33 = vor.u32 %v4711_v24, %v3818_v25 }
  0xca   :  { %1610 = vmatpush.bf16.msrb.mxu0 %v3517_v26  ;;  %1624 = vmatpush.bf16.msrb.mxu1 %v3645_v27  ;;  %v3437_v26 = vor.u32 %v4615_v15, %v3434_v16  ;;  %v3565_v27 = vor.u32 %v4647_v17, %v3562_v19  ;;  %v1339_v29 = vpop.f32.mrf.mxu0  ;;  %v4017_v15 = vor.u32 %v4763_v8, %v4016_v7  ;;  %v4008_v16 = vld [vmem:[#allocation8 + $0xd0] sm:$0xf]  ;;  %v4761_v17 = vld [vmem:[#allocation8 + $0xd4] sm:$0xf0] }
  0xcb   :  { %1638 = vmatpush.bf16.msrb.mxu2 %v3773_v28  ;;  %1604 = vmatmul.bf16.vlgmr.msra.gmra.mxu3 %v5244_v6  ;;  %v3725_v6 = vor.u32 %v4687_v61, %v3722_v62  ;;  %v3693_v28 = vor.u32 %v4679_v20, %v3690_v21  ;;  %v3533_v61 = vor.u32 %v4639_v47, %v3530_v48  ;;  %v3936_v21 = vld [vmem:[#allocation8 + $0x40] sm:$0xf] }
  0xcc   :  { %1652 = vmatpush.bf16.msrb.mxu3 %v3901_v32  ;;  %1590 = vmatmul.bf16.vlgmr.msra.gmra.mxu2 %v5241_v57  ;;  %v3850_v57 = vld [vmem:[#allocation5 + $0x598] sm:$0xf0]  ;;  %v4643_v32 = vld [vmem:[#allocation5 + $0x32c] sm:$0xf]  ;;  %v3661_v62 = vor.u32 %v4671_v50, %v3658_v51  ;;  %v4009_v24 = vor.u32 %v4761_v17, %v4008_v16  ;;  %v3912_v50 = vld [vmem:[#allocation8 + $0x10] sm:$0xf] }
  0xcd   :  { %v3853_v5 = vor.u32 %v4719_v63, %v3850_v57  ;;  %v3549_v44 = vor.u32 %v4643_v32, %v3546_v34  ;;  %v3992_v34 = vld [vmem:[#allocation8 + $0xb0] sm:$0xf]  ;;  %v4737_v51 = vld [vmem:[#allocation8 + $0x14] sm:$0xf0]  ;;  %v4018_v16 = vld [vmem:[#allocation8 + $0xe8] sm:$0xf0] }
  0xce   :  { %1611 = vmatpush.bf16.msrb.mxu0 %v3501_v40  ;;  %1625 = vmatpush.bf16.msrb.mxu1 %v3629_v41  ;;  %v4707_v40 = vld [vmem:[#allocation5 + $0x52c] sm:$0xf]  ;;  %v3802_v41 = vld [vmem:[#allocation5 + $0x538] sm:$0xf0]  ;;  %v1381_v10 = vpop.f32.mrf.mxu3 }
  0xcf   :  { %1639 = vmatpush.bf16.msrb.mxu2 %v3757_v42  ;;  %v3421_v42 = vor.u32 %v4611_v30, %v3418_v31  ;;  %v3805_v49 = vor.u32 %v4707_v40, %v3802_v41  ;;  %v3928_v31 = vld [vmem:[#allocation8 + $0x30] sm:$0xf]  ;;  %v3920_v41 = vld [vmem:[#allocation8 + $0x20] sm:$0xf] }
  0xd0   :  { %1653 = vmatpush.bf16.msrb.mxu3 %v3885_v46  ;;  %v3402_v46 = vld [vmem:[#allocation5 + $0x218] sm:$0xf0] }
  0xd1   :  { %v3405_v58 = vor.u32 %v4607_v43, %v3402_v46  ;;  %v3993_v43 = vor.u32 %v4757_v36, %v3992_v34  ;;  %v4072_v36 = vld [vmem:[#allocation8 + $0x150] sm:$0xf] }
  0xd2   :  { %1612 = vmatpush.bf16.msrb.mxu0 %v3485_v52  ;;  %1626 = vmatpush.bf16.msrb.mxu1 %v3613_v53  ;;  %v4703_v52 = vld [vmem:[#allocation5 + $0x50c] sm:$0xf]  ;;  %v3786_v53 = vld [vmem:[#allocation5 + $0x518] sm:$0xf0] }
  0xd3   :  { %1640 = vmatpush.bf16.msrb.mxu2 %v3741_v54  ;;  %v3960_v54 = vld [vmem:[#allocation8 + $0x70] sm:$0xf]  ;;  %v3789_v63 = vor.u32 %v4703_v52, %v3786_v53 }
  0xd4   :  { %1654 = vmatpush.bf16.msrb.mxu3 %v3869_v59  ;;  %v4024_v59 = vld [vmem:[#allocation8 + $0xf0] sm:$0xf]  ;;  %v3961_v57 = vor.u32 %v4749_v55, %v3960_v54  ;;  %v4753_v55 = vld [vmem:[#allocation8 + $0x94] sm:$0xf0] }
  0xd5   :  { %v4025_v4 = vor.u32 %v4765_v60, %v4024_v59  ;;  %v3976_v54 = vld [vmem:[#allocation8 + $0x90] sm:$0xf] }
  0xd6   :  { %1613 = vmatpush.bf16.msrb.mxu0 %v3469_v0  ;;  %1627 = vmatpush.bf16.msrb.mxu1 %v3597_v1  ;;  %v362_v1 = vperm.slane %v5275_v56, 0 }
  0xd7   :  { %1641 = vmatpush.bf16.msrb.mxu2 %v3725_v6  ;;  %v1367_v0 = vpop.f32.mrf.mxu2  ;;  %v1341_v6 = vpop.f32.mrf.mxu0 }
  0xd8   :  { %1655 = vmatpush.bf16.msrb.mxu3 %v3853_v5  ;;  %v1355_v5 = vpop.f32.mrf.mxu1  ;;  %v1340_v11 = vadd.f32 %v1339_v29, %v362_v1 }
  0xda   :  { %1614 = vmatpush.bf16.msrb.mxu0 %v3453_v12  ;;  %1628 = vmatpush.bf16.msrb.mxu1 %v3581_v13  ;;  %v1342_v12 = vadd.f32 %v1341_v6, %v362_v1  ;;  %v3944_v13 = vld [vmem:[#allocation8 + $0x50] sm:$0xf]  ;;  %v1354_v19 = vadd.f32 %v5273_v38, %v1340_v11  ;;  %v3968_v1 = vld [vmem:[#allocation8 + $0x80] sm:$0xf]  ;;  %v4751_v6 = vld [vmem:[#allocation8 + $0x84] sm:$0xf0] }
  0xdb   :  { %1642 = vmatpush.bf16.msrb.mxu2 %v3709_v14  ;;  %v4745_v14 = vld [vmem:[#allocation8 + $0x54] sm:$0xf0]  ;;  %v3969_v11 = vor.u32 %v4751_v6, %v3968_v1 }
  0xdc   :  { %1656 = vmatpush.bf16.msrb.mxu3 %v3837_v18  ;;  %v3945_v18 = vor.u32 %v4745_v14, %v3944_v13  ;;  %v1356_v20 = vadd.f32 %v1355_v5, %v1342_v12  ;;  %v1368_v29 = vadd.f32 %v1367_v0, %v1354_v19  ;;  %v3962_v0 = vld [vmem:[#allocation8 + $0x78] sm:$0xf0]  ;;  %v4746_v12 = vld [vmem:[#allocation8 + $0x64] sm:$0xf]  ;;  %v3954_v13 = vld [vmem:[#allocation8 + $0x68] sm:$0xf0]  ;;  %v4029_v14 = vor.u32 %v4764_v2, %v4026_v3 }
  0xdd   :  { %v3957_v19 = vor.u32 %v4746_v12, %v3954_v13  ;;  %v4736_v2 = vld [vmem:[#allocation8 + $0x14] sm:$0xf]  ;;  %v4064_v3 = vld [vmem:[#allocation8 + $0x140] sm:$0xf]  ;;  %v3978_v13 = vld [vmem:[#allocation8 + $0x98] sm:$0xf0] }
  0xde   :  { %1615 = vmatpush.bf16.msrb.mxu0 %v3437_v26  ;;  %1629 = vmatpush.bf16.msrb.mxu1 %v3565_v27  ;;  %v4000_v26 = vld [vmem:[#allocation8 + $0xc0] sm:$0xf]  ;;  %v4759_v27 = vld [vmem:[#allocation8 + $0xc4] sm:$0xf0]  ;;  %v1382_v38 = vadd.f32 %v1381_v10, %v1368_v29  ;;  %v4752_v12 = vld [vmem:[#allocation8 + $0x94] sm:$0xf] }
  0xdf   :  { %1643 = vmatpush.bf16.msrb.mxu2 %v3693_v28  ;;  %v1369_v25 = vpop.f32.mrf.mxu2  ;;  %v4001_v32 = vor.u32 %v4759_v27, %v4000_v26  ;;  %v4760_v26 = vld [vmem:[#allocation8 + $0xd4] sm:$0xf]  ;;  %v4010_v27 = vld [vmem:[#allocation8 + $0xd8] sm:$0xf0] }
  0xe0   :  { %1657 = vmatpush.bf16.msrb.mxu3 %v3821_v33  ;;  %v1370_v30 = vadd.f32 %v1369_v25, %v1356_v20  ;;  %v1383_v33 = vpop.f32.mrf.mxu3  ;;  %v4744_v20 = vld [vmem:[#allocation8 + $0x54] sm:$0xf]  ;;  %v4781_v25 = vld [vmem:[#allocation8 + $0x174] sm:$0xf0]  ;;  %v4013_v34 = vor.u32 %v4760_v26, %v4010_v27  ;;  %v4750_v26 = vld [vmem:[#allocation8 + $0x84] sm:$0xf] }
  0xe1   :  { %v3970_v27 = vld [vmem:[#allocation8 + $0x88] sm:$0xf0] }
  0xe2   :  { %1616 = vmatpush.bf16.msrb.mxu0 %v3421_v42  ;;  %1630 = vmatpush.bf16.msrb.mxu1 %v3549_v44  ;;  %v1384_v40 = vadd.f32 %v1383_v33, %v1370_v30  ;;  %v4739_v42 = vld [vmem:[#allocation8 + $0x24] sm:$0xf0]  ;;  %v3984_v44 = vld [vmem:[#allocation8 + $0xa0] sm:$0xf]  ;;  %v3938_v33 = vld [vmem:[#allocation8 + $0x48] sm:$0xf0] }
  0xe3   :  { %1644 = vmatpush.bf16.msrb.mxu2 %v3677_v45  ;;  %v4755_v45 = vld [vmem:[#allocation8 + $0xa4] sm:$0xf0]  ;;  %v3921_v47 = vor.u32 %v4739_v42, %v3920_v41  ;;  %v4002_v41 = vld [vmem:[#allocation8 + $0xc8] sm:$0xf0] }
  0xe4   :  { %1658 = vmatpush.bf16.msrb.mxu3 %v3805_v49  ;;  %v3985_v52 = vor.u32 %v4755_v45, %v3984_v44 }
  0xe6   :  { %1617 = vmatpush.bf16.msrb.mxu0 %v3405_v58  ;;  %1631 = vmatpush.bf16.msrb.mxu1 %v3533_v61  ;;  %v1395_v28 = vpop.f32.mrf.mxu0  ;;  %v3913_v58 = vor.u32 %v4737_v51, %v3912_v50  ;;  %v3904_v61 = vld [vmem:[#allocation8] sm:$0xf]  ;;  %v4756_v51 = vld [vmem:[#allocation8 + $0xb4] sm:$0xf] }
  0xe7   :  { %1645 = vmatpush.bf16.msrb.mxu2 %v3661_v62  ;;  %v1396_v48 = vadd.f32 %v1395_v28, %v1382_v38  ;;  %v4735_v62 = vld [vmem:[#allocation8 + $0x4] sm:$0xf0] }
  0xe8   :  { %1659 = vmatpush.bf16.msrb.mxu3 %v3789_v63  ;;  %v4748_v63 = vld [vmem:[#allocation8 + $0x74] sm:$0xf] }
  0xe9   :  { %1618 = vmatmul.bf16.vlgmr.msrb.gmra.mxu0 %v5247_v22  ;;  %1632 = vmatmul.bf16.vlgmr.msrb.gmra.mxu1 %v5249_v23  ;;  %v4743_v22 = vld [vmem:[#allocation8 + $0x44] sm:$0xf0] }
  0xea   :  { %2068 = vmatpush.bf16.msra.mxu0 %v3961_v57  ;;  %2082 = vmatpush.bf16.msra.mxu1 %v4025_v4  ;;  %v3937_v23 = vor.u32 %v4743_v22, %v3936_v21  ;;  %v3977_v57 = vor.u32 %v4753_v55, %v3976_v54  ;;  %v3905_v4 = vor.u32 %v4735_v62, %v3904_v61  ;;  %v3946_v21 = vld [vmem:[#allocation8 + $0x58] sm:$0xf0]  ;;  %v4738_v55 = vld [vmem:[#allocation8 + $0x24] sm:$0xf]  ;;  %v3986_v62 = vld [vmem:[#allocation8 + $0xa8] sm:$0xf0] }
  0xeb   :  { %1646 = vmatmul.bf16.vlgmr.msrb.gmra.mxu2 %v5253_v35  ;;  %1660 = vmatmul.bf16.vlgmr.msrb.gmra.mxu3 %v5255_v39  ;;  %v1409_v35 = vpop.f32.mrf.mxu1  ;;  %v4741_v39 = vld [vmem:[#allocation8 + $0x34] sm:$0xf0]  ;;  %v3949_v30 = vor.u32 %v4744_v20, %v3946_v21  ;;  %v4754_v61 = vld [vmem:[#allocation8 + $0xa4] sm:$0xf]  ;;  %v4771_v20 = vld [vmem:[#allocation8 + $0x124] sm:$0xf0] }
  0xec   :  { %v3929_v37 = vor.u32 %v4741_v39, %v3928_v31  ;;  %v1410_v59 = vadd.f32 %v1409_v35, %v1396_v48  ;;  %v4779_v35 = vld [vmem:[#allocation8 + $0x164] sm:$0xf0]  ;;  %v4742_v31 = vld [vmem:[#allocation8 + $0x44] sm:$0xf]  ;;  %v3930_v48 = vld [vmem:[#allocation8 + $0x38] sm:$0xf0] }
  0xed   :  { %v3941_v44 = vor.u32 %v4742_v31, %v3938_v33  ;;  %v4734_v21 = vld [vmem:[#allocation8 + $0x4] sm:$0xf]  ;;  %v3973_v33 = vor.u32 %v4750_v26, %v3970_v27  ;;  %v4787_v26 = vld [vmem:[#allocation8 + $0x1a4] sm:$0xf0] }
  0xee   :  { %2069 = vmatpush.bf16.msra.mxu0 %v3953_v9  ;;  %2083 = vmatpush.bf16.msra.mxu1 %v4017_v15  ;;  %v1397_v46 = vpop.f32.mrf.mxu0  ;;  %v1666_v7 = vmax.f32 %v1410_v59, 0.0  ;;  %v3965_v9 = vor.u32 %v4748_v63, %v3962_v0  ;;  %v1437_v10 = vpop.f32.mrf.mxu3  ;;  %v4762_v15 = vld [vmem:[#allocation8 + $0xe4] sm:$0xf] }
  0xef   :  { %v1398_v49 = vadd.f32 %v1397_v46, %v1384_v40  ;;  %v1423_v5 = vpop.f32.mrf.mxu2  ;;  %v4021_v22 = vor.u32 %v4762_v15, %v4018_v16  ;;  %v4758_v40 = vld [vmem:[#allocation8 + $0xc4] sm:$0xf] }
  0xf2   :  { %2070 = vmatpush.bf16.msra.mxu0 %v3945_v18  ;;  %2084 = vmatpush.bf16.msra.mxu1 %v4009_v24  ;;  %v363_v18 = vperm.slane %v5275_v56, 1  ;;  %v4088_v24 = vld [vmem:[#allocation8 + $0x170] sm:$0xf] }
  0xf3   :  { %v1411_v53 = vpop.f32.mrf.mxu1  ;;  %v4089_v28 = vor.u32 %v4781_v25, %v4088_v24  ;;  %v3981_v24 = vor.u32 %v4752_v12, %v3978_v13  ;;  %v4120_v13 = vld [vmem:[#allocation8 + $0x1b0] sm:$0xf] }
  0xf4   :  { %v1412_v60 = vadd.f32 %v1411_v53, %v1398_v49  ;;  %v1424_v29 = vadd.f32 %v1423_v5, %v363_v18  ;;  %v4005_v49 = vor.u32 %v4758_v40, %v4002_v41  ;;  %v3914_v5 = vld [vmem:[#allocation8 + $0x18] sm:$0xf0]  ;;  %v4032_v41 = vld [vmem:[#allocation8 + $0x100] sm:$0xf] }
  0xf5   :  { %2096 = vmatpush.bf16.msra.mxu2 %v4089_v28 }
  0xf6   :  { %2071 = vmatpush.bf16.msra.mxu0 %v3937_v23  ;;  %2085 = vmatpush.bf16.msra.mxu1 %v4001_v32  ;;  %v1670_v8 = vmax.f32 %v1412_v60, 0.0  ;;  %v4080_v23 = vld [vmem:[#allocation8 + $0x160] sm:$0xf]  ;;  %v1439_v38 = vpop.f32.mrf.mxu3  ;;  %v1438_v42 = vadd.f32 %v1437_v10, %v1424_v29  ;;  %v4773_v10 = vld [vmem:[#allocation8 + $0x134] sm:$0xf0] }
  0xf7   :  { %v4081_v39 = vor.u32 %v4779_v35, %v4080_v23  ;;  %v1425_v32 = vpop.f32.mrf.mxu2 }
  0xf8   :  { %v5283_v17 = vpack.c.bf16 %v1670_v8, %v1666_v7  ;;  %v1426_v50 = vadd.f32 %v1425_v32, %v363_v18  ;;  %v3989_v7 = vor.u32 %v4754_v61, %v3986_v62  ;;  %v3917_v18 = vor.u32 %v4736_v2, %v3914_v5  ;;  %v4769_v32 = vld [vmem:[#allocation8 + $0x114] sm:$0xf0]  ;;  %v4774_v62 = vld [vmem:[#allocation8 + $0x144] sm:$0xf]  ;;  %v4128_v5 = vld [vmem:[#allocation8 + $0x1c0] sm:$0xf] }
  0xf9   :  { %2097 = vmatpush.bf16.msra.mxu2 %v4081_v39  ;;  %v4040_v39 = vld [vmem:[#allocation8 + $0x110] sm:$0xf] }
  0xfa   :  { %2072 = vmatpush.bf16.msra.mxu0 %v3929_v37  ;;  %2086 = vmatpush.bf16.msra.mxu1 %v3993_v43  ;;  %v4777_v37 = vld [vmem:[#allocation8 + $0x154] sm:$0xf0]  ;;  %v1440_v60 = vadd.f32 %v1439_v38, %v1426_v50  ;;  %v4152_v50 = vld [vmem:[#allocation8 + $0x1f0] sm:$0xf] }
  0xfb   :  { %v4073_v45 = vor.u32 %v4777_v37, %v4072_v36  ;;  %v4041_v36 = vor.u32 %v4769_v32, %v4040_v39  ;;  %v4034_v39 = vld [vmem:[#allocation8 + $0x108] sm:$0xf0] }
  0xfd   :  { %2098 = vmatpush.bf16.msra.mxu2 %v4073_v45  ;;  %v4090_v45 = vld [vmem:[#allocation8 + $0x178] sm:$0xf0] }
  0xfe   :  { %2073 = vmatpush.bf16.msra.mxu0 %v3921_v47  ;;  %2087 = vmatpush.bf16.msra.mxu1 %v3985_v52  ;;  %v4740_v47 = vld [vmem:[#allocation8 + $0x34] sm:$0xf]  ;;  %v3994_v52 = vld [vmem:[#allocation8 + $0xb8] sm:$0xf0] }
  0xff   :  { %v3933_v54 = vor.u32 %v4740_v47, %v3930_v48  ;;  %v3997_v59 = vor.u32 %v4756_v51, %v3994_v52  ;;  %v4778_v47 = vld [vmem:[#allocation8 + $0x164] sm:$0xf]  ;;  %v4082_v48 = vld [vmem:[#allocation8 + $0x168] sm:$0xf0]  ;;  %v4797_v51 = vld [vmem:[#allocation8 + $0x1f4] sm:$0xf0] }
 0x100   :  { %v4153_v52 = vor.u32 %v4797_v51, %v4152_v50 }
 0x102   :  { %2074 = vmatpush.bf16.msra.mxu0 %v3913_v58  ;;  %2088 = vmatpush.bf16.msra.mxu1 %v3977_v57  ;;  %v3922_v58 = vld [vmem:[#allocation8 + $0x28] sm:$0xf0] }
 0x103   :  { %v3925_v6 = vor.u32 %v4738_v55, %v3922_v58  ;;  %2110 = vmatpush.bf16.msra.mxu3 %v4153_v52  ;;  %v4144_v55 = vld [vmem:[#allocation8 + $0x1e0] sm:$0xf]  ;;  %v4795_v58 = vld [vmem:[#allocation8 + $0x1e4] sm:$0xf0] }
 0x106   :  { %2075 = vmatpush.bf16.msra.mxu0 %v3905_v4  ;;  %2089 = vmatpush.bf16.msra.mxu1 %v3969_v11  ;;  %v1451_v43 = vpop.f32.mrf.mxu0  ;;  %v1465_v46 = vpop.f32.mrf.mxu1  ;;  %v4775_v4 = vld [vmem:[#allocation8 + $0x144] sm:$0xf0] }
 0x107   :  { %v1452_v53 = vadd.f32 %v1451_v43, %v1438_v42  ;;  %v4065_v8 = vor.u32 %v4775_v4, %v4064_v3  ;;  %v4767_v42 = vld [vmem:[#allocation8 + $0x104] sm:$0xf0]  ;;  %v4772_v3 = vld [vmem:[#allocation8 + $0x134] sm:$0xf]  ;;  %v4058_v4 = vld [vmem:[#allocation8 + $0x138] sm:$0xf0] }
 0x108   :  { %v4033_v43 = vor.u32 %v4767_v42, %v4032_v41 }
 0x109   :  { %2076 = vmatmul.bf16.vlgmr.msra.gmra.mxu0 %v5283_v17  ;;  %v1466_v57 = vadd.f32 %v1465_v46, %v1452_v53  ;;  %2099 = vmatpush.bf16.msra.mxu2 %v4065_v8  ;;  %v4776_v53 = vld [vmem:[#allocation8 + $0x154] sm:$0xf]  ;;  %v4791_v8 = vld [vmem:[#allocation8 + $0x1c4] sm:$0xf0] }
 0x10a   :  { %2124 = vmatpush.bf16.msrb.mxu0 %v3965_v9  ;;  %2138 = vmatpush.bf16.msrb.mxu1 %v4029_v14  ;;  %v4056_v9 = vld [vmem:[#allocation8 + $0x130] sm:$0xf]  ;;  %v4129_v12 = vor.u32 %v4791_v8, %v4128_v5  ;;  %v4122_v8 = vld [vmem:[#allocation8 + $0x1b8] sm:$0xf0] }
 0x10b   :  { %v4057_v15 = vor.u32 %v4773_v10, %v4056_v9  ;;  %v4770_v9 = vld [vmem:[#allocation8 + $0x124] sm:$0xf]  ;;  %v4050_v10 = vld [vmem:[#allocation8 + $0x128] sm:$0xf0] }
 0x10d   :  { %2100 = vmatpush.bf16.msra.mxu2 %v4057_v15 }
 0x10e   :  { %2125 = vmatpush.bf16.msrb.mxu0 %v3957_v19  ;;  %2139 = vmatpush.bf16.msrb.mxu1 %v4021_v22  ;;  %v1453_v0 = vpop.f32.mrf.mxu0  ;;  %v1493_v1 = vpop.f32.mrf.mxu3  ;;  %v4048_v19 = vld [vmem:[#allocation8 + $0x120] sm:$0xf]  ;;  %v3906_v22 = vld [vmem:[#allocation8 + $0x8] sm:$0xf0] }
 0x10f   :  { %v1479_v63 = vpop.f32.mrf.mxu2  ;;  %v1454_v11 = vadd.f32 %v1453_v0, %v1440_v60  ;;  %v1467_v14 = vpop.f32.mrf.mxu1  ;;  %v4049_v23 = vor.u32 %v4771_v20, %v4048_v19  ;;  %v3909_v31 = vor.u32 %v4734_v21, %v3906_v22  ;;  %v4145_v60 = vor.u32 %v4795_v58, %v4144_v55  ;;  %v4042_v19 = vld [vmem:[#allocation8 + $0x118] sm:$0xf0] }
 0x110   :  { %v1480_v16 = vadd.f32 %v1479_v63, %v1466_v57  ;;  %v4066_v63 = vld [vmem:[#allocation8 + $0x148] sm:$0xf0]  ;;  %v364_v0 = vperm.slane %v5275_v56, 2 }
 0x111   :  { %v1468_v25 = vadd.f32 %v1467_v14, %v1454_v11  ;;  %2101 = vmatpush.bf16.msra.mxu2 %v4049_v23  ;;  %2111 = vmatpush.bf16.msra.mxu3 %v4145_v60  ;;  %v4069_v57 = vor.u32 %v4774_v62, %v4066_v63  ;;  %v4789_v14 = vld [vmem:[#allocation8 + $0x1b4] sm:$0xf0]  ;;  %v4792_v62 = vld [vmem:[#allocation8 + $0x1d4] sm:$0xf]  ;;  %v4138_v63 = vld [vmem:[#allocation8 + $0x1d8] sm:$0xf0] }
 0x112   :  { %2126 = vmatpush.bf16.msrb.mxu0 %v3949_v30  ;;  %2140 = vmatpush.bf16.msrb.mxu1 %v4013_v34  ;;  %v1494_v35 = vadd.f32 %v1493_v1, %v1480_v16  ;;  %v4136_v1 = vld [vmem:[#allocation8 + $0x1d0] sm:$0xf]  ;;  %v4053_v16 = vor.u32 %v4770_v9, %v4050_v10  ;;  %v4121_v21 = vor.u32 %v4789_v14, %v4120_v13  ;;  %v4786_v10 = vld [vmem:[#allocation8 + $0x1a4] sm:$0xf]  ;;  %v365_v13 = vperm.slane %v5275_v56, 3 }
 0x114   :  { %v1667_v37 = vmax.f32 %v1494_v35, 0.0 }
 0x115   :  { %2102 = vmatpush.bf16.msra.mxu2 %v4041_v36  ;;  %v4104_v36 = vld [vmem:[#allocation8 + $0x190] sm:$0xf] }
 0x116   :  { %2127 = vmatpush.bf16.msrb.mxu0 %v3941_v44  ;;  %2141 = vmatpush.bf16.msrb.mxu1 %v4005_v49  ;;  %v1495_v30 = vpop.f32.mrf.mxu3  ;;  %v4780_v44 = vld [vmem:[#allocation8 + $0x174] sm:$0xf]  ;;  %v4085_v49 = vor.u32 %v4778_v47, %v4082_v48 }
 0x117   :  { %v1481_v28 = vpop.f32.mrf.mxu2  ;;  %v4093_v46 = vor.u32 %v4780_v44, %v4090_v45  ;;  %v4096_v45 = vld [vmem:[#allocation8 + $0x180] sm:$0xf]  ;;  %v4796_v48 = vld [vmem:[#allocation8 + $0x1f4] sm:$0xf] }
 0x118   :  { %v1482_v29 = vadd.f32 %v1481_v28, %v1468_v25  ;;  %v4112_v25 = vld [vmem:[#allocation8 + $0x1a0] sm:$0xf] }
 0x119   :  { %2103 = vmatpush.bf16.msra.mxu2 %v4033_v43  ;;  %v4113_v35 = vor.u32 %v4787_v26, %v4112_v25 }
 0x11a   :  { %2128 = vmatpush.bf16.msrb.mxu0 %v3933_v54  ;;  %2142 = vmatpush.bf16.msrb.mxu1 %v3997_v59  ;;  %v1496_v34 = vadd.f32 %v1495_v30, %v1482_v29  ;;  %v4074_v54 = vld [vmem:[#allocation8 + $0x158] sm:$0xf0] }
 0x11c   :  { %v1671_v38 = vmax.f32 %v1496_v34, 0.0 }
 0x11d   :  { %2152 = vmatpush.bf16.msrb.mxu2 %v4093_v46  ;;  %v4783_v46 = vld [vmem:[#allocation8 + $0x184] sm:$0xf0] }
 0x11e   :  { %2129 = vmatpush.bf16.msrb.mxu0 %v3925_v6  ;;  %2143 = vmatpush.bf16.msrb.mxu1 %v3989_v7  ;;  %v1675_v40 = vpack.c.bf16 %v1671_v38, %v1667_v37  ;;  %v4793_v6 = vld [vmem:[#allocation8 + $0x1d4] sm:$0xf0]  ;;  %v4061_v7 = vor.u32 %v4772_v3, %v4058_v4  ;;  %v4097_v47 = vor.u32 %v4783_v46, %v4096_v45  ;;  %v4328_v45 = vld [vmem:[#allocation11 + $0x150] sm:$0xf]  ;;  %v4843_v46 = vld [vmem:[#allocation11 + $0x164] sm:$0xf0] }
 0x11f   :  { %v4137_v2 = vor.u32 %v4793_v6, %v4136_v1  ;;  %v4785_v37 = vld [vmem:[#allocation8 + $0x194] sm:$0xf0]  ;;  %v4790_v6 = vld [vmem:[#allocation8 + $0x1c4] sm:$0xf] }
 0x120   :  { %2090 = vmatmul.bf16.vlgmr.msra.gmra.mxu1 %v1675_v40 }
 0x121   :  { %2153 = vmatpush.bf16.msrb.mxu2 %v4085_v49  ;;  %2112 = vmatpush.bf16.msra.mxu3 %v4137_v2  ;;  %v4154_v49 = vld [vmem:[#allocation8 + $0x1f8] sm:$0xf0]  ;;  %v4130_v2 = vld [vmem:[#allocation8 + $0x1c8] sm:$0xf0] }
 0x122   :  { %2130 = vmatpush.bf16.msrb.mxu0 %v3917_v18  ;;  %2144 = vmatpush.bf16.msrb.mxu1 %v3981_v24  ;;  %v4768_v18 = vld [vmem:[#allocation8 + $0x114] sm:$0xf]  ;;  %v4157_v51 = vor.u32 %v4796_v48, %v4154_v49  ;;  %v4133_v3 = vor.u32 %v4790_v6, %v4130_v2  ;;  %v4329_v48 = vor.u32 %v4843_v46, %v4328_v45  ;;  %v4330_v49 = vld [vmem:[#allocation11 + $0x168] sm:$0xf0]  ;;  %v4258_v6 = vld [vmem:[#allocation11 + $0xd8] sm:$0xf0] }
 0x123   :  { %v4045_v28 = vor.u32 %v4768_v18, %v4042_v19  ;;  %v4782_v18 = vld [vmem:[#allocation8 + $0x184] sm:$0xf] }
 0x125   :  { %2113 = vmatpush.bf16.msra.mxu3 %v4129_v12 }
 0x126   :  { %2131 = vmatpush.bf16.msrb.mxu0 %v3909_v31  ;;  %2145 = vmatpush.bf16.msrb.mxu1 %v3973_v33  ;;  %v1507_v59 = vpop.f32.mrf.mxu0  ;;  %v1521_v61 = vpop.f32.mrf.mxu1  ;;  %v4766_v31 = vld [vmem:[#allocation8 + $0x104] sm:$0xf] }
 0x127   :  { %v1508_v11 = vadd.f32 %v1507_v59, %v364_v0  ;;  %v4037_v33 = vor.u32 %v4766_v31, %v4034_v39 }
 0x129   :  { %2132 = vmatmul.bf16.vlgmr.msrb.gmra.mxu0 %v5283_v17  ;;  %v4077_v17 = vor.u32 %v4776_v53, %v4074_v54  ;;  %v1522_v22 = vadd.f32 %v1521_v61, %v1508_v11  ;;  %2114 = vmatpush.bf16.msra.mxu3 %v4121_v21  ;;  %v4794_v54 = vld [vmem:[#allocation8 + $0x1e4] sm:$0xf]  ;;  %v4114_v11 = vld [vmem:[#allocation8 + $0x1a8] sm:$0xf0] }
 0x12a   :  { %v4117_v12 = vor.u32 %v4786_v10, %v4114_v11  ;;  %2776 = vmatpush.bf16.msra.mxu0 %v4329_v48  ;;  %v4816_v10 = vld [vmem:[#allocation11 + $0x94] sm:$0xf]  ;;  %v4234_v11 = vld [vmem:[#allocation11 + $0xa8] sm:$0xf0]  ;;  %v4162_v48 = vld [vmem:[#allocation11 + $0x18] sm:$0xf0] }
 0x12b   :  { %2154 = vmatpush.bf16.msrb.mxu2 %v4077_v17  ;;  %v4146_v17 = vld [vmem:[#allocation8 + $0x1e8] sm:$0xf0] }
 0x12c   :  { %v4149_v59 = vor.u32 %v4794_v54, %v4146_v17  ;;  %v4306_v54 = vld [vmem:[#allocation11 + $0x138] sm:$0xf0] }
 0x12d   :  { %2115 = vmatpush.bf16.msra.mxu3 %v4113_v35 }
 0x12e   :  { %v1509_v20 = vpop.f32.mrf.mxu0  ;;  %v1523_v24 = vpop.f32.mrf.mxu1 }
 0x12f   :  { %2155 = vmatpush.bf16.msrb.mxu2 %v4069_v57  ;;  %v1535_v15 = vpop.f32.mrf.mxu2  ;;  %v1549_v27 = vpop.f32.mrf.mxu3  ;;  %v1510_v23 = vadd.f32 %v1509_v20, %v364_v0  ;;  %v4141_v0 = vor.u32 %v4792_v62, %v4138_v63  ;;  %v4282_v62 = vld [vmem:[#allocation11 + $0x108] sm:$0xf0]  ;;  %v4256_v63 = vld [vmem:[#allocation11 + $0xc0] sm:$0xf] }
 0x130   :  { %2146 = vmatmul.bf16.vlgmr.msrb.gmra.mxu1 %v1675_v40  ;;  %v1536_v29 = vadd.f32 %v1535_v15, %v1522_v22  ;;  %v4105_v40 = vor.u32 %v4785_v37, %v4104_v36  ;;  %v4784_v15 = vld [vmem:[#allocation8 + $0x194] sm:$0xf] }
 0x131   :  { %v1524_v30 = vadd.f32 %v1523_v24, %v1510_v23  ;;  %v4098_v24 = vld [vmem:[#allocation8 + $0x188] sm:$0xf0] }
 0x132   :  { %v1550_v34 = vadd.f32 %v1549_v27, %v1536_v29  ;;  %2116 = vmatpush.bf16.msra.mxu3 %v4105_v40  ;;  %v4101_v25 = vor.u32 %v4782_v18, %v4098_v24 }
 0x133   :  { %2156 = vmatpush.bf16.msrb.mxu2 %v4061_v7  ;;  %v4788_v7 = vld [vmem:[#allocation8 + $0x1b4] sm:$0xf] }
 0x134   :  { %v4125_v9 = vor.u32 %v4788_v7, %v4122_v8  ;;  %v4520_v7 = vld [vmem:[#allocation11 + $0x2d0] sm:$0xf] }
 0x136   :  { %2117 = vmatpush.bf16.msra.mxu3 %v4097_v47  ;;  %v4840_v47 = vld [vmem:[#allocation11 + $0x154] sm:$0xf] }
 0x137   :  { %2157 = vmatpush.bf16.msrb.mxu2 %v4053_v16  ;;  %v1537_v32 = vpop.f32.mrf.mxu2  ;;  %v1551_v43 = vpop.f32.mrf.mxu3  ;;  %v4106_v16 = vld [vmem:[#allocation8 + $0x198] sm:$0xf0] }
 0x138   :  { %v1538_v42 = vadd.f32 %v1537_v32, %v1524_v30  ;;  %v4109_v22 = vor.u32 %v4784_v15, %v4106_v16  ;;  %v4522_v15 = vld [vmem:[#allocation11 + $0x2e8] sm:$0xf0]  ;;  %v4208_v16 = vld [vmem:[#allocation11 + $0x60] sm:$0xf] }
 0x13a   :  { %v1552_v50 = vadd.f32 %v1551_v43, %v1538_v42  ;;  %2166 = vmatpush.bf16.msrb.mxu3 %v4157_v51  ;;  %v4837_v51 = vld [vmem:[#allocation11 + $0x134] sm:$0xf0] }
 0x13b   :  { %2158 = vmatpush.bf16.msrb.mxu2 %v4045_v28 }
 0x13e   :  { %2167 = vmatpush.bf16.msrb.mxu3 %v4149_v59  ;;  %v4831_v59 = vld [vmem:[#allocation11 + $0x104] sm:$0xf0] }
 0x13f   :  { %2159 = vmatpush.bf16.msrb.mxu2 %v4037_v33 }
 0x142   :  { %2168 = vmatpush.bf16.msrb.mxu3 %v4141_v0 }
 0x146   :  { %v1563_v38 = vpop.f32.mrf.mxu0  ;;  %v1577_v41 = vpop.f32.mrf.mxu1  ;;  %2169 = vmatpush.bf16.msrb.mxu3 %v4133_v3 }
 0x147   :  { %v1564_v44 = vadd.f32 %v1563_v38, %v1550_v34 }
 0x149   :  { %v1578_v52 = vadd.f32 %v1577_v41, %v1564_v44 }
 0x14a   :  { %2170 = vmatpush.bf16.msrb.mxu3 %v4125_v9  ;;  %v4891_v9 = vld [vmem:[#allocation11 + $0x2e4] sm:$0xf0] }
 0x14b   :  { %v1668_v60 = vmax.f32 %v1578_v52, 0.0  ;;  %v4333_v52 = vor.u32 %v4840_v47, %v4330_v49  ;;  %v4798_v47 = vld [vmem:[#allocation11 + $0x4] sm:$0xf] }
 0x14c   :  { %v4870_v49 = vld [vmem:[#allocation11 + $0x244] sm:$0xf] }
 0x14e   :  { %v1565_v53 = vpop.f32.mrf.mxu0  ;;  %v1579_v58 = vpop.f32.mrf.mxu1  ;;  %2171 = vmatpush.bf16.msrb.mxu3 %v4117_v12  ;;  %v4521_v12 = vor.u32 %v4891_v9, %v4520_v7  ;;  %v4858_v9 = vld [vmem:[#allocation11 + $0x1e4] sm:$0xf] }
 0x14f   :  { %v1566_v55 = vadd.f32 %v1565_v53, %v1552_v50  ;;  %v1591_v4 = vpop.f32.mrf.mxu2  ;;  %v1605_v5 = vpop.f32.mrf.mxu3  ;;  %v4304_v50 = vld [vmem:[#allocation11 + $0x120] sm:$0xf]  ;;  %v4834_v53 = vld [vmem:[#allocation11 + $0x124] sm:$0xf] }
 0x150   :  { %v1592_v19 = vadd.f32 %v1591_v4, %v365_v13  ;;  %v4305_v17 = vor.u32 %v4837_v51, %v4304_v50  ;;  %v4232_v4 = vld [vmem:[#allocation11 + $0x90] sm:$0xf]  ;;  %2790 = vmatpush.bf16.msra.mxu1 %v4521_v12  ;;  %v4165_v50 = vor.u32 %v4798_v47, %v4162_v48  ;;  %v4450_v51 = vld [vmem:[#allocation11 + $0x258] sm:$0xf0]  ;;  %v4288_v12 = vld [vmem:[#allocation11 + $0xf8] sm:$0xf] }
 0x151   :  { %v1580_v61 = vadd.f32 %v1579_v58, %v1566_v55  ;;  %v4309_v55 = vor.u32 %v4834_v53, %v4306_v54  ;;  %v4280_v58 = vld [vmem:[#allocation11 + $0xf0] sm:$0xf]  ;;  %v4453_v54 = vor.u32 %v4870_v49, %v4450_v51  ;;  %v4216_v49 = vld [vmem:[#allocation11 + $0x68] sm:$0xf] }
 0x152   :  { %2172 = vmatpush.bf16.msrb.mxu3 %v4109_v22  ;;  %v1606_v27 = vadd.f32 %v1605_v5, %v1592_v19  ;;  %2777 = vmatpush.bf16.msra.mxu0 %v4305_v17  ;;  %v4819_v5 = vld [vmem:[#allocation11 + $0xa4] sm:$0xf0]  ;;  %v4813_v19 = vld [vmem:[#allocation11 + $0x74] sm:$0xf0]  ;;  %v4844_v53 = vld [vmem:[#allocation11 + $0x16c] sm:$0xf0] }
 0x153   :  { %v1672_v57 = vmax.f32 %v1580_v61, 0.0  ;;  %v4281_v61 = vor.u32 %v4831_v59, %v4280_v58  ;;  %v4233_v8 = vor.u32 %v4819_v5, %v4232_v4  ;;  %v4209_v22 = vor.u32 %v4813_v19, %v4208_v16  ;;  %v4338_v58 = vld [vmem:[#allocation11 + $0x170] sm:$0xf0]  ;;  %v4314_v4 = vld [vmem:[#allocation11 + $0x140] sm:$0xf0] }
 0x154   :  { %v4400_v5 = vld [vmem:[#allocation11 + $0x1e0] sm:$0xf]  ;;  %v4376_v19 = vld [vmem:[#allocation11 + $0x1b0] sm:$0xf]  ;;  %v4504_v51 = vld [vmem:[#allocation11 + $0x2a8] sm:$0xf] }
 0x155   :  { %v1676_v1 = vpack.c.bf16 %v1672_v57, %v1668_v60  ;;  %v4828_v60 = vld [vmem:[#allocation11 + $0xf4] sm:$0xf]  ;;  %v4825_v57 = vld [vmem:[#allocation11 + $0xd4] sm:$0xf0] }
 0x156   :  { %2173 = vmatpush.bf16.msrb.mxu3 %v4101_v25  ;;  %v4285_v0 = vor.u32 %v4828_v60, %v4282_v62  ;;  %2778 = vmatpush.bf16.msra.mxu0 %v4281_v61  ;;  %v4257_v2 = vor.u32 %v4825_v57, %v4256_v63  ;;  %v4810_v25 = vld [vmem:[#allocation11 + $0x64] sm:$0xf]  ;;  %v4424_v60 = vld [vmem:[#allocation11 + $0x210] sm:$0xf]  ;;  %v4867_v61 = vld [vmem:[#allocation11 + $0x224] sm:$0xf0] }
 0x157   :  { %2104 = vmatmul.bf16.vlgmr.msra.gmra.mxu2 %v1676_v1  ;;  %v1593_v14 = vpop.f32.mrf.mxu2  ;;  %v1607_v20 = vpop.f32.mrf.mxu3  ;;  %v4864_v62 = vld [vmem:[#allocation11 + $0x214] sm:$0xf]  ;;  %v4425_v63 = vor.u32 %v4867_v61, %v4424_v60  ;;  %v4426_v57 = vld [vmem:[#allocation11 + $0x228] sm:$0xf0]  ;;  %v4506_v60 = vld [vmem:[#allocation11 + $0x2c0] sm:$0xf0] }
 0x158   :  { %v1594_v28 = vadd.f32 %v1593_v14, %v365_v13  ;;  %2804 = vmatpush.bf16.msra.mxu2 %v4333_v52  ;;  %v4237_v13 = vor.u32 %v4816_v10, %v4234_v11  ;;  %v4888_v14 = vld [vmem:[#allocation11 + $0x2d4] sm:$0xf]  ;;  %v4336_v52 = vld [vmem:[#allocation11 + $0x158] sm:$0xf]  ;;  %v4402_v10 = vld [vmem:[#allocation11 + $0x1f8] sm:$0xf0] }
 0x159   :  { %v4525_v18 = vor.u32 %v4888_v14, %v4522_v15  ;;  %v4337_v17 = vor.u32 %v4844_v53, %v4336_v52  ;;  %v4829_v14 = vld [vmem:[#allocation11 + $0xfc] sm:$0xf]  ;;  %v4405_v15 = vor.u32 %v4858_v9, %v4402_v10  ;;  %v4886_v53 = vld [vmem:[#allocation11 + $0x2bc] sm:$0xf0]  ;;  %v4168_v9 = vld [vmem:[#allocation11 + $0x8] sm:$0xf] }
 0x15a   :  { %v1608_v56 = vadd.f32 %v1607_v20, %v1594_v28  ;;  %2779 = vmatpush.bf16.msra.mxu0 %v4257_v2  ;;  %v4496_v20 = vld [vmem:[#allocation11 + $0x2a0] sm:$0xf] }
 0x15b   :  { %v4802_v10 = vld [vmem:[#allocation11 + $0x1c] sm:$0xf0] }
 0x15c   :  { %2805 = vmatpush.bf16.msra.mxu2 %v4309_v55  ;;  %v4841_v55 = vld [vmem:[#allocation11 + $0x15c] sm:$0xf] }
 0x15d   :  { %v4341_v59 = vor.u32 %v4841_v55, %v4338_v58  ;;  %v4505_v55 = vor.u32 %v4886_v53, %v4504_v51 }
 0x15e   :  { %2780 = vmatpush.bf16.msra.mxu0 %v4233_v8  ;;  %v4861_v8 = vld [vmem:[#allocation11 + $0x1f4] sm:$0xf0] }
 0x15f   :  { %v4401_v11 = vor.u32 %v4861_v8, %v4400_v5  ;;  %v4877_v5 = vld [vmem:[#allocation11 + $0x27c] sm:$0xf] }
 0x160   :  { %2806 = vmatpush.bf16.msra.mxu2 %v4285_v0  ;;  %v4312_v0 = vld [vmem:[#allocation11 + $0x128] sm:$0xf] }
 0x162   :  { %2781 = vmatpush.bf16.msra.mxu0 %v4209_v22  ;;  %v4852_v22 = vld [vmem:[#allocation11 + $0x1b4] sm:$0xf] }
 0x166   :  { %v1619_v21 = vpop.f32.mrf.mxu0  ;;  %v1633_v26 = vpop.f32.mrf.mxu1 }
 0x167   :  { %2160 = vmatmul.bf16.vlgmr.msrb.gmra.mxu2 %v1676_v1  ;;  %v1620_v23 = vadd.f32 %v1619_v21, %v1606_v27  ;;  %v4822_v1 = vld [vmem:[#allocation11 + $0xc4] sm:$0xf]  ;;  %v4885_v21 = vld [vmem:[#allocation11 + $0x2b4] sm:$0xf0] }
 0x168   :  { %v4261_v3 = vor.u32 %v4822_v1, %v4258_v6  ;;  %v4497_v24 = vor.u32 %v4885_v21, %v4496_v20  ;;  %v4882_v27 = vld [vmem:[#allocation11 + $0x2a4] sm:$0xf]  ;;  %v4838_v1 = vld [vmem:[#allocation11 + $0x13c] sm:$0xf0]  ;;  %v4429_v6 = vor.u32 %v4864_v62, %v4426_v57  ;;  %v4855_v20 = vld [vmem:[#allocation11 + $0x1c4] sm:$0xf0] }
 0x169   :  { %v1634_v31 = vadd.f32 %v1633_v26, %v1620_v23  ;;  %v4210_v26 = vld [vmem:[#allocation11 + $0x78] sm:$0xf0]  ;;  %v4313_v2 = vor.u32 %v4838_v1, %v4312_v0  ;;  %v4192_v62 = vld [vmem:[#allocation11 + $0x38] sm:$0xf]  ;;  %v4880_v1 = vld [vmem:[#allocation11 + $0x28c] sm:$0xf0] }
 0x16a   :  { %2807 = vmatpush.bf16.msra.mxu2 %v4261_v3  ;;  %v4213_v28 = vor.u32 %v4810_v25, %v4210_v26  ;;  %v4498_v23 = vld [vmem:[#allocation11 + $0x2b8] sm:$0xf0]  ;;  %2791 = vmatpush.bf16.msra.mxu1 %v4497_v24  ;;  %v4835_v3 = vld [vmem:[#allocation11 + $0x12c] sm:$0xf]  ;;  %v4264_v25 = vld [vmem:[#allocation11 + $0xc8] sm:$0xf] }
 0x16b   :  { %v4317_v7 = vor.u32 %v4835_v3, %v4314_v4  ;;  %v4378_v24 = vld [vmem:[#allocation11 + $0x1c8] sm:$0xf0]  ;;  %v4826_v26 = vld [vmem:[#allocation11 + $0xdc] sm:$0xf0]  ;;  %v4480_v57 = vld [vmem:[#allocation11 + $0x278] sm:$0xf] }
 0x16c   :  { %v4481_v3 = vor.u32 %v4880_v1, %v4480_v57 }
 0x16e   :  { %v1647_v35 = vpop.f32.mrf.mxu2  ;;  %v1661_v29 = vpop.f32.mrf.mxu3  ;;  %2808 = vmatpush.bf16.msra.mxu2 %v4237_v13  ;;  %v4832_v13 = vld [vmem:[#allocation11 + $0x10c] sm:$0xf0] }
 0x16f   :  { %v1621_v30 = vpop.f32.mrf.mxu0  ;;  %v1648_v32 = vadd.f32 %v1647_v35, %v1634_v31  ;;  %v1635_v33 = vpop.f32.mrf.mxu1  ;;  %v4501_v35 = vor.u32 %v4882_v27, %v4498_v23  ;;  %v4289_v16 = vor.u32 %v4832_v13, %v4288_v12  ;;  %v4823_v27 = vld [vmem:[#allocation11 + $0xcc] sm:$0xf]  ;;  %v4377_v23 = vor.u32 %v4855_v20, %v4376_v19  ;;  %v4874_v13 = vld [vmem:[#allocation11 + $0x25c] sm:$0xf0]  ;;  %v4458_v20 = vld [vmem:[#allocation11 + $0x260] sm:$0xf0] }
 0x170   :  { %v1622_v39 = vadd.f32 %v1621_v30, %v1608_v56  ;;  %v4184_v56 = vld [vmem:[#allocation11 + $0x30] sm:$0xf]  ;;  %v4169_v12 = vor.u32 %v4802_v10, %v4168_v9  ;;  %v4871_v19 = vld [vmem:[#allocation11 + $0x24c] sm:$0xf] }
 0x171   :  { %v1662_v37 = vadd.f32 %v1661_v29, %v1648_v32  ;;  %v4807_v29 = vld [vmem:[#allocation11 + $0x44] sm:$0xf0]  ;;  %v4472_v30 = vld [vmem:[#allocation11 + $0x270] sm:$0xf]  ;;  %v4804_v32 = vld [vmem:[#allocation11 + $0x34] sm:$0xf] }
 0x172   :  { %v1636_v34 = vadd.f32 %v1635_v33, %v1622_v39  ;;  %2809 = vmatpush.bf16.msra.mxu2 %v4213_v28  ;;  %v4185_v31 = vor.u32 %v4807_v29, %v4184_v56  ;;  %v4879_v39 = vld [vmem:[#allocation11 + $0x284] sm:$0xf0]  ;;  %v4186_v33 = vld [vmem:[#allocation11 + $0x48] sm:$0xf0]  ;;  %v4266_v28 = vld [vmem:[#allocation11 + $0xe0] sm:$0xf0]  ;;  %v4265_v56 = vor.u32 %v4826_v26, %v4264_v25 }
 0x173   :  { %v1669_v42 = vmax.f32 %v1662_v37, 0.0  ;;  %v4876_v37 = vld [vmem:[#allocation11 + $0x274] sm:$0xf]  ;;  %v4269_v29 = vor.u32 %v4823_v27, %v4266_v28  ;;  %v4865_v25 = vld [vmem:[#allocation11 + $0x21c] sm:$0xf] }
 0x174   :  { %2782 = vmatpush.bf16.msra.mxu0 %v4185_v31  ;;  %v4849_v31 = vld [vmem:[#allocation11 + $0x194] sm:$0xf0]  ;;  %v4434_v27 = vld [vmem:[#allocation11 + $0x230] sm:$0xf0] }
 0x175   :  { %v4437_v28 = vor.u32 %v4865_v25, %v4434_v27  ;;  %v4830_v25 = vld [vmem:[#allocation11 + $0x104] sm:$0xf] }
 0x176   :  { %v1649_v36 = vpop.f32.mrf.mxu2  ;;  %v1663_v40 = vpop.f32.mrf.mxu3 }
 0x177   :  { %v1650_v38 = vadd.f32 %v1649_v36, %v1636_v34  ;;  %v4473_v34 = vor.u32 %v4879_v39, %v4472_v30  ;;  %v4189_v36 = vor.u32 %v4804_v32, %v4186_v33  ;;  %v4352_v30 = vld [vmem:[#allocation11 + $0x180] sm:$0xf]  ;;  %v4846_v39 = vld [vmem:[#allocation11 + $0x184] sm:$0xf]  ;;  %v4354_v33 = vld [vmem:[#allocation11 + $0x198] sm:$0xf0] }
 0x178   :  { %v4353_v32 = vor.u32 %v4849_v31, %v4352_v30  ;;  %v4859_v30 = vld [vmem:[#allocation11 + $0x1ec] sm:$0xf]  ;;  %v4410_v31 = vld [vmem:[#allocation11 + $0x200] sm:$0xf0] }
 0x179   :  { %v1664_v41 = vadd.f32 %v1663_v40, %v1650_v38  ;;  %v4474_v38 = vld [vmem:[#allocation11 + $0x288] sm:$0xf0]  ;;  %v4160_v40 = vld [vmem:[#allocation11] sm:$0xf]  ;;  %2792 = vmatpush.bf16.msra.mxu1 %v4473_v34  ;;  %2810 = vmatpush.bf16.msra.mxu2 %v4189_v36  ;;  %v4240_v34 = vld [vmem:[#allocation11 + $0x98] sm:$0xf] }
 0x17a   :  { %v4820_v36 = vld [vmem:[#allocation11 + $0xac] sm:$0xf0] }
 0x17b   :  { %v1673_v43 = vmax.f32 %v1664_v41, 0.0  ;;  %v4477_v41 = vor.u32 %v4876_v37, %v4474_v38  ;;  %v4357_v37 = vor.u32 %v4846_v39, %v4354_v33  ;;  %v4241_v38 = vor.u32 %v4820_v36, %v4240_v34  ;;  %v5290_v34 = vld [vmem:[#allocation10] sm:$0x3]  ;;  %v4384_v36 = vld [vmem:[#allocation11 + $0x1b8] sm:$0xf] }
 0x17c   :  { %v4413_v33 = vor.u32 %v4859_v30, %v4410_v31  ;;  %v4272_v30 = vld [vmem:[#allocation11 + $0xd0] sm:$0xf] }
 0x17d   :  { %v1677_v44 = vpack.c.bf16 %v1673_v43, %v1669_v42  ;;  %v4801_v42 = vld [vmem:[#allocation11 + $0x14] sm:$0xf0]  ;;  %v4448_v43 = vld [vmem:[#allocation11 + $0x240] sm:$0xf]  ;;  %2811 = vmatpush.bf16.msra.mxu2 %v4165_v50 }
 0x17e   :  { %v4161_v45 = vor.u32 %v4801_v42, %v4160_v40  ;;  %v4528_v40 = vld [vmem:[#allocation11 + $0x2d8] sm:$0xf]  ;;  %v4817_v42 = vld [vmem:[#allocation11 + $0x9c] sm:$0xf]  ;;  %v4814_v50 = vld [vmem:[#allocation11 + $0x7c] sm:$0xf0] }
 0x17f   :  { %2118 = vmatmul.bf16.vlgmr.msra.gmra.mxu3 %v1677_v44  ;;  %v4217_v52 = vor.u32 %v4814_v50, %v4216_v49  ;;  %v4362_v50 = vld [vmem:[#allocation11 + $0x1a0] sm:$0xf0] }
 0x180   :  { %2818 = vmatpush.bf16.msra.mxu3 %v4525_v18  ;;  %2783 = vmatpush.bf16.msra.mxu0 %v4161_v45  ;;  %v4290_v18 = vld [vmem:[#allocation11 + $0x110] sm:$0xf0]  ;;  %v4889_v45 = vld [vmem:[#allocation11 + $0x2dc] sm:$0xf] }
 0x181   :  { %2860 = vmatpush.bf16.msrb.mxu2 %v4341_v59  ;;  %v4293_v21 = vor.u32 %v4829_v14, %v4290_v18  ;;  %v4883_v59 = vld [vmem:[#allocation11 + $0x2ac] sm:$0xf] }
 0x182   :  { %v4509_v61 = vor.u32 %v4883_v59, %v4506_v60  ;;  %v4799_v14 = vld [vmem:[#allocation11 + $0xc] sm:$0xf] }
 0x184   :  { %2819 = vmatpush.bf16.msra.mxu3 %v4501_v35  ;;  %2832 = vmatpush.bf16.msrb.mxu0 %v4337_v17  ;;  %v4381_v35 = vor.u32 %v4852_v22, %v4378_v24  ;;  %v4218_v17 = vld [vmem:[#allocation11 + $0x80] sm:$0xf0]  ;;  %v4432_v22 = vld [vmem:[#allocation11 + $0x218] sm:$0xf]  ;;  %v4868_v24 = vld [vmem:[#allocation11 + $0x22c] sm:$0xf0] }
 0x185   :  { %2861 = vmatpush.bf16.msrb.mxu2 %v4317_v7  ;;  %v4482_v7 = vld [vmem:[#allocation11 + $0x290] sm:$0xf0]  ;;  %v4433_v26 = vor.u32 %v4868_v24, %v4432_v22  ;;  %v4833_v24 = vld [vmem:[#allocation11 + $0x114] sm:$0xf0] }
 0x186   :  { %v4485_v8 = vor.u32 %v4877_v5, %v4482_v7 }
 0x188   :  { %2820 = vmatpush.bf16.msra.mxu3 %v4477_v41  ;;  %2833 = vmatpush.bf16.msrb.mxu0 %v4313_v2  ;;  %v4892_v41 = vld [vmem:[#allocation11 + $0x2ec] sm:$0xf0]  ;;  %v4194_v2 = vld [vmem:[#allocation11 + $0x50] sm:$0xf0] }
 0x189   :  { %2862 = vmatpush.bf16.msrb.mxu2 %v4293_v21  ;;  %v4461_v21 = vor.u32 %v4871_v19, %v4458_v20 }
 0x18c   :  { %2821 = vmatpush.bf16.msra.mxu3 %v4453_v54  ;;  %2834 = vmatpush.bf16.msrb.mxu0 %v4289_v16  ;;  %v4811_v54 = vld [vmem:[#allocation11 + $0x6c] sm:$0xf] }
 0x18d   :  { %2863 = vmatpush.bf16.msrb.mxu2 %v4269_v29  ;;  %v4221_v58 = vor.u32 %v4811_v54, %v4218_v17  ;;  %v4862_v29 = vld [vmem:[#allocation11 + $0x1fc] sm:$0xf0] }
 0x18f   :  { %2174 = vmatmul.bf16.vlgmr.msrb.gmra.mxu3 %v1677_v44  ;;  %v4873_v44 = vld [vmem:[#allocation11 + $0x254] sm:$0xf0] }
 0x190   :  { %v4449_v46 = vor.u32 %v4873_v44, %v4448_v43  ;;  %2822 = vmatpush.bf16.msra.mxu3 %v4429_v6  ;;  %2835 = vmatpush.bf16.msrb.mxu0 %v4265_v56  ;;  %v4529_v43 = vor.u32 %v4892_v41, %v4528_v40  ;;  %v4242_v44 = vld [vmem:[#allocation11 + $0xb0] sm:$0xf0]  ;;  %v4805_v6 = vld [vmem:[#allocation11 + $0x3c] sm:$0xf]  ;;  %v4408_v56 = vld [vmem:[#allocation11 + $0x1e8] sm:$0xf] }
 0x191   :  { %v4245_v47 = vor.u32 %v4817_v42, %v4242_v44  ;;  %v4197_v4 = vor.u32 %v4805_v6, %v4194_v2  ;;  %v4386_v41 = vld [vmem:[#allocation11 + $0x1d0] sm:$0xf0]  ;;  %v4360_v44 = vld [vmem:[#allocation11 + $0x188] sm:$0xf]  ;;  %v4845_v6 = vld [vmem:[#allocation11 + $0x174] sm:$0xf0] }
 0x192   :  { %2793 = vmatpush.bf16.msra.mxu1 %v4449_v46  ;;  %v4530_v46 = vld [vmem:[#allocation11 + $0x2f0] sm:$0xf0]  ;;  %v4842_v2 = vld [vmem:[#allocation11 + $0x164] sm:$0xf] }
 0x193   :  { %v4533_v48 = vor.u32 %v4889_v45, %v4530_v46  ;;  %2864 = vmatpush.bf16.msrb.mxu2 %v4245_v47  ;;  %v4850_v45 = vld [vmem:[#allocation11 + $0x19c] sm:$0xf0]  ;;  %v4847_v46 = vld [vmem:[#allocation11 + $0x18c] sm:$0xf] }
 0x194   :  { %2823 = vmatpush.bf16.msra.mxu3 %v4405_v15  ;;  %2836 = vmatpush.bf16.msrb.mxu0 %v4241_v38  ;;  %v4170_v15 = vld [vmem:[#allocation11 + $0x20] sm:$0xf0]  ;;  %v4853_v38 = vld [vmem:[#allocation11 + $0x1bc] sm:$0xf]  ;;  %v4361_v49 = vor.u32 %v4850_v45, %v4360_v44  ;;  %v4365_v51 = vor.u32 %v4847_v46, %v4362_v50  ;;  %v4821_v44 = vld [vmem:[#allocation11 + $0xb4] sm:$0xf0] }
 0x195   :  { %v4173_v18 = vor.u32 %v4799_v14, %v4170_v15  ;;  %v4389_v42 = vor.u32 %v4853_v38, %v4386_v41  ;;  %v4836_v14 = vld [vmem:[#allocation11 + $0x134] sm:$0xf]  ;;  %v4322_v15 = vld [vmem:[#allocation11 + $0x148] sm:$0xf0]  ;;  %v4536_v45 = vld [vmem:[#allocation11 + $0x2e0] sm:$0xf] }
 0x196   :  { %2794 = vmatpush.bf16.msra.mxu1 %v4425_v63  ;;  %v4808_v63 = vld [vmem:[#allocation11 + $0x4c] sm:$0xf0]  ;;  %v4325_v20 = vor.u32 %v4836_v14, %v4322_v15  ;;  %v4893_v46 = vld [vmem:[#allocation11 + $0x2f4] sm:$0xf0]  ;;  %v4490_v14 = vld [vmem:[#allocation11 + $0x298] sm:$0xf0] }
 0x197   :  { %2865 = vmatpush.bf16.msrb.mxu2 %v4221_v58  ;;  %v4193_v0 = vor.u32 %v4808_v63, %v4192_v62 }
 0x198   :  { %2824 = vmatpush.bf16.msra.mxu3 %v4381_v35  ;;  %2837 = vmatpush.bf16.msrb.mxu0 %v4217_v52 }
 0x19a   :  { %2795 = vmatpush.bf16.msra.mxu1 %v4401_v11  ;;  %v4456_v11 = vld [vmem:[#allocation11 + $0x248] sm:$0xf] }
 0x19b   :  { %2866 = vmatpush.bf16.msrb.mxu2 %v4197_v4  ;;  %v4457_v16 = vor.u32 %v4874_v13, %v4456_v11  ;;  %v4320_v11 = vld [vmem:[#allocation11 + $0x130] sm:$0xf]  ;;  %v4839_v13 = vld [vmem:[#allocation11 + $0x144] sm:$0xf0] }
 0x19c   :  { %2825 = vmatpush.bf16.msra.mxu3 %v4357_v37  ;;  %2838 = vmatpush.bf16.msrb.mxu0 %v4193_v0  ;;  %v4856_v37 = vld [vmem:[#allocation11 + $0x1cc] sm:$0xf0]  ;;  %v4344_v0 = vld [vmem:[#allocation11 + $0x160] sm:$0xf]  ;;  %v4321_v19 = vor.u32 %v4839_v13, %v4320_v11  ;;  %v4202_v11 = vld [vmem:[#allocation11 + $0x58] sm:$0xf0] }
 0x19d   :  { %v2091_v35 = vpop.f32.mrf.mxu1  ;;  %v4385_v40 = vor.u32 %v4856_v37, %v4384_v36  ;;  %v4345_v9 = vor.u32 %v4845_v6, %v4344_v0  ;;  %v4884_v0 = vld [vmem:[#allocation11 + $0x2b4] sm:$0xf]  ;;  %v4878_v13 = vld [vmem:[#allocation11 + $0x284] sm:$0xf] }
 0x19e   :  { %2796 = vmatpush.bf16.msra.mxu1 %v4377_v23  ;;  %v2077_v23 = vpop.f32.mrf.mxu0 }
 0x19f   :  { %2867 = vmatpush.bf16.msrb.mxu2 %v4173_v18 }
 0x1a0   :  { %2874 = vmatpush.bf16.msrb.mxu3 %v4533_v48  ;;  %2839 = vmatpush.bf16.msrb.mxu0 %v4169_v12 }
 0x1a2   :  { %2797 = vmatpush.bf16.msra.mxu1 %v4353_v32  ;;  %v4409_v32 = vor.u32 %v4862_v29, %v4408_v56 }
 0x1a4   :  { %2875 = vmatpush.bf16.msrb.mxu3 %v4509_v61 }
 0x1a5   :  { %v2093_v48 = vpop.f32.mrf.mxu1 }
 0x1a6   :  { %2846 = vmatpush.bf16.msrb.mxu1 %v4529_v43  ;;  %v1744_v43 = vperm.slane %v5290_v34, 0  ;;  %v2079_v47 = vpop.f32.mrf.mxu0 }
 0x1a8   :  { %2876 = vmatpush.bf16.msrb.mxu3 %v4485_v8  ;;  %v2078_v54 = vadd.f32 %v2077_v23, %v1744_v43  ;;  %v2080_v17 = vadd.f32 %v2079_v47, %v1744_v43  ;;  %v1745_v8 = vperm.slane %v5290_v34, 1  ;;  %v4274_v34 = vld [vmem:[#allocation11 + $0xe8] sm:$0xf0]  ;;  %v4248_v43 = vld [vmem:[#allocation11 + $0xa0] sm:$0xf] }
 0x1a9   :  { %v4818_v47 = vld [vmem:[#allocation11 + $0xa4] sm:$0xf] }
 0x1aa   :  { %2847 = vmatpush.bf16.msrb.mxu1 %v4505_v55  ;;  %v2092_v55 = vadd.f32 %v2091_v35, %v2078_v54  ;;  %v2094_v58 = vadd.f32 %v2093_v48, %v2080_v17  ;;  %v4250_v48 = vld [vmem:[#allocation11 + $0xb8] sm:$0xf0]  ;;  %v4249_v54 = vor.u32 %v4821_v44, %v4248_v43  ;;  %v4537_v17 = vor.u32 %v4893_v46, %v4536_v45  ;;  %v4392_v43 = vld [vmem:[#allocation11 + $0x1c0] sm:$0xf]  ;;  %v4857_v44 = vld [vmem:[#allocation11 + $0x1d4] sm:$0xf0] }
 0x1ab   :  { %v4854_v45 = vld [vmem:[#allocation11 + $0x1c4] sm:$0xf]  ;;  %v4394_v46 = vld [vmem:[#allocation11 + $0x1d8] sm:$0xf0] }
 0x1ac   :  { %2877 = vmatpush.bf16.msrb.mxu3 %v4461_v21  ;;  %v4296_v21 = vld [vmem:[#allocation11 + $0x100] sm:$0xf] }
 0x1ad   :  { %v2147_v63 = vpop.f32.mrf.mxu1  ;;  %v4297_v56 = vor.u32 %v4833_v24, %v4296_v21  ;;  %v4493_v21 = vor.u32 %v4878_v13, %v4490_v14  ;;  %v4875_v24 = vld [vmem:[#allocation11 + $0x264] sm:$0xf0] }
 0x1ae   :  { %2848 = vmatpush.bf16.msrb.mxu1 %v4481_v3  ;;  %v2133_v60 = vpop.f32.mrf.mxu0  ;;  %v4346_v3 = vld [vmem:[#allocation11 + $0x178] sm:$0xf0] }
 0x1af   :  { %v4349_v10 = vor.u32 %v4842_v2, %v4346_v3  ;;  %v2134_v22 = vadd.f32 %v2133_v60, %v1745_v8  ;;  %v4200_v3 = vld [vmem:[#allocation11 + $0x40] sm:$0xf] }
 0x1b0   :  { %2878 = vmatpush.bf16.msrb.mxu3 %v4437_v28 }
 0x1b1   :  { %v2148_v23 = vadd.f32 %v2147_v63, %v2134_v22  ;;  %v4812_v63 = vld [vmem:[#allocation11 + $0x74] sm:$0xf]  ;;  %v4464_v22 = vld [vmem:[#allocation11 + $0x250] sm:$0xf] }
 0x1b2   :  { %2849 = vmatpush.bf16.msrb.mxu1 %v4457_v16 }
 0x1b4   :  { %2879 = vmatpush.bf16.msrb.mxu3 %v4413_v33  ;;  %v4824_v33 = vld [vmem:[#allocation11 + $0xd4] sm:$0xf] }
 0x1b5   :  { %v2149_v27 = vpop.f32.mrf.mxu1  ;;  %v4277_v41 = vor.u32 %v4824_v33, %v4274_v34 }
 0x1b6   :  { %2850 = vmatpush.bf16.msrb.mxu1 %v4433_v26  ;;  %v2135_v16 = vpop.f32.mrf.mxu0  ;;  %v4298_v26 = vld [vmem:[#allocation11 + $0x118] sm:$0xf0] }
 0x1b7   :  { %v2136_v28 = vadd.f32 %v2135_v16, %v1745_v8  ;;  %v4301_v29 = vor.u32 %v4830_v25, %v4298_v26  ;;  %v4488_v8 = vld [vmem:[#allocation11 + $0x280] sm:$0xf]  ;;  %v4800_v25 = vld [vmem:[#allocation11 + $0x14] sm:$0xf]  ;;  %v4178_v26 = vld [vmem:[#allocation11 + $0x28] sm:$0xf0] }
 0x1b8   :  { %2880 = vmatpush.bf16.msrb.mxu3 %v4389_v42 }
 0x1b9   :  { %v2150_v31 = vadd.f32 %v2149_v27, %v2136_v28  ;;  %v4872_v27 = vld [vmem:[#allocation11 + $0x254] sm:$0xf]  ;;  %v4466_v28 = vld [vmem:[#allocation11 + $0x268] sm:$0xf0] }
 0x1ba   :  { %2851 = vmatpush.bf16.msrb.mxu1 %v4409_v32  ;;  %v4827_v32 = vld [vmem:[#allocation11 + $0xe4] sm:$0xf0] }
 0x1bc   :  { %2881 = vmatpush.bf16.msrb.mxu3 %v4365_v51  ;;  %v4890_v51 = vld [vmem:[#allocation11 + $0x2e4] sm:$0xf] }
 0x1be   :  { %2852 = vmatpush.bf16.msrb.mxu1 %v4385_v40  ;;  %v4273_v40 = vor.u32 %v4827_v32, %v4272_v30  ;;  %v4440_v30 = vld [vmem:[#allocation11 + $0x220] sm:$0xf]  ;;  %v4442_v32 = vld [vmem:[#allocation11 + $0x238] sm:$0xf0] }
 0x1c2   :  { %2853 = vmatpush.bf16.msrb.mxu1 %v4361_v49 }
 0x1da   :  { %v2105_v39 = vpop.f32.mrf.mxu2 }
 0x1db   :  { %v2106_v59 = vadd.f32 %v2105_v39, %v2092_v55  ;;  %v4224_v55 = vld [vmem:[#allocation11 + $0x70] sm:$0xf] }
 0x1e2   :  { %v2107_v52 = vpop.f32.mrf.mxu2 }
 0x1e3   :  { %v2108_v61 = vadd.f32 %v2107_v52, %v2094_v58  ;;  %v4538_v52 = vld [vmem:[#allocation11 + $0x2f8] sm:$0xf0]  ;;  %v4815_v58 = vld [vmem:[#allocation11 + $0x84] sm:$0xf0] }
 0x1e4   :  { %v4541_v60 = vor.u32 %v4890_v51, %v4538_v52  ;;  %v4225_v6 = vor.u32 %v4815_v58, %v4224_v55  ;;  %v4848_v51 = vld [vmem:[#allocation11 + $0x194] sm:$0xf]  ;;  %v4370_v52 = vld [vmem:[#allocation11 + $0x1a8] sm:$0xf0] }
 0x1ea   :  { %v2161_v4 = vpop.f32.mrf.mxu2 }
 0x1eb   :  { %v2162_v39 = vadd.f32 %v2161_v4, %v2148_v23  ;;  %v4809_v4 = vld [vmem:[#allocation11 + $0x54] sm:$0xf0] }
 0x1ec   :  { %v4201_v15 = vor.u32 %v4809_v4, %v4200_v3 }
 0x1f2   :  { %v2163_v35 = vpop.f32.mrf.mxu2 }
 0x1f3   :  { %v2164_v36 = vadd.f32 %v2163_v35, %v2150_v31  ;;  %v4465_v35 = vor.u32 %v4875_v24, %v4464_v22  ;;  %v4869_v31 = vld [vmem:[#allocation11 + $0x234] sm:$0xf0] }
 0x1f4   :  { %v4441_v33 = vor.u32 %v4869_v31, %v4440_v30 }
 0x202   :  { %v2119_v53 = vpop.f32.mrf.mxu3 }
 0x203   :  { %v2120_v62 = vadd.f32 %v2119_v53, %v2106_v59  ;;  %v4253_v59 = vor.u32 %v4818_v47, %v4250_v48  ;;  %v4393_v47 = vor.u32 %v4857_v44, %v4392_v43  ;;  %v4397_v48 = vor.u32 %v4854_v45, %v4394_v46 }
 0x205   :  { %v2180_v5 = vmax.f32 %v2120_v62, 0.0  ;;  %v4887_v62 = vld [vmem:[#allocation11 + $0x2c4] sm:$0xf0] }
 0x20a   :  { %v2121_v57 = vpop.f32.mrf.mxu3 }
 0x20b   :  { %v2122_v1 = vadd.f32 %v2121_v57, %v2108_v61  ;;  %v4512_v61 = vld [vmem:[#allocation11 + $0x2b0] sm:$0xf]  ;;  %v4226_v57 = vld [vmem:[#allocation11 + $0x88] sm:$0xf0] }
 0x20c   :  { %v4513_v2 = vor.u32 %v4887_v62, %v4512_v61 }
 0x20d   :  { %v2182_v7 = vmax.f32 %v2122_v1, 0.0  ;;  %v4514_v1 = vld [vmem:[#allocation11 + $0x2c8] sm:$0xf0] }
 0x20f   :  { %v5294_v12 = vpack.c.bf16 %v2182_v7, %v2180_v5  ;;  %v4229_v5 = vor.u32 %v4812_v63, %v4226_v57  ;;  %v4517_v7 = vor.u32 %v4884_v0, %v4514_v1 }
 0x211   :  { %2784 = vmatmul.bf16.vlgmr.msra.gmra.mxu0 %v5294_v12  ;;  %2812 = vmatmul.bf16.vlgmr.msra.gmra.mxu2 %v5294_v12 }
 0x212   :  { %v2175_v18 = vpop.f32.mrf.mxu3  ;;  %2888 = vmatpush.bf16.msra.mxu0 %v4345_v9  ;;  %2916 = vmatpush.bf16.msra.mxu2 %v4349_v10  ;;  %v4881_v9 = vld [vmem:[#allocation11 + $0x294] sm:$0xf0]  ;;  %v4806_v10 = vld [vmem:[#allocation11 + $0x44] sm:$0xf] }
 0x213   :  { %v2176_v37 = vadd.f32 %v2175_v18, %v2162_v39  ;;  %v4489_v16 = vor.u32 %v4881_v9, %v4488_v8  ;;  %v4176_v18 = vld [vmem:[#allocation11 + $0x10] sm:$0xf]  ;;  %v4866_v39 = vld [vmem:[#allocation11 + $0x224] sm:$0xf] }
 0x214   :  { %v4445_v34 = vor.u32 %v4866_v39, %v4442_v32 }
 0x215   :  { %v2181_v49 = vmax.f32 %v2176_v37, 0.0  ;;  %v4863_v37 = vld [vmem:[#allocation11 + $0x204] sm:$0xf0] }
 0x216   :  { %2889 = vmatpush.bf16.msra.mxu0 %v4321_v19  ;;  %2917 = vmatpush.bf16.msra.mxu2 %v4325_v20  ;;  %v4803_v19 = vld [vmem:[#allocation11 + $0x24] sm:$0xf0]  ;;  %v4205_v20 = vor.u32 %v4806_v10, %v4202_v11 }
 0x217   :  { %v4177_v23 = vor.u32 %v4803_v19, %v4176_v18 }
 0x21a   :  { %v2177_v38 = vpop.f32.mrf.mxu3  ;;  %2890 = vmatpush.bf16.msra.mxu0 %v4297_v56  ;;  %2918 = vmatpush.bf16.msra.mxu2 %v4301_v29  ;;  %v4181_v56 = vor.u32 %v4800_v25, %v4178_v26  ;;  %v4469_v29 = vor.u32 %v4872_v27, %v4466_v28 }
 0x21b   :  { %v2178_v42 = vadd.f32 %v2177_v38, %v2164_v36  ;;  %v4416_v36 = vld [vmem:[#allocation11 + $0x1f0] sm:$0xf]  ;;  %v4860_v38 = vld [vmem:[#allocation11 + $0x1f4] sm:$0xf] }
 0x21d   :  { %v2183_v50 = vmax.f32 %v2178_v42, 0.0 }
 0x21e   :  { %2891 = vmatpush.bf16.msra.mxu0 %v4273_v40  ;;  %2919 = vmatpush.bf16.msra.mxu2 %v4277_v41  ;;  %v4418_v40 = vld [vmem:[#allocation11 + $0x208] sm:$0xf0]  ;;  %v4417_v41 = vor.u32 %v4863_v37, %v4416_v36 }
 0x21f   :  { %v5298_v53 = vpack.c.bf16 %v2183_v50, %v2181_v49  ;;  %v4421_v42 = vor.u32 %v4860_v38, %v4418_v40  ;;  %v4368_v49 = vld [vmem:[#allocation11 + $0x190] sm:$0xf]  ;;  %v4851_v50 = vld [vmem:[#allocation11 + $0x1a4] sm:$0xf0] }
 0x221   :  { %2798 = vmatmul.bf16.vlgmr.msra.gmra.mxu1 %v5298_v53  ;;  %2826 = vmatmul.bf16.vlgmr.msra.gmra.mxu3 %v5298_v53 }
 0x222   :  { %2840 = vmatmul.bf16.vlgmr.msrb.gmra.mxu0 %v5294_v12  ;;  %2868 = vmatmul.bf16.vlgmr.msrb.gmra.mxu2 %v5294_v12 }
 0x223   :  { %2892 = vmatpush.bf16.msra.mxu0 %v4249_v54  ;;  %2902 = vmatpush.bf16.msra.mxu1 %v4537_v17  ;;  %v4369_v54 = vor.u32 %v4851_v50, %v4368_v49 }
 0x224   :  { %2920 = vmatpush.bf16.msra.mxu2 %v4253_v59  ;;  %2930 = vmatpush.bf16.msra.mxu3 %v4541_v60 }
 0x227   :  { %2893 = vmatpush.bf16.msra.mxu0 %v4225_v6  ;;  %2903 = vmatpush.bf16.msra.mxu1 %v4513_v2  ;;  %v5310_v2 = vld [vmem:[#allocation13] sm:$0x3f] }
 0x228   :  { %2921 = vmatpush.bf16.msra.mxu2 %v4229_v5  ;;  %2931 = vmatpush.bf16.msra.mxu3 %v4517_v7  ;;  %v2285_v4 = vperm.slane %v5310_v2, 1  ;;  %v2286_v8 = vperm.slane %v5310_v2, 2  ;;  %v2287_v10 = vperm.slane %v5310_v2, 3  ;;  %v2289_v28 = vperm.slane %v5310_v2, 5 }
 0x22b   :  { %2894 = vmatpush.bf16.msra.mxu0 %v4201_v15  ;;  %2904 = vmatpush.bf16.msra.mxu1 %v4489_v16  ;;  %v2288_v16 = vperm.slane %v5310_v2, 4 }
 0x22c   :  { %2922 = vmatpush.bf16.msra.mxu2 %v4205_v20  ;;  %2932 = vmatpush.bf16.msra.mxu3 %v4493_v21 }
 0x22f   :  { %2895 = vmatpush.bf16.msra.mxu0 %v4177_v23  ;;  %2905 = vmatpush.bf16.msra.mxu1 %v4465_v35 }
 0x230   :  { %2923 = vmatpush.bf16.msra.mxu2 %v4181_v56  ;;  %2933 = vmatpush.bf16.msra.mxu3 %v4469_v29 }
 0x231   :  { %2854 = vmatmul.bf16.vlgmr.msrb.gmra.mxu1 %v5298_v53  ;;  %2882 = vmatmul.bf16.vlgmr.msrb.gmra.mxu3 %v5298_v53 }
 0x232   :  { %2896 = vmatmul.bf16.vlgmr.msra.gmra.mxu0 %v5294_v12 }
 0x233   :  { %2924 = vmatmul.bf16.vlgmr.msra.gmra.mxu2 %v5294_v12  ;;  %2906 = vmatpush.bf16.msra.mxu1 %v4441_v33  ;;  %v4373_v12 = vor.u32 %v4848_v51, %v4370_v52 }
 0x234   :  { %2934 = vmatpush.bf16.msra.mxu3 %v4445_v34 }
 0x237   :  { %2907 = vmatpush.bf16.msra.mxu1 %v4417_v41 }
 0x238   :  { %2935 = vmatpush.bf16.msra.mxu3 %v4421_v42 }
 0x23b   :  { %2908 = vmatpush.bf16.msra.mxu1 %v4393_v47 }
 0x23c   :  { %2936 = vmatpush.bf16.msra.mxu3 %v4397_v48 }
 0x23f   :  { %2909 = vmatpush.bf16.msra.mxu1 %v4369_v54 }
 0x240   :  { %2937 = vmatpush.bf16.msra.mxu3 %v4373_v12 }
 0x242   :  { %2910 = vmatmul.bf16.vlgmr.msra.gmra.mxu1 %v5298_v53 }
 0x243   :  { %2938 = vmatmul.bf16.vlgmr.msra.gmra.mxu3 %v5298_v53  ;;  %v2284_v53 = vperm.slane %v5310_v2, 0 }
 0x28e   :  { %v2785_v17 = vpop.f32.mrf.mxu0 }
 0x28f   :  { %v2786_v13 = vadd.f32 %v2785_v17, %v2284_v53 }
 0x294   :  { %v2813_v55 = vpop.f32.mrf.mxu2 }
 0x295   :  { %v2814_v9 = vadd.f32 %v2813_v55, %v2285_v4 }
 0x296   :  { %v2787_v58 = vpop.f32.mrf.mxu0 }
 0x297   :  { %v2788_v31 = vadd.f32 %v2787_v58, %v2284_v53 }
 0x29c   :  { %v2815_v60 = vpop.f32.mrf.mxu2 }
 0x29d   :  { %v2816_v27 = vadd.f32 %v2815_v60, %v2285_v4 }
 0x29e   :  { %v2799_v59 = vpop.f32.mrf.mxu1 }
 0x29f   :  { %v2841_v62 = vpop.f32.mrf.mxu0  ;;  %v5319_v19 = vadd.f32 %v2799_v59, %v2786_v13 }
 0x2a0   :  { %v2842_v14 = vadd.f32 %v2841_v62, %v2286_v8 }
 0x2a1   :  { %v2967_v35 = vmul.f32 %v5319_v19, %v5319_v19 }
 0x2a4   :  { %v2827_v61 = vpop.f32.mrf.mxu3 }
 0x2a5   :  { %v2869_v57 = vpop.f32.mrf.mxu2  ;;  %v5316_v15 = vadd.f32 %v2827_v61, %v2814_v9 }
 0x2a6   :  { %v2801_v63 = vpop.f32.mrf.mxu1  ;;  %v2870_v20 = vadd.f32 %v2869_v57, %v2287_v10 }
 0x2a7   :  { %v2843_v6 = vpop.f32.mrf.mxu0  ;;  %v2968_v22 = vmul.f32 %v5316_v15, %v5316_v15  ;;  %v2944_v56 = vadd.f32 %v5316_v15, %v5319_v19  ;;  %v5341_v38 = vadd.f32 %v2801_v63, %v2788_v31 }
 0x2a8   :  { %v2844_v39 = vadd.f32 %v2843_v6, %v2286_v8 }
 0x2a9   :  { %v2979_v33 = vadd.f32 %v2968_v22, %v2967_v35  ;;  %v2973_v12 = vmul.f32 %v5341_v38, %v5341_v38 }
 0x2ac   :  { %v2829_v0 = vpop.f32.mrf.mxu3 }
 0x2ad   :  { %v2871_v5 = vpop.f32.mrf.mxu2  ;;  %v5336_v32 = vadd.f32 %v2829_v0, %v2816_v27 }
 0x2ae   :  { %v2855_v1 = vpop.f32.mrf.mxu1  ;;  %v2872_v40 = vadd.f32 %v2871_v5, %v2287_v10 }
 0x2af   :  { %v2897_v11 = vpop.f32.mrf.mxu0  ;;  %v5321_v21 = vadd.f32 %v2855_v1, %v2842_v14  ;;  %v2974_v46 = vmul.f32 %v5336_v32, %v5336_v32  ;;  %v2951_v17 = vadd.f32 %v5336_v32, %v5341_v38  ;;  %v5162_v14 = vmov 768.0  }
 0x2b0   :  { %v2898_v24 = vadd.f32 %v2897_v11, %v2288_v16  ;;  %4912 = vrcp.f32 %v5162_v14 }
 0x2b1   :  { %v2969_v29 = vmul.f32 %v5321_v21, %v5321_v21  ;;  %v2945_v34 = vadd.f32 %v2944_v56, %v5321_v21  ;;  %v2986_v63 = vadd.f32 %v2974_v46, %v2973_v12 }
 0x2b3   :  { %v2980_v45 = vadd.f32 %v2979_v33, %v2969_v29 }
 0x2b4   :  { %v2883_v3 = vpop.f32.mrf.mxu3 }
 0x2b5   :  { %v5325_v25 = vadd.f32 %v2883_v3, %v2870_v20 }
 0x2b6   :  { %v2857_v7 = vpop.f32.mrf.mxu1  ;;  %v2925_v23 = vpop.f32.mrf.mxu2 }
 0x2b7   :  { %v2970_v36 = vmul.f32 %v5325_v25, %v5325_v25  ;;  %v2899_v37 = vpop.f32.mrf.mxu0  ;;  %v5343_v41 = vadd.f32 %v2857_v7, %v2844_v39  ;;  %v2926_v42 = vadd.f32 %v2925_v23, %v2289_v28  ;;  %v2946_v43 = vadd.f32 %v2945_v34, %v5325_v25 }
 0x2b8   :  { %v2900_v47 = vadd.f32 %v2899_v37, %v2288_v16  ;;  %v4913_v16 = vpop.eup %4912 }
 0x2b9   :  { %v2981_v54 = vadd.f32 %v2980_v45, %v2970_v36  ;;  %v2975_v55 = vmul.f32 %v5343_v41, %v5343_v41  ;;  %v2952_v57 = vadd.f32 %v2951_v17, %v5343_v41  ;;  %vm2963_vm0 = vweird.f32 %v4913_v16 }
 0x2bb   :  { %v2987_v6 = vadd.f32 %v2986_v63, %v2975_v55 }
 0x2bc   :  { %v2885_v18 = vpop.f32.mrf.mxu3 }
 0x2bd   :  { %v5350_v49 = vadd.f32 %v2885_v18, %v2872_v40  ;;  %v2959_v18 = vmul.f32 768.0, %v4913_v16 }
 0x2be   :  { %v2927_v62 = vpop.f32.mrf.mxu2 }
 0x2bf   :  { %v2911_v26 = vpop.f32.mrf.mxu1  ;;  %v2976_v0 = vmul.f32 %v5350_v49, %v5350_v49  ;;  %v2953_v2 = vadd.f32 %v2952_v57, %v5350_v49  ;;  %v2928_v3 = vadd.f32 %v2927_v62, %v2289_v28  ;;  %v2960_v20 = vsub.f32 1.0, %v2959_v18 }
 0x2c0   :  { %v5334_v30 = vadd.f32 %v2911_v26, %v2898_v24 }
 0x2c1   :  { %v2988_v8 = vadd.f32 %v2987_v6, %v2976_v0  ;;  %v2961_v22 = vmul.f32 %v4913_v16, %v2960_v20 }
 0x2c2   :  { %v2971_v44 = vmul.f32 %v5334_v30, %v5334_v30  ;;  %v2947_v52 = vadd.f32 %v2946_v43, %v5334_v30 }
 0x2c3   :  { %v2962_v24 = vadd.f32 %v4913_v16, %v2961_v22 }
 0x2c4   :  { %v2982_v61 = vadd.f32 %v2981_v54, %v2971_v44 }
 0x2c5   :  { %v2964_v26 = vsel %vm2963_vm0, %v4913_v16, %v2962_v24 }
 0x2c6   :  { %v2939_v48 = vpop.f32.mrf.mxu3 }
 0x2c7   :  { %v5352_v50 = vadd.f32 %v2939_v48, %v2926_v42  ;;  %v2913_v51 = vpop.f32.mrf.mxu1 }
 0x2c8   :  { %v5361_v58 = vadd.f32 %v2913_v51, %v2900_v47  ;;  %v5389_v47 = vld [vmem:[%s5462_s7] sm:$0x3f]  ;;  %s5163_s7 = smov [#allocation16]  }
 0x2c9   :  { %v2948_v59 = vadd.f32 %v2947_v52, %v5352_v50  ;;  %v2972_v60 = vmul.f32 %v5352_v50, %v5352_v50  ;;  %v5391_v52 = vld [vmem:[#allocation14] sm:$0x3f]  ;;  %v3037_v54 = vperm.slane %v5389_v47, 0  ;;  %v3038_v12 = vperm.slane %v5389_v47, 1  ;;  %s3115_s28 = sshll.u32 %s5163_s7, 4  ;;  %s3116_s28 = int_to_ptr.vmem [resolvable:$true] %s3115_s28 }
 0x2ca   :  { %v2977_v4 = vmul.f32 %v5361_v58, %v5361_v58  ;;  %v2954_v53 = vadd.f32 %v2953_v2, %v5361_v58  ;;  %v3039_v17 = vperm.slane %v5389_v47, 2  ;;  %v3040_v55 = vperm.slane %v5389_v47, 3 }
 0x2cb   :  { %2949 = vadd.xlane.f32.xlu0 %v2948_v59  ;;  %v2983_v1 = vadd.f32 %v2982_v61, %v2972_v60  ;;  %v3041_v59 = vperm.slane %v5389_v47, 4  ;;  %v3042_v60 = vperm.slane %v5389_v47, 5  ;;  %v3075_v63 = vperm.slane %v5391_v52, 0 }
 0x2cc   :  { %v2989_v11 = vadd.f32 %v2988_v8, %v2977_v4  ;;  %v3076_v57 = vperm.slane %v5391_v52, 1  ;;  %v3077_v0 = vperm.slane %v5391_v52, 2  ;;  %v3080_v8 = vperm.slane %v5391_v52, 5 }
 0x2cd   :  { %2984 = vadd.xlane.f32.xlu1 %v2983_v1  ;;  %v3078_v1 = vperm.slane %v5391_v52, 3 }
 0x2ce   :  { %v2941_v5 = vpop.f32.mrf.mxu3 }
 0x2cf   :  { %v5372_v7 = vadd.f32 %v2941_v5, %v2928_v3  ;;  %v3079_v3 = vperm.slane %v5391_v52, 4 }
 0x2d1   :  { %v2955_v9 = vadd.f32 %v2954_v53, %v5372_v7  ;;  %v2978_v10 = vmul.f32 %v5372_v7, %v5372_v7 }
 0x2d3   :  { %2956 = vadd.xlane.f32.xlu0 %v2955_v9  ;;  %v2990_v13 = vadd.f32 %v2989_v11, %v2978_v10 }
 0x2d5   :  { %2991 = vadd.xlane.f32.xlu1 %v2990_v13 }
 0x33e   :  { %v2950_v27 = vpop.xlane.xlu0 %2949 }
 0x33f   :  { %v5378_v28 = vmul.f32 %v2964_v26, %v2950_v27 }
 0x340   :  { %v2985_v23 = vpop.xlane.xlu1 %2984 }
 0x341   :  { %v2993_v35 = vmul.f32 %v2985_v23, %v2964_v26  ;;  %v2995_v56 = vmul.f32 %v5378_v28, %v5378_v28  ;;  %v3023_v4 = vsub.f32 %v5319_v19, %v5378_v28  ;;  %v3024_v5 = vsub.f32 %v5316_v15, %v5378_v28 }
 0x342   :  { %v3025_v53 = vsub.f32 %v5321_v21, %v5378_v28  ;;  %v3026_v10 = vsub.f32 %v5325_v25, %v5378_v28  ;;  %v3027_v11 = vsub.f32 %v5334_v30, %v5378_v28  ;;  %v3028_v15 = vsub.f32 %v5352_v50, %v5378_v28 }
 0x343   :  { %v2997_v29 = vsub.f32 %v2993_v35, %v2995_v56 }
 0x345   :  { %v2999_v31 = vmax.f32 %v2997_v29, 0.0 }
 0x346   :  { %v2957_v39 = vpop.xlane.xlu0 %2956 }
 0x347   :  { %v3001_v33 = vadd.f32 1e-05, %v2999_v31  ;;  %v5382_v34 = vmul.f32 %v2964_v26, %v2957_v39 }
 0x348   :  { %v2992_v36 = vpop.xlane.xlu1 %2991 }
 0x349   :  { %4914 = vrsqrt.f32 %v3001_v33  ;;  %v2994_v37 = vmul.f32 %v2992_v36, %v2964_v26  ;;  %v2996_v40 = vmul.f32 %v5382_v34, %v5382_v34  ;;  %vm3009_vm2 = vweird.f32 %v3001_v33 }
 0x34a   :  { %v3029_v36 = vsub.f32 %v5341_v38, %v5382_v34  ;;  %v3033_v38 = vsub.f32 %v5361_v58, %v5382_v34 }
 0x34b   :  { %v2998_v42 = vsub.f32 %v2994_v37, %v2996_v40  ;;  %v3030_v37 = vsub.f32 %v5336_v32, %v5382_v34  ;;  %v3034_v32 = vsub.f32 %v5372_v7, %v5382_v34 }
 0x34d   :  { %v3000_v43 = vmax.f32 %v2998_v42, 0.0 }
 0x34f   :  { %v4915_v44 = vpop.eup %4914  ;;  %v3002_v45 = vadd.f32 1e-05, %v3000_v43 }
 0x350   :  { %v3004_v46 = vmul.f32 %v4915_v44, %v3001_v33  ;;  %vm3010_vm1 = vweird.f32 %v4915_v44 }
 0x351   :  { %4916 = vrsqrt.f32 %v3002_v45  ;;  %vm3011_vm3 = vmor %vm3009_vm2, %vm3010_vm1  ;;  %vm3019_vm5 = vweird.f32 %v3002_v45 }
 0x352   :  { %v3005_v48 = vmul.f32 %v4915_v44, %v3004_v46 }
 0x354   :  { %v3006_v51 = vmul.f32 0.5, %v3005_v48 }
 0x356   :  { %v3007_v61 = vsub.f32 1.5, %v3006_v51 }
 0x357   :  { %v4917_v62 = vpop.eup %4916 }
 0x358   :  { %v3008_v6 = vmul.f32 %v4915_v44, %v3007_v61  ;;  %v3014_v2 = vmul.f32 %v4917_v62, %v3002_v45  ;;  %vm3020_vm4 = vweird.f32 %v4917_v62  ;;  %v3032_v45 = vsub.f32 %v5350_v49, %v5382_v34 }
 0x359   :  { %vm3021_vm6 = vmor %vm3019_vm5, %vm3020_vm4 }
 0x35a   :  { %v3012_v9 = vsel %vm3011_vm3, %v4915_v44, %v3008_v6  ;;  %v3015_v13 = vmul.f32 %v4917_v62, %v3014_v2  ;;  %v3031_v44 = vsub.f32 %v5343_v41, %v5382_v34 }
 0x35b   :  { %v3049_v14 = vmul.f32 %v3037_v54, %v3012_v9  ;;  %v3050_v16 = vmul.f32 %v3038_v12, %v3012_v9  ;;  %v3051_v18 = vmul.f32 %v3039_v17, %v3012_v9  ;;  %v3052_v19 = vmul.f32 %v3040_v55, %v3012_v9 }
 0x35c   :  { %v3053_v20 = vmul.f32 %v3041_v59, %v3012_v9  ;;  %v3054_v22 = vmul.f32 %v3042_v60, %v3012_v9  ;;  %v3016_v21 = vmul.f32 0.5, %v3015_v13 }
 0x35d   :  { %v3061_v24 = vmul.f32 %v3049_v14, %v3023_v4  ;;  %v3062_v26 = vmul.f32 %v3050_v16, %v3024_v5  ;;  %v3063_v27 = vmul.f32 %v3051_v18, %v3025_v53  ;;  %v3064_v23 = vmul.f32 %v3052_v19, %v3026_v10 }
 0x35e   :  { %v3065_v35 = vmul.f32 %v3053_v20, %v3027_v11  ;;  %v3066_v25 = vmul.f32 %v3054_v22, %v3028_v15  ;;  %v3017_v56 = vsub.f32 1.5, %v3016_v21 }
 0x35f   :  { %v3087_v30 = vadd.f32 %v3075_v63, %v3061_v24  ;;  %v3088_v29 = vadd.f32 %v3076_v57, %v3062_v26  ;;  %v3089_v50 = vadd.f32 %v3077_v0, %v3063_v27  ;;  %v3090_v28 = vadd.f32 %v3078_v1, %v3064_v23 }
 0x360   :  { %v3018_v31 = vmul.f32 %v4917_v62, %v3017_v56  ;;  %v3091_v39 = vadd.f32 %v3079_v3, %v3065_v35  ;;  %v3092_v33 = vadd.f32 %v3080_v8, %v3066_v25 }
 0x361   :  { %v3099_v40 = vpack.c.bf16 %v3088_v29, %v3087_v30  ;;  %v3100_v42 = vpack.c.bf16 %v3090_v28, %v3089_v50 }
 0x362   :  { %v3022_v43 = vsel %vm3021_vm6, %v4917_v62, %v3018_v31  ;;  %v3101_v46 = vpack.c.bf16 %v3092_v33, %v3091_v39 }
 0x363   :  { %v3055_v47 = vmul.f32 %v3037_v54, %v3022_v43  ;;  %v3056_v48 = vmul.f32 %v3038_v12, %v3022_v43  ;;  %v3057_v51 = vmul.f32 %v3039_v17, %v3022_v43  ;;  %v3058_v61 = vmul.f32 %v3040_v55, %v3022_v43  ;;  %3105 = vst [vmem:[#allocation16] sm:$0xff] %v3099_v40 }
 0x364   :  { %v3059_v6 = vmul.f32 %v3041_v59, %v3022_v43  ;;  %v3060_v62 = vmul.f32 %v3042_v60, %v3022_v43  ;;  %3106 = vst [vmem:[#allocation16 + $0x8] sm:$0xff] %v3100_v42 }
 0x365   :  { %v3067_v2 = vmul.f32 %v3055_v47, %v3029_v36  ;;  %v3068_v41 = vmul.f32 %v3056_v48, %v3030_v37  ;;  %v3069_v4 = vmul.f32 %v3057_v51, %v3031_v44  ;;  %v3070_v5 = vmul.f32 %v3058_v61, %v3032_v45  ;;  %3107 = vst [vmem:[#allocation16 + $0x10] sm:$0xff] %v3101_v46 }
 0x366   :  { %v3071_v49 = vmul.f32 %v3059_v6, %v3033_v38  ;;  %v3072_v54 = vmul.f32 %v3060_v62, %v3034_v32 }
 0x367   :  { %v3093_v12 = vadd.f32 %v3075_v63, %v3067_v2  ;;  %v3094_v17 = vadd.f32 %v3076_v57, %v3068_v41  ;;  %v3095_v58 = vadd.f32 %v3077_v0, %v3069_v4  ;;  %v3096_v7 = vadd.f32 %v3078_v1, %v3070_v5 }
 0x368   :  { %v3097_v34 = vadd.f32 %v3079_v3, %v3071_v49  ;;  %v3098_v55 = vadd.f32 %v3080_v8, %v3072_v54 }
 0x369   :  { %v3102_v59 = vpack.c.bf16 %v3094_v17, %v3093_v12  ;;  %v3103_v60 = vpack.c.bf16 %v3096_v7, %v3095_v58 }
 0x36a   :  { %v3104_v63 = vpack.c.bf16 %v3098_v55, %v3097_v34 }
 0x36b   :  { %3108 = vst [vmem:[#allocation16 + $0x18] sm:$0xff] %v3102_v59 }
 0x36c   :  { %3109 = vst [vmem:[#allocation16 + $0x20] sm:$0xff] %v3103_v60 }
 0x36d   :  { %3110 = vst [vmem:[#allocation16 + $0x28] sm:$0xff] %v3104_v63 }
 0x36e   :  { %3123 = dma.vmem_to_hbm [thread:$0]  %s3116_s28, 768, %s3118_s12, [#allocation4], %s5153_s29, %s5153_s29, %s5154_s30  }
 0x36f   :  { %5144 = dma.done.wait [#allocation4], 768  }
 0x370   :  { %5145 = vsyncadd [#allocation4], 4294966528 }
 0x371   :  { %3128 = vsyncpa [#allocation3], 1 }
 0x372   :  { %3129 = vsyncpa [#allocation6], 1 }
 0x373   :  { %3130 = vsyncpa [#allocation9], 1 }
 0x374   :  { %3131 = vsyncpa [#allocation12], 1 }
 0x375   :  { %3132 = vsyncpa [#allocation15], 1 }
 0x376   :  { %3133 = vsyncpa [#allocation4], 1 }

</bundles_post_ra>
